<compile_context>
chip_gen: v7x
topology: tpu7x:2x2x1
jax: 0.10.0
libtpu: 0.0.40
codegen_flags: <defaults>
</compile_context>

<pallas_src>
import jax
import jax.numpy as jnp
from jax.experimental import pallas as pl
from jax.experimental.pallas import tpu as pltpu


# ---------------------------------------------------------------------------
# Fused decoder kernel: one agent tile per grid step, modes folded onto lanes.
# All cross-lane work (GN stats, replication, gathers) runs on the MXU via
# constant block/selection matrices; the VPU only sees elementwise f32 ops.
# ---------------------------------------------------------------------------
def decoder_kernel(packed_ref,                        # [T, D+5] f32: x | ctr_s | ctr_c | 1
                   W1_ref, W2_ref, Wp_ref,            # bf16 per-mode pred weights
                   Wd1_ref,                           # f32  [2M, M*D] (coordinate precision)
                   Wd2_ref, Wad_ref, Wax_ref,         # bf16 AttDest weights
                   Wc1_ref, Wc2_ref, Wcf_ref,         # bf16 cls weights
                   A_ref,                             # f32 [M*D, M*D] GN block-averaging
                   Sx_ref,                            # f32 [D+5, M*D]  residual replication
                   So_ref,                            # f32 [D+5, M*P2] ctr tile + pred bias
                   Sc_ref,                            # f32 [D+5, 2M]   ctr_c replication
                   Sd_ref,                            # f32 [M*P2, 2M]  dest selection
                   V_ref,                             # f32 [17, M*D]   bias/gamma/beta pack
                   out_ref):                          # [T, M*P2 + M]
    f32 = jnp.float32
    hi = jax.lax.Precision.HIGHEST

    xin = packed_ref[...]                             # f32 [T, D+5]
    xin_b = xin.astype(W1_ref.dtype)                  # bf16 copy (ctr/one lanes hit 0-rows)

    V = V_ref[...]
    b1, g1, be1, b2, g2, be2 = (V[i:i + 1] for i in range(6))
    bd1, gd2, bed2, ga, bea = (V[i:i + 1] for i in range(6, 11))
    bc1, gc1, bec1, bc2, gc2, bec2 = (V[i:i + 1] for i in range(11, 17))

    A = A_ref[...]

    def mm(a, w_ref):                                 # bf16 operands, f32 accumulate (MXU)
        return jnp.dot(a.astype(w_ref.dtype), w_ref[...], preferred_element_type=f32)

    def f32mm(a, w):                                  # exact f32 matmul (MXU multi-pass)
        return jnp.dot(a, w, preferred_element_type=f32, precision=hi)

    def gn(h, gamma, beta, eps=1e-5):
        # GroupNorm(ng=1) per mode: stats via MXU block-averaging matmul (f32).
        mu = f32mm(h, A)
        ms = f32mm(h * h, A)
        var = jnp.maximum(ms - mu * mu, 0.0)
        return (h - mu) * jax.lax.rsqrt(var + eps) * gamma + beta

    # loop-invariant projections of the packed input (f32, exact 0/1 selectors)
    x_rep = f32mm(xin, Sx_ref[...])                   # [T, M*D]   residual replication
    off = f32mm(xin, So_ref[...])                     # [T, M*P2]  per-point ctr + pred bias
    ctr_r = f32mm(xin, Sc_ref[...])                   # [T, 2M]    per-mode ctr_c

    # ---- per-mode pred heads: LinearRes -> Linear(D, 2P), modes on lanes ----
    h = mm(xin_b, W1_ref) + b1
    h = jnp.maximum(gn(h, g1, be1), 0.0)
    h = mm(h, W2_ref) + b2
    h = jnp.maximum(gn(h, g2, be2) + x_rep, 0.0)
    reg = mm(h, Wp_ref) + off                         # pred + bias + per-agent center

    # ---- AttDest: dist MLP + (dist, agents) linear, modes on lanes ----
    dest = f32mm(reg, Sd_ref[...])                    # last trajectory point per mode
    dist = ctr_r - dest                               # [T, 2M]
    d = jnp.maximum(f32mm(dist, Wd1_ref[...]) + bd1, 0.0)
    d = jnp.maximum(gn(mm(d, Wd2_ref), gd2, bed2), 0.0)
    # cat([d, x]) @ Wa  ==  d @ Wa[:D] + x @ Wa[D:]  (x half shared across modes)
    feats = jnp.maximum(gn(mm(d, Wad_ref) + mm(xin_b, Wax_ref), ga, bea), 0.0)

    # ---- cls head: LinearRes -> Linear(D, 1), modes on lanes ----
    c = mm(feats, Wc1_ref) + bc1
    c = jnp.maximum(gn(c, gc1, bec1), 0.0)
    c = mm(c, Wc2_ref) + bc2
    c = jnp.maximum(gn(c, gc2, bec2) + feats, 0.0)
    logit = mm(c, Wcf_ref)    # shared scalar cls bias dropped: softmax is shift-invariant

    # softmax over modes — EXACT divide (approx reciprocal broke sum-to-1)
    e = jnp.exp(logit - jnp.max(logit, axis=-1, keepdims=True))
    cls = e / jnp.sum(e, axis=-1, keepdims=True)

    out_ref[...] = jnp.concatenate([reg, cls], axis=-1)   # single lane-dense store


# ---------------------------------------------------------------------------
# Weight fusion: fold the mode dimension into the weights and build the
# constant selection / averaging matrices.  Packed input layout:
# [x (D) | ctr_scatter (2) | ctr_cat (2) | 1]  ->  D + 5 lanes.
# ---------------------------------------------------------------------------
_FUSED_ORDER = ('W1f', 'W2f', 'Wpf', 'Wd1f', 'Wd2f', 'Wadf', 'Waxf',
                'Wc1f', 'Wc2f', 'Wcff', 'A_gn', 'Sx', 'So', 'Sc', 'Sd', 'V')
_MXU_WEIGHTS = ('W1f', 'W2f', 'Wpf', 'Wd2f', 'Wadf', 'Waxf', 'Wc1f', 'Wc2f', 'Wcff')


def _block_diag(blocks):
    a, b = blocks[0].shape
    out = jnp.zeros((len(blocks) * a, len(blocks) * b), jnp.float32)
    for m, blk in enumerate(blocks):
        out = out.at[m * a:(m + 1) * a, m * b:(m + 1) * b].set(blk)
    return out


def fuse_params(params, mxu_dtype=jnp.bfloat16):
    W1, W2, Wp, Vm, Bp = (params[k] for k in ('W1', 'W2', 'Wp', 'Vm', 'Bp'))
    M, D, _ = W1.shape
    P2 = Wp.shape[-1]
    P = P2 // 2
    D5 = D + 5
    Wa = params['Wa']

    def top_rows(w):          # place w in the leading rows of a zero [D5, cols] matrix
        return jnp.zeros((D5, w.shape[1]), jnp.float32).at[:w.shape[0]].set(w)

    eye2 = jnp.eye(2, dtype=jnp.float32)
    eyeD = jnp.eye(D, dtype=jnp.float32)

    So = jnp.zeros((D5, M * P2), jnp.float32)
    So = So.at[D:D + 2].set(jnp.tile(eye2, (1, M * P)))      # ctr_s -> every (x, y) point
    So = So.at[D + 4].set(Bp.reshape(-1))                    # pred bias via the ones-lane
    Sc = jnp.zeros((D5, 2 * M), jnp.float32)
    Sc = Sc.at[D + 2:D + 4].set(jnp.tile(eye2, (1, M)))      # ctr_cat repeated per mode
    Sd = jnp.zeros((M * P2, 2 * M), jnp.float32)
    for m in range(M):
        Sd = Sd.at[m * P2 + P2 - 2, 2 * m].set(1.0)          # dest x of mode m
        Sd = Sd.at[m * P2 + P2 - 1, 2 * m + 1].set(1.0)      # dest y of mode m

    fused = {
        'W1f': top_rows(jnp.concatenate([W1[m] for m in range(M)], axis=1)),  # [D5, M*D]
        'W2f': _block_diag([W2[m] for m in range(M)]),                         # [M*D, M*D]
        'Wpf': _block_diag([Wp[m] for m in range(M)]),                         # [M*D, M*P2]
        'Wd1f': _block_diag([params['Wd1']] * M),                              # f32 [2M, M*D]
        'Wd2f': _block_diag([params['Wd2']] * M),
        'Wadf': _block_diag([Wa[:D]] * M),                                     # dist half of Wa
        'Waxf': top_rows(jnp.tile(Wa[D:], (1, M))),                            # agent half (shared)
        'Wc1f': _block_diag([params['Wc1']] * M),
        'Wc2f': _block_diag([params['Wc2']] * M),
        'Wcff': _block_diag([params['Wcf']] * M),                              # [M*D, M]
        'A_gn': _block_diag([jnp.full((D, D), 1.0 / D, jnp.float32)] * M),     # GN averaging
        'Sx': top_rows(jnp.tile(eyeD, (1, M))),                                # residual replicate
        'So': So, 'Sc': Sc, 'Sd': Sd,
        'V': jnp.concatenate([jnp.transpose(Vm, (1, 0, 2)).reshape(6, M * D),
                              jnp.tile(params['Va'], (1, M)),
                              jnp.tile(params['Vc'], (1, M))], axis=0),        # [17, M*D]
    }
    return {k: (v.astype(mxu_dtype) if k in _MXU_WEIGHTS else v.astype(jnp.float32))
            for k, v in fused.items()}


# ---------------------------------------------------------------------------
# pallas_call wrapper (returns un-sorted reg/cls) + full forward with glue.
# ---------------------------------------------------------------------------
def _decoder_core(fused, agents, ctr_scatter, ctr_cat, tile=128):
    N, D = agents.shape
    MD = fused['W2f'].shape[0]
    M = MD // D
    MP2 = fused['Wpf'].shape[1]
    P2 = MP2 // M
    P = P2 // 2

    # Adaptive tile (sweep 128/256/512 for large N): shrink toward N for tiny
    # inputs and keep >= 2 grid steps when possible so v7x's two TensorCores
    # both get agent tiles ("parallel" grid axis).
    tile = max(8, min(tile, 8 * pl.cdiv(pl.cdiv(N, 2), 8)))
    n_pad = pl.cdiv(N, tile) * tile

    packed = jnp.concatenate(
        [agents.astype(jnp.float32), ctr_scatter, ctr_cat,
         jnp.ones((N, 1), jnp.float32)], axis=1)                 # [N, D+5]
    packed = jnp.pad(packed, ((0, n_pad - N), (0, 0)))

    out = pl.pallas_call(
        decoder_kernel,
        grid=(n_pad // tile,),
        in_specs=([pl.BlockSpec((tile, D + 5), lambda i: (i, 0))]
                  + [pl.BlockSpec(fused[k].shape, lambda i: (0, 0))
                     for k in _FUSED_ORDER]),
        out_specs=pl.BlockSpec((tile, MP2 + M), lambda i: (i, 0)),
        out_shape=jax.ShapeDtypeStruct((n_pad, MP2 + M), jnp.float32),
        compiler_params=pltpu.CompilerParams(dimension_semantics=("parallel",)),
    )(packed, *[fused[k] for k in _FUSED_ORDER])

    reg = out[:N, :MP2].reshape(N, M, P, 2)
    cls = out[:N, MP2:]
    return reg, cls


def simple_decoder_forward(params, agents, agent_ids, agent_ctrs,
                           tile=128, mxu_dtype=jnp.bfloat16):
    N = agents.shape[0]
    # Centers in the order the per-scenario indexed add uses (reg[ids] += ctrs).
    # TODO(synk): ragged per-scenario list indexing / output packaging stays
    # plain-JAX glue; assumes agent_ids are disjoint across scenarios.
    ctr_scatter = jnp.zeros((N, 2), jnp.float32)
    for ids, ctrs in zip(agent_ids, agent_ctrs):
        ctr_scatter = ctr_scatter.at[ids].set(ctrs)
    # Centers in torch.cat(agent_ctrs, 0) order (AttDest input, row-aligned with agents).
    ctr_cat = jnp.concatenate(agent_ctrs, axis=0)
    assert ctr_cat.shape[0] == N

    fused = fuse_params(params, mxu_dtype=mxu_dtype)
    reg, cls = _decoder_core(fused, agents, ctr_scatter, ctr_cat, tile=tile)

    # descending sort over modes + gather of reg (glue: pure index shuffle)
    order = jnp.argsort(-cls, axis=1)
    cls_sorted = jnp.take_along_axis(cls, order, axis=1)
    reg_sorted = jnp.take_along_axis(reg, order[:, :, None, None], axis=1)

    out = {'cls': [], 'reg': []}
    for ids in agent_ids:
        out['cls'].append(cls_sorted[ids])
        out['reg'].append(reg_sorted[ids])
    return out


# ---------------------------------------------------------------------------
# Deterministic parameter construction (shapes follow the torch __init__).
# ---------------------------------------------------------------------------
def init_params(key, n_agt, num_mode, pred_len):
    D, M, P2 = n_agt, num_mode, 2 * pred_len
    ks = jax.random.split(key, 16)

    def w(k, shape, scale=0.1):
        return (scale * jax.random.normal(k, shape)).astype(jnp.float32)

    params = {}
    params['W1'] = w(ks[0], (M, D, D))                # per-mode LinearRes linear1
    params['W2'] = w(ks[1], (M, D, D))                # per-mode LinearRes linear2
    Vm = jnp.zeros((M, 6, D), jnp.float32)            # b1, g1, be1, b2, g2, be2
    Vm = Vm.at[:, 0].set(w(ks[2], (M, D)))
    Vm = Vm.at[:, 1].set(1.0)
    Vm = Vm.at[:, 3].set(w(ks[3], (M, D)))
    Vm = Vm.at[:, 4].set(1.0)
    params['Vm'] = Vm
    params['Wp'] = w(ks[4], (M, D, P2))               # per-mode Linear(n_agt, 2*pred_len)
    params['Bp'] = w(ks[5], (M, P2))
    params['Wd1'] = w(ks[6], (2, D))                  # AttDest dist: Linear(2, n_agt)
    params['Wd2'] = w(ks[7], (D, D))                  # AttDest dist: Linear(n_agt, n_agt), no bias
    params['Wa'] = w(ks[8], (2 * D, D))               # AttDest agt:  Linear(2*n_agt, n_agt), no bias
    Va = jnp.zeros((5, D), jnp.float32)               # bd1, gd2, bed2, ga, bea
    Va = Va.at[0].set(w(ks[9], (D,)))
    Va = Va.at[1].set(1.0)
    Va = Va.at[3].set(1.0)
    params['Va'] = Va
    params['Wc1'] = w(ks[10], (D, D))                 # cls LinearRes linear1
    params['Wc2'] = w(ks[11], (D, D))                 # cls LinearRes linear2
    Vc = jnp.zeros((6, D), jnp.float32)               # bc1, gc1, bec1, bc2, gc2, bec2
    Vc = Vc.at[0].set(w(ks[12], (D,)))
    Vc = Vc.at[1].set(1.0)
    Vc = Vc.at[3].set(w(ks[13], (D,)))
    Vc = Vc.at[4].set(1.0)
    params['Vc'] = Vc
    params['Wcf'] = w(ks[14], (D, 1))                 # cls final Linear(n_agt, 1)
    params['bcf'] = w(ks[15], (1, 1))
    return params


# ---------------------------------------------------------------------------
# Pure-JAX f32 reference (un-fused, un-sorted) for a loose numerical check.
# ---------------------------------------------------------------------------
def _reference_forward(params, agents, ctr_scatter, ctr_cat):
    def gn(x, g, b, eps=1e-5):
        mu = x.mean(-1, keepdims=True)
        var = ((x - mu) ** 2).mean(-1, keepdims=True)
        return (x - mu) * jax.lax.rsqrt(var + eps) * g + b

    def linear_res(x, W1, b1, g1, be1, W2, b2, g2, be2):
        h = jnp.maximum(gn(x @ W1 + b1, g1, be1), 0.0)
        h = gn(h @ W2 + b2, g2, be2) + x
        return jnp.maximum(h, 0.0)

    M = params['W1'].shape[0]
    P2 = params['Wp'].shape[-1]
    P = P2 // 2
    N, D = agents.shape
    Vm, Va, Vc = params['Vm'], params['Va'], params['Vc']

    regs = []
    for m in range(M):
        h = linear_res(agents, params['W1'][m], Vm[m, 0], Vm[m, 1], Vm[m, 2],
                       params['W2'][m], Vm[m, 3], Vm[m, 4], Vm[m, 5])
        regs.append((h @ params['Wp'][m] + params['Bp'][m]).reshape(N, P, 2))
    reg = jnp.stack(regs, axis=1) + ctr_scatter[:, None, None, :]          # [N, M, P, 2]

    dest = reg[:, :, -1, :]                                                # [N, M, 2]
    dist = (ctr_cat[:, None, :] - dest).reshape(N * M, 2)
    d = jnp.maximum(dist @ params['Wd1'] + Va[0], 0.0)
    d = jnp.maximum(gn(d @ params['Wd2'], Va[1], Va[2]), 0.0)
    cat = jnp.concatenate([d, jnp.repeat(agents, M, axis=0)], axis=-1)
    feats = jnp.maximum(gn(cat @ params['Wa'], Va[3], Va[4]), 0.0)

    c = linear_res(feats, params['Wc1'], Vc[0], Vc[1], Vc[2],
                   params['Wc2'], Vc[3], Vc[4], Vc[5])
    logit = (c @ params['Wcf'] + params['bcf']).reshape(N, M)
    return reg, jax.nn.softmax(logit, axis=-1)


if __name__ == "__main__":
    n_agt, num_mode, pred_len = 32, 3, 4
    N = 16                                            # 2 scenarios x 8 agents
    key = jax.random.PRNGKey(0)
    k_par, k_agt, k_ctr = jax.random.split(key, 3)

    params = init_params(k_par, n_agt, num_mode, pred_len)
    agents = jax.random.normal(k_agt, (N, n_agt), dtype=jnp.float32)
    ctrs_all = 5.0 * jax.random.normal(k_ctr, (N, 2), dtype=jnp.float32)
    agent_ids = [jnp.arange(0, 8), jnp.arange(8, 16)]
    agent_ctrs = [ctrs_all[:8], ctrs_all[8:]]

    out = simple_decoder_forward(params, agents, agent_ids, agent_ctrs, tile=128)
    jax.block_until_ready(out)

    # numerical sanity vs pure-JAX f32 reference (loose tol: bf16 MXU operands)
    ctr_scatter = jnp.zeros((N, 2), jnp.float32)
    for ids, ctrs in zip(agent_ids, agent_ctrs):
        ctr_scatter = ctr_scatter.at[ids].set(ctrs)
    ctr_cat = jnp.concatenate(agent_ctrs, axis=0)
    reg_k, cls_k = _decoder_core(fuse_params(params), agents, ctr_scatter, ctr_cat, tile=128)
    reg_r, cls_r = _reference_forward(params, agents, ctr_scatter, ctr_cat)
    assert bool(jnp.allclose(reg_k, reg_r, atol=1e-1, rtol=1e-1))
    assert bool(jnp.allclose(cls_k, cls_r, atol=1e-1, rtol=1e-1))

    # structural checks on the final (sorted, per-scenario) outputs
    for ids, c, r in zip(agent_ids, out['cls'], out['reg']):
        assert c.shape == (len(ids), num_mode)
        assert r.shape == (len(ids), num_mode, pred_len, 2)
        assert bool(jnp.all(jnp.isfinite(c))) and bool(jnp.all(jnp.isfinite(r)))
        assert bool(jnp.allclose(jnp.sum(c, axis=-1), 1.0, atol=1e-3))
        assert bool(jnp.all(c[:, :-1] >= c[:, 1:] - 1e-6))   # descending over modes

    print("KERNEL_OK")
</pallas_src>

<mosaic_0001>
module attributes {stable_mosaic.version = 11 : i64} {
  func.func @decoder_kernel(%arg0: i32, %arg1: memref<8x37xf32, #tpu.memory_space<vmem>>, %arg2: memref<37x96xbf16, #tpu.memory_space<vmem>>, %arg3: memref<96x96xbf16, #tpu.memory_space<vmem>>, %arg4: memref<96x24xbf16, #tpu.memory_space<vmem>>, %arg5: memref<6x96xf32, #tpu.memory_space<vmem>>, %arg6: memref<96x96xbf16, #tpu.memory_space<vmem>>, %arg7: memref<96x96xbf16, #tpu.memory_space<vmem>>, %arg8: memref<37x96xbf16, #tpu.memory_space<vmem>>, %arg9: memref<96x96xbf16, #tpu.memory_space<vmem>>, %arg10: memref<96x96xbf16, #tpu.memory_space<vmem>>, %arg11: memref<96x3xbf16, #tpu.memory_space<vmem>>, %arg12: memref<96x96xf32, #tpu.memory_space<vmem>>, %arg13: memref<37x96xf32, #tpu.memory_space<vmem>>, %arg14: memref<37x24xf32, #tpu.memory_space<vmem>>, %arg15: memref<37x6xf32, #tpu.memory_space<vmem>>, %arg16: memref<24x6xf32, #tpu.memory_space<vmem>>, %arg17: memref<17x96xf32, #tpu.memory_space<vmem>>, %arg18: memref<8x27xf32, #tpu.memory_space<vmem>>) attributes {dimension_semantics = [#tpu.dimension_semantics<parallel>], iteration_bounds = array<i64: 2>, scalar_prefetch = 0 : i64, scratch_operands = 0 : i64, tpu.core_type = #tpu.core_type<tc>, window_params = [{transform_indices = @transform_0, window_bounds = array<i64: 8, 37>}, {pipeline_mode = #tpu.pipeline_mode<synchronous>, transform_indices = @transform_1, window_bounds = array<i64: 37, 96>}, {pipeline_mode = #tpu.pipeline_mode<synchronous>, transform_indices = @transform_2, window_bounds = array<i64: 96, 96>}, {pipeline_mode = #tpu.pipeline_mode<synchronous>, transform_indices = @transform_3, window_bounds = array<i64: 96, 24>}, {pipeline_mode = #tpu.pipeline_mode<synchronous>, transform_indices = @transform_4, window_bounds = array<i64: 6, 96>}, {pipeline_mode = #tpu.pipeline_mode<synchronous>, transform_indices = @transform_5, window_bounds = array<i64: 96, 96>}, {pipeline_mode = #tpu.pipeline_mode<synchronous>, transform_indices = @transform_6, window_bounds = array<i64: 96, 96>}, {pipeline_mode = #tpu.pipeline_mode<synchronous>, transform_indices = @transform_7, window_bounds = array<i64: 37, 96>}, {pipeline_mode = #tpu.pipeline_mode<synchronous>, transform_indices = @transform_8, window_bounds = array<i64: 96, 96>}, {pipeline_mode = #tpu.pipeline_mode<synchronous>, transform_indices = @transform_9, window_bounds = array<i64: 96, 96>}, {pipeline_mode = #tpu.pipeline_mode<synchronous>, transform_indices = @transform_10, window_bounds = array<i64: 96, 3>}, {pipeline_mode = #tpu.pipeline_mode<synchronous>, transform_indices = @transform_11, window_bounds = array<i64: 96, 96>}, {pipeline_mode = #tpu.pipeline_mode<synchronous>, transform_indices = @transform_12, window_bounds = array<i64: 37, 96>}, {pipeline_mode = #tpu.pipeline_mode<synchronous>, transform_indices = @transform_13, window_bounds = array<i64: 37, 24>}, {pipeline_mode = #tpu.pipeline_mode<synchronous>, transform_indices = @transform_14, window_bounds = array<i64: 37, 6>}, {pipeline_mode = #tpu.pipeline_mode<synchronous>, transform_indices = @transform_15, window_bounds = array<i64: 24, 6>}, {pipeline_mode = #tpu.pipeline_mode<synchronous>, transform_indices = @transform_16, window_bounds = array<i64: 17, 96>}, {transform_indices = @transform_17, window_bounds = array<i64: 8, 27>}]} {
    %c0 = arith.constant 0 : index
    %c0_0 = arith.constant 0 : index
    %0 = vector.load %arg1[%c0, %c0_0] : memref<8x37xf32, #tpu.memory_space<vmem>>, vector<8x37xf32>
    %1 = arith.truncf %0 : vector<8x37xf32> to vector<8x37xbf16>
    %c0_1 = arith.constant 0 : index
    %c0_2 = arith.constant 0 : index
    %2 = vector.load %arg17[%c0_1, %c0_2] : memref<17x96xf32, #tpu.memory_space<vmem>>, vector<17x96xf32>
    %3 = vector.extract_strided_slice %2 {offsets = [0, 0], sizes = [1, 96], strides = [1, 1]} : vector<17x96xf32> to vector<1x96xf32>
    %4 = vector.extract_strided_slice %2 {offsets = [1, 0], sizes = [1, 96], strides = [1, 1]} : vector<17x96xf32> to vector<1x96xf32>
    %5 = vector.extract_strided_slice %2 {offsets = [2, 0], sizes = [1, 96], strides = [1, 1]} : vector<17x96xf32> to vector<1x96xf32>
    %6 = vector.extract_strided_slice %2 {offsets = [3, 0], sizes = [1, 96], strides = [1, 1]} : vector<17x96xf32> to vector<1x96xf32>
    %7 = vector.extract_strided_slice %2 {offsets = [4, 0], sizes = [1, 96], strides = [1, 1]} : vector<17x96xf32> to vector<1x96xf32>
    %8 = vector.extract_strided_slice %2 {offsets = [5, 0], sizes = [1, 96], strides = [1, 1]} : vector<17x96xf32> to vector<1x96xf32>
    %9 = vector.extract_strided_slice %2 {offsets = [6, 0], sizes = [1, 96], strides = [1, 1]} : vector<17x96xf32> to vector<1x96xf32>
    %10 = vector.extract_strided_slice %2 {offsets = [7, 0], sizes = [1, 96], strides = [1, 1]} : vector<17x96xf32> to vector<1x96xf32>
    %11 = vector.extract_strided_slice %2 {offsets = [8, 0], sizes = [1, 96], strides = [1, 1]} : vector<17x96xf32> to vector<1x96xf32>
    %12 = vector.extract_strided_slice %2 {offsets = [9, 0], sizes = [1, 96], strides = [1, 1]} : vector<17x96xf32> to vector<1x96xf32>
    %13 = vector.extract_strided_slice %2 {offsets = [10, 0], sizes = [1, 96], strides = [1, 1]} : vector<17x96xf32> to vector<1x96xf32>
    %14 = vector.extract_strided_slice %2 {offsets = [11, 0], sizes = [1, 96], strides = [1, 1]} : vector<17x96xf32> to vector<1x96xf32>
    %15 = vector.extract_strided_slice %2 {offsets = [12, 0], sizes = [1, 96], strides = [1, 1]} : vector<17x96xf32> to vector<1x96xf32>
    %16 = vector.extract_strided_slice %2 {offsets = [13, 0], sizes = [1, 96], strides = [1, 1]} : vector<17x96xf32> to vector<1x96xf32>
    %17 = vector.extract_strided_slice %2 {offsets = [14, 0], sizes = [1, 96], strides = [1, 1]} : vector<17x96xf32> to vector<1x96xf32>
    %18 = vector.extract_strided_slice %2 {offsets = [15, 0], sizes = [1, 96], strides = [1, 1]} : vector<17x96xf32> to vector<1x96xf32>
    %19 = vector.extract_strided_slice %2 {offsets = [16, 0], sizes = [1, 96], strides = [1, 1]} : vector<17x96xf32> to vector<1x96xf32>
    %c0_3 = arith.constant 0 : index
    %c0_4 = arith.constant 0 : index
    %20 = vector.load %arg12[%c0_3, %c0_4] : memref<96x96xf32, #tpu.memory_space<vmem>>, vector<96x96xf32>
    %c0_5 = arith.constant 0 : index
    %c0_6 = arith.constant 0 : index
    %21 = vector.load %arg13[%c0_5, %c0_6] : memref<37x96xf32, #tpu.memory_space<vmem>>, vector<37x96xf32>
    %cst = arith.constant dense<0.000000e+00> : vector<8x96xf32>
    %22 = tpu.matmul %0, %21, %cst {dimension_numbers = #tpu.dot_dimension_numbers<[1], [0], [0], [1], [0, 0, 1, 1], [], []>, precision = #tpu.contract_precision<fp32>} : vector<8x37xf32>, vector<37x96xf32>, vector<8x96xf32> -> vector<8x96xf32>
    %c0_7 = arith.constant 0 : index
    %c0_8 = arith.constant 0 : index
    %23 = vector.load %arg14[%c0_7, %c0_8] : memref<37x24xf32, #tpu.memory_space<vmem>>, vector<37x24xf32>
    %cst_9 = arith.constant dense<0.000000e+00> : vector<8x24xf32>
    %24 = tpu.matmul %0, %23, %cst_9 {dimension_numbers = #tpu.dot_dimension_numbers<[1], [0], [0], [1], [0, 0, 1, 1], [], []>, precision = #tpu.contract_precision<fp32>} : vector<8x37xf32>, vector<37x24xf32>, vector<8x24xf32> -> vector<8x24xf32>
    %c0_10 = arith.constant 0 : index
    %c0_11 = arith.constant 0 : index
    %25 = vector.load %arg15[%c0_10, %c0_11] : memref<37x6xf32, #tpu.memory_space<vmem>>, vector<37x6xf32>
    %cst_12 = arith.constant dense<0.000000e+00> : vector<8x6xf32>
    %26 = tpu.matmul %0, %25, %cst_12 {dimension_numbers = #tpu.dot_dimension_numbers<[1], [0], [0], [1], [0, 0, 1, 1], [], []>, precision = #tpu.contract_precision<fp32>} : vector<8x37xf32>, vector<37x6xf32>, vector<8x6xf32> -> vector<8x6xf32>
    %c0_13 = arith.constant 0 : index
    %c0_14 = arith.constant 0 : index
    %27 = vector.load %arg2[%c0_13, %c0_14] : memref<37x96xbf16, #tpu.memory_space<vmem>>, vector<37x96xbf16>
    %cst_15 = arith.constant dense<0.000000e+00> : vector<8x96xf32>
    %28 = tpu.matmul %1, %27, %cst_15 {dimension_numbers = #tpu.dot_dimension_numbers<[1], [0], [0], [1], [0, 0, 1, 1], [], []>} : vector<8x37xbf16>, vector<37x96xbf16>, vector<8x96xf32> -> vector<8x96xf32>
    %29 = vector.broadcast %3 : vector<1x96xf32> to vector<8x96xf32>
    %30 = arith.addf %28, %29 : vector<8x96xf32>
    %cst_16 = arith.constant dense<0.000000e+00> : vector<8x96xf32>
    %31 = tpu.matmul %30, %20, %cst_16 {dimension_numbers = #tpu.dot_dimension_numbers<[1], [0], [0], [1], [0, 0, 1, 1], [], []>, precision = #tpu.contract_precision<fp32>} : vector<8x96xf32>, vector<96x96xf32>, vector<8x96xf32> -> vector<8x96xf32>
    %32 = arith.mulf %30, %30 : vector<8x96xf32>
    %cst_17 = arith.constant dense<0.000000e+00> : vector<8x96xf32>
    %33 = tpu.matmul %32, %20, %cst_17 {dimension_numbers = #tpu.dot_dimension_numbers<[1], [0], [0], [1], [0, 0, 1, 1], [], []>, precision = #tpu.contract_precision<fp32>} : vector<8x96xf32>, vector<96x96xf32>, vector<8x96xf32> -> vector<8x96xf32>
    %34 = arith.mulf %31, %31 : vector<8x96xf32>
    %35 = arith.subf %33, %34 : vector<8x96xf32>
    %cst_18 = arith.constant 0.000000e+00 : f32
    %36 = vector.broadcast %cst_18 : f32 to vector<8x96xf32>
    %37 = arith.maximumf %35, %36 : vector<8x96xf32>
    %38 = arith.subf %30, %31 : vector<8x96xf32>
    %cst_19 = arith.constant 9.99999974E-6 : f32
    %39 = vector.broadcast %cst_19 : f32 to vector<8x96xf32>
    %40 = arith.addf %37, %39 : vector<8x96xf32>
    %41 = math.rsqrt %40 : vector<8x96xf32>
    %42 = arith.mulf %38, %41 : vector<8x96xf32>
    %43 = vector.broadcast %4 : vector<1x96xf32> to vector<8x96xf32>
    %44 = arith.mulf %42, %43 : vector<8x96xf32>
    %45 = vector.broadcast %5 : vector<1x96xf32> to vector<8x96xf32>
    %46 = arith.addf %44, %45 : vector<8x96xf32>
    %cst_20 = arith.constant 0.000000e+00 : f32
    %47 = vector.broadcast %cst_20 : f32 to vector<8x96xf32>
    %48 = arith.maximumf %46, %47 : vector<8x96xf32>
    %49 = arith.truncf %48 : vector<8x96xf32> to vector<8x96xbf16>
    %c0_21 = arith.constant 0 : index
    %c0_22 = arith.constant 0 : index
    %50 = vector.load %arg3[%c0_21, %c0_22] : memref<96x96xbf16, #tpu.memory_space<vmem>>, vector<96x96xbf16>
    %cst_23 = arith.constant dense<0.000000e+00> : vector<8x96xf32>
    %51 = tpu.matmul %49, %50, %cst_23 {dimension_numbers = #tpu.dot_dimension_numbers<[1], [0], [0], [1], [0, 0, 1, 1], [], []>} : vector<8x96xbf16>, vector<96x96xbf16>, vector<8x96xf32> -> vector<8x96xf32>
    %52 = vector.broadcast %6 : vector<1x96xf32> to vector<8x96xf32>
    %53 = arith.addf %51, %52 : vector<8x96xf32>
    %cst_24 = arith.constant dense<0.000000e+00> : vector<8x96xf32>
    %54 = tpu.matmul %53, %20, %cst_24 {dimension_numbers = #tpu.dot_dimension_numbers<[1], [0], [0], [1], [0, 0, 1, 1], [], []>, precision = #tpu.contract_precision<fp32>} : vector<8x96xf32>, vector<96x96xf32>, vector<8x96xf32> -> vector<8x96xf32>
    %55 = arith.mulf %53, %53 : vector<8x96xf32>
    %cst_25 = arith.constant dense<0.000000e+00> : vector<8x96xf32>
    %56 = tpu.matmul %55, %20, %cst_25 {dimension_numbers = #tpu.dot_dimension_numbers<[1], [0], [0], [1], [0, 0, 1, 1], [], []>, precision = #tpu.contract_precision<fp32>} : vector<8x96xf32>, vector<96x96xf32>, vector<8x96xf32> -> vector<8x96xf32>
    %57 = arith.mulf %54, %54 : vector<8x96xf32>
    %58 = arith.subf %56, %57 : vector<8x96xf32>
    %cst_26 = arith.constant 0.000000e+00 : f32
    %59 = vector.broadcast %cst_26 : f32 to vector<8x96xf32>
    %60 = arith.maximumf %58, %59 : vector<8x96xf32>
    %61 = arith.subf %53, %54 : vector<8x96xf32>
    %cst_27 = arith.constant 9.99999974E-6 : f32
    %62 = vector.broadcast %cst_27 : f32 to vector<8x96xf32>
    %63 = arith.addf %60, %62 : vector<8x96xf32>
    %64 = math.rsqrt %63 : vector<8x96xf32>
    %65 = arith.mulf %61, %64 : vector<8x96xf32>
    %66 = vector.broadcast %7 : vector<1x96xf32> to vector<8x96xf32>
    %67 = arith.mulf %65, %66 : vector<8x96xf32>
    %68 = vector.broadcast %8 : vector<1x96xf32> to vector<8x96xf32>
    %69 = arith.addf %67, %68 : vector<8x96xf32>
    %70 = arith.addf %69, %22 : vector<8x96xf32>
    %cst_28 = arith.constant 0.000000e+00 : f32
    %71 = vector.broadcast %cst_28 : f32 to vector<8x96xf32>
    %72 = arith.maximumf %70, %71 : vector<8x96xf32>
    %73 = arith.truncf %72 : vector<8x96xf32> to vector<8x96xbf16>
    %c0_29 = arith.constant 0 : index
    %c0_30 = arith.constant 0 : index
    %74 = vector.load %arg4[%c0_29, %c0_30] : memref<96x24xbf16, #tpu.memory_space<vmem>>, vector<96x24xbf16>
    %cst_31 = arith.constant dense<0.000000e+00> : vector<8x24xf32>
    %75 = tpu.matmul %73, %74, %cst_31 {dimension_numbers = #tpu.dot_dimension_numbers<[1], [0], [0], [1], [0, 0, 1, 1], [], []>} : vector<8x96xbf16>, vector<96x24xbf16>, vector<8x24xf32> -> vector<8x24xf32>
    %76 = arith.addf %75, %24 : vector<8x24xf32>
    %c0_32 = arith.constant 0 : index
    %c0_33 = arith.constant 0 : index
    %77 = vector.load %arg16[%c0_32, %c0_33] : memref<24x6xf32, #tpu.memory_space<vmem>>, vector<24x6xf32>
    %cst_34 = arith.constant dense<0.000000e+00> : vector<8x6xf32>
    %78 = tpu.matmul %76, %77, %cst_34 {dimension_numbers = #tpu.dot_dimension_numbers<[1], [0], [0], [1], [0, 0, 1, 1], [], []>, precision = #tpu.contract_precision<fp32>} : vector<8x24xf32>, vector<24x6xf32>, vector<8x6xf32> -> vector<8x6xf32>
    %79 = arith.subf %26, %78 : vector<8x6xf32>
    %c0_35 = arith.constant 0 : index
    %c0_36 = arith.constant 0 : index
    %80 = vector.load %arg5[%c0_35, %c0_36] : memref<6x96xf32, #tpu.memory_space<vmem>>, vector<6x96xf32>
    %cst_37 = arith.constant dense<0.000000e+00> : vector<8x96xf32>
    %81 = tpu.matmul %79, %80, %cst_37 {dimension_numbers = #tpu.dot_dimension_numbers<[1], [0], [0], [1], [0, 0, 1, 1], [], []>, precision = #tpu.contract_precision<fp32>} : vector<8x6xf32>, vector<6x96xf32>, vector<8x96xf32> -> vector<8x96xf32>
    %82 = vector.broadcast %9 : vector<1x96xf32> to vector<8x96xf32>
    %83 = arith.addf %81, %82 : vector<8x96xf32>
    %cst_38 = arith.constant 0.000000e+00 : f32
    %84 = vector.broadcast %cst_38 : f32 to vector<8x96xf32>
    %85 = arith.maximumf %83, %84 : vector<8x96xf32>
    %86 = arith.truncf %85 : vector<8x96xf32> to vector<8x96xbf16>
    %c0_39 = arith.constant 0 : index
    %c0_40 = arith.constant 0 : index
    %87 = vector.load %arg6[%c0_39, %c0_40] : memref<96x96xbf16, #tpu.memory_space<vmem>>, vector<96x96xbf16>
    %cst_41 = arith.constant dense<0.000000e+00> : vector<8x96xf32>
    %88 = tpu.matmul %86, %87, %cst_41 {dimension_numbers = #tpu.dot_dimension_numbers<[1], [0], [0], [1], [0, 0, 1, 1], [], []>} : vector<8x96xbf16>, vector<96x96xbf16>, vector<8x96xf32> -> vector<8x96xf32>
    %cst_42 = arith.constant dense<0.000000e+00> : vector<8x96xf32>
    %89 = tpu.matmul %88, %20, %cst_42 {dimension_numbers = #tpu.dot_dimension_numbers<[1], [0], [0], [1], [0, 0, 1, 1], [], []>, precision = #tpu.contract_precision<fp32>} : vector<8x96xf32>, vector<96x96xf32>, vector<8x96xf32> -> vector<8x96xf32>
    %90 = arith.mulf %88, %88 : vector<8x96xf32>
    %cst_43 = arith.constant dense<0.000000e+00> : vector<8x96xf32>
    %91 = tpu.matmul %90, %20, %cst_43 {dimension_numbers = #tpu.dot_dimension_numbers<[1], [0], [0], [1], [0, 0, 1, 1], [], []>, precision = #tpu.contract_precision<fp32>} : vector<8x96xf32>, vector<96x96xf32>, vector<8x96xf32> -> vector<8x96xf32>
    %92 = arith.mulf %89, %89 : vector<8x96xf32>
    %93 = arith.subf %91, %92 : vector<8x96xf32>
    %cst_44 = arith.constant 0.000000e+00 : f32
    %94 = vector.broadcast %cst_44 : f32 to vector<8x96xf32>
    %95 = arith.maximumf %93, %94 : vector<8x96xf32>
    %96 = arith.subf %88, %89 : vector<8x96xf32>
    %cst_45 = arith.constant 9.99999974E-6 : f32
    %97 = vector.broadcast %cst_45 : f32 to vector<8x96xf32>
    %98 = arith.addf %95, %97 : vector<8x96xf32>
    %99 = math.rsqrt %98 : vector<8x96xf32>
    %100 = arith.mulf %96, %99 : vector<8x96xf32>
    %101 = vector.broadcast %10 : vector<1x96xf32> to vector<8x96xf32>
    %102 = arith.mulf %100, %101 : vector<8x96xf32>
    %103 = vector.broadcast %11 : vector<1x96xf32> to vector<8x96xf32>
    %104 = arith.addf %102, %103 : vector<8x96xf32>
    %cst_46 = arith.constant 0.000000e+00 : f32
    %105 = vector.broadcast %cst_46 : f32 to vector<8x96xf32>
    %106 = arith.maximumf %104, %105 : vector<8x96xf32>
    %107 = arith.truncf %106 : vector<8x96xf32> to vector<8x96xbf16>
    %c0_47 = arith.constant 0 : index
    %c0_48 = arith.constant 0 : index
    %108 = vector.load %arg7[%c0_47, %c0_48] : memref<96x96xbf16, #tpu.memory_space<vmem>>, vector<96x96xbf16>
    %cst_49 = arith.constant dense<0.000000e+00> : vector<8x96xf32>
    %109 = tpu.matmul %107, %108, %cst_49 {dimension_numbers = #tpu.dot_dimension_numbers<[1], [0], [0], [1], [0, 0, 1, 1], [], []>} : vector<8x96xbf16>, vector<96x96xbf16>, vector<8x96xf32> -> vector<8x96xf32>
    %c0_50 = arith.constant 0 : index
    %c0_51 = arith.constant 0 : index
    %110 = vector.load %arg8[%c0_50, %c0_51] : memref<37x96xbf16, #tpu.memory_space<vmem>>, vector<37x96xbf16>
    %cst_52 = arith.constant dense<0.000000e+00> : vector<8x96xf32>
    %111 = tpu.matmul %1, %110, %cst_52 {dimension_numbers = #tpu.dot_dimension_numbers<[1], [0], [0], [1], [0, 0, 1, 1], [], []>} : vector<8x37xbf16>, vector<37x96xbf16>, vector<8x96xf32> -> vector<8x96xf32>
    %112 = arith.addf %109, %111 : vector<8x96xf32>
    %cst_53 = arith.constant dense<0.000000e+00> : vector<8x96xf32>
    %113 = tpu.matmul %112, %20, %cst_53 {dimension_numbers = #tpu.dot_dimension_numbers<[1], [0], [0], [1], [0, 0, 1, 1], [], []>, precision = #tpu.contract_precision<fp32>} : vector<8x96xf32>, vector<96x96xf32>, vector<8x96xf32> -> vector<8x96xf32>
    %114 = arith.mulf %112, %112 : vector<8x96xf32>
    %cst_54 = arith.constant dense<0.000000e+00> : vector<8x96xf32>
    %115 = tpu.matmul %114, %20, %cst_54 {dimension_numbers = #tpu.dot_dimension_numbers<[1], [0], [0], [1], [0, 0, 1, 1], [], []>, precision = #tpu.contract_precision<fp32>} : vector<8x96xf32>, vector<96x96xf32>, vector<8x96xf32> -> vector<8x96xf32>
    %116 = arith.mulf %113, %113 : vector<8x96xf32>
    %117 = arith.subf %115, %116 : vector<8x96xf32>
    %cst_55 = arith.constant 0.000000e+00 : f32
    %118 = vector.broadcast %cst_55 : f32 to vector<8x96xf32>
    %119 = arith.maximumf %117, %118 : vector<8x96xf32>
    %120 = arith.subf %112, %113 : vector<8x96xf32>
    %cst_56 = arith.constant 9.99999974E-6 : f32
    %121 = vector.broadcast %cst_56 : f32 to vector<8x96xf32>
    %122 = arith.addf %119, %121 : vector<8x96xf32>
    %123 = math.rsqrt %122 : vector<8x96xf32>
    %124 = arith.mulf %120, %123 : vector<8x96xf32>
    %125 = vector.broadcast %12 : vector<1x96xf32> to vector<8x96xf32>
    %126 = arith.mulf %124, %125 : vector<8x96xf32>
    %127 = vector.broadcast %13 : vector<1x96xf32> to vector<8x96xf32>
    %128 = arith.addf %126, %127 : vector<8x96xf32>
    %cst_57 = arith.constant 0.000000e+00 : f32
    %129 = vector.broadcast %cst_57 : f32 to vector<8x96xf32>
    %130 = arith.maximumf %128, %129 : vector<8x96xf32>
    %131 = arith.truncf %130 : vector<8x96xf32> to vector<8x96xbf16>
    %c0_58 = arith.constant 0 : index
    %c0_59 = arith.constant 0 : index
    %132 = vector.load %arg9[%c0_58, %c0_59] : memref<96x96xbf16, #tpu.memory_space<vmem>>, vector<96x96xbf16>
    %cst_60 = arith.constant dense<0.000000e+00> : vector<8x96xf32>
    %133 = tpu.matmul %131, %132, %cst_60 {dimension_numbers = #tpu.dot_dimension_numbers<[1], [0], [0], [1], [0, 0, 1, 1], [], []>} : vector<8x96xbf16>, vector<96x96xbf16>, vector<8x96xf32> -> vector<8x96xf32>
    %134 = vector.broadcast %14 : vector<1x96xf32> to vector<8x96xf32>
    %135 = arith.addf %133, %134 : vector<8x96xf32>
    %cst_61 = arith.constant dense<0.000000e+00> : vector<8x96xf32>
    %136 = tpu.matmul %135, %20, %cst_61 {dimension_numbers = #tpu.dot_dimension_numbers<[1], [0], [0], [1], [0, 0, 1, 1], [], []>, precision = #tpu.contract_precision<fp32>} : vector<8x96xf32>, vector<96x96xf32>, vector<8x96xf32> -> vector<8x96xf32>
    %137 = arith.mulf %135, %135 : vector<8x96xf32>
    %cst_62 = arith.constant dense<0.000000e+00> : vector<8x96xf32>
    %138 = tpu.matmul %137, %20, %cst_62 {dimension_numbers = #tpu.dot_dimension_numbers<[1], [0], [0], [1], [0, 0, 1, 1], [], []>, precision = #tpu.contract_precision<fp32>} : vector<8x96xf32>, vector<96x96xf32>, vector<8x96xf32> -> vector<8x96xf32>
    %139 = arith.mulf %136, %136 : vector<8x96xf32>
    %140 = arith.subf %138, %139 : vector<8x96xf32>
    %cst_63 = arith.constant 0.000000e+00 : f32
    %141 = vector.broadcast %cst_63 : f32 to vector<8x96xf32>
    %142 = arith.maximumf %140, %141 : vector<8x96xf32>
    %143 = arith.subf %135, %136 : vector<8x96xf32>
    %cst_64 = arith.constant 9.99999974E-6 : f32
    %144 = vector.broadcast %cst_64 : f32 to vector<8x96xf32>
    %145 = arith.addf %142, %144 : vector<8x96xf32>
    %146 = math.rsqrt %145 : vector<8x96xf32>
    %147 = arith.mulf %143, %146 : vector<8x96xf32>
    %148 = vector.broadcast %15 : vector<1x96xf32> to vector<8x96xf32>
    %149 = arith.mulf %147, %148 : vector<8x96xf32>
    %150 = vector.broadcast %16 : vector<1x96xf32> to vector<8x96xf32>
    %151 = arith.addf %149, %150 : vector<8x96xf32>
    %cst_65 = arith.constant 0.000000e+00 : f32
    %152 = vector.broadcast %cst_65 : f32 to vector<8x96xf32>
    %153 = arith.maximumf %151, %152 : vector<8x96xf32>
    %154 = arith.truncf %153 : vector<8x96xf32> to vector<8x96xbf16>
    %c0_66 = arith.constant 0 : index
    %c0_67 = arith.constant 0 : index
    %155 = vector.load %arg10[%c0_66, %c0_67] : memref<96x96xbf16, #tpu.memory_space<vmem>>, vector<96x96xbf16>
    %cst_68 = arith.constant dense<0.000000e+00> : vector<8x96xf32>
    %156 = tpu.matmul %154, %155, %cst_68 {dimension_numbers = #tpu.dot_dimension_numbers<[1], [0], [0], [1], [0, 0, 1, 1], [], []>} : vector<8x96xbf16>, vector<96x96xbf16>, vector<8x96xf32> -> vector<8x96xf32>
    %157 = vector.broadcast %17 : vector<1x96xf32> to vector<8x96xf32>
    %158 = arith.addf %156, %157 : vector<8x96xf32>
    %cst_69 = arith.constant dense<0.000000e+00> : vector<8x96xf32>
    %159 = tpu.matmul %158, %20, %cst_69 {dimension_numbers = #tpu.dot_dimension_numbers<[1], [0], [0], [1], [0, 0, 1, 1], [], []>, precision = #tpu.contract_precision<fp32>} : vector<8x96xf32>, vector<96x96xf32>, vector<8x96xf32> -> vector<8x96xf32>
    %160 = arith.mulf %158, %158 : vector<8x96xf32>
    %cst_70 = arith.constant dense<0.000000e+00> : vector<8x96xf32>
    %161 = tpu.matmul %160, %20, %cst_70 {dimension_numbers = #tpu.dot_dimension_numbers<[1], [0], [0], [1], [0, 0, 1, 1], [], []>, precision = #tpu.contract_precision<fp32>} : vector<8x96xf32>, vector<96x96xf32>, vector<8x96xf32> -> vector<8x96xf32>
    %162 = arith.mulf %159, %159 : vector<8x96xf32>
    %163 = arith.subf %161, %162 : vector<8x96xf32>
    %cst_71 = arith.constant 0.000000e+00 : f32
    %164 = vector.broadcast %cst_71 : f32 to vector<8x96xf32>
    %165 = arith.maximumf %163, %164 : vector<8x96xf32>
    %166 = arith.subf %158, %159 : vector<8x96xf32>
    %cst_72 = arith.constant 9.99999974E-6 : f32
    %167 = vector.broadcast %cst_72 : f32 to vector<8x96xf32>
    %168 = arith.addf %165, %167 : vector<8x96xf32>
    %169 = math.rsqrt %168 : vector<8x96xf32>
    %170 = arith.mulf %166, %169 : vector<8x96xf32>
    %171 = vector.broadcast %18 : vector<1x96xf32> to vector<8x96xf32>
    %172 = arith.mulf %170, %171 : vector<8x96xf32>
    %173 = vector.broadcast %19 : vector<1x96xf32> to vector<8x96xf32>
    %174 = arith.addf %172, %173 : vector<8x96xf32>
    %175 = arith.addf %174, %130 : vector<8x96xf32>
    %cst_73 = arith.constant 0.000000e+00 : f32
    %176 = vector.broadcast %cst_73 : f32 to vector<8x96xf32>
    %177 = arith.maximumf %175, %176 : vector<8x96xf32>
    %178 = arith.truncf %177 : vector<8x96xf32> to vector<8x96xbf16>
    %c0_74 = arith.constant 0 : index
    %c0_75 = arith.constant 0 : index
    %179 = vector.load %arg11[%c0_74, %c0_75] : memref<96x3xbf16, #tpu.memory_space<vmem>>, vector<96x3xbf16>
    %cst_76 = arith.constant dense<0.000000e+00> : vector<8x3xf32>
    %180 = tpu.matmul %178, %179, %cst_76 {dimension_numbers = #tpu.dot_dimension_numbers<[1], [0], [0], [1], [0, 0, 1, 1], [], []>} : vector<8x96xbf16>, vector<96x3xbf16>, vector<8x3xf32> -> vector<8x3xf32>
    %cst_77 = arith.constant dense<0xFF800000> : vector<8xf32>
    %181 = vector.multi_reduction <maximumf>, %180, %cst_77 [1] : vector<8x3xf32> to vector<8xf32>
    %182 = vector.shape_cast %181 : vector<8xf32> to vector<8x1xf32>
    %183 = vector.broadcast %182 : vector<8x1xf32> to vector<8x3xf32>
    %184 = arith.subf %180, %183 : vector<8x3xf32>
    %185 = math.exp %184 : vector<8x3xf32>
    %cst_78 = arith.constant dense<0.000000e+00> : vector<8xf32>
    %186 = vector.multi_reduction <add>, %185, %cst_78 [1] : vector<8x3xf32> to vector<8xf32>
    %187 = vector.shape_cast %186 : vector<8xf32> to vector<8x1xf32>
    %188 = vector.broadcast %187 : vector<8x1xf32> to vector<8x3xf32>
    %189 = arith.divf %185, %188 : vector<8x3xf32>
    %190 = tpu.concatenate %76, %189 in 1 : vector<8x24xf32>, vector<8x3xf32> -> vector<8x27xf32>
    %c0_79 = arith.constant 0 : index
    %c0_80 = arith.constant 0 : index
    %191 = vector.load %arg18[%c0_79, %c0_80] : memref<8x27xf32, #tpu.memory_space<vmem>>, vector<8x27xf32>
    tpu.vector_store %arg18[%c0_79, %c0_80], %190 {strides = array<i32>} : memref<8x27xf32, #tpu.memory_space<vmem>>, vector<8x27xf32>,
    return
  }
  func.func @transform_0(%arg0: i32) -> (i32, i32) {
    %c0_i32 = arith.constant 0 : i32
    %c0_i32_0 = arith.constant 0 : i32
    return %arg0, %c0_i32 : i32, i32
  }
  func.func @transform_1(%arg0: i32) -> (i32, i32) {
    %c0_i32 = arith.constant 0 : i32
    %c0_i32_0 = arith.constant 0 : i32
    %c0_i32_1 = arith.constant 0 : i32
    return %c0_i32, %c0_i32_0 : i32, i32
  }
  func.func @transform_2(%arg0: i32) -> (i32, i32) {
    %c0_i32 = arith.constant 0 : i32
    %c0_i32_0 = arith.constant 0 : i32
    %c0_i32_1 = arith.constant 0 : i32
    return %c0_i32, %c0_i32_0 : i32, i32
  }
  func.func @transform_3(%arg0: i32) -> (i32, i32) {
    %c0_i32 = arith.constant 0 : i32
    %c0_i32_0 = arith.constant 0 : i32
    %c0_i32_1 = arith.constant 0 : i32
    return %c0_i32, %c0_i32_0 : i32, i32
  }
  func.func @transform_4(%arg0: i32) -> (i32, i32) {
    %c0_i32 = arith.constant 0 : i32
    %c0_i32_0 = arith.constant 0 : i32
    %c0_i32_1 = arith.constant 0 : i32
    return %c0_i32, %c0_i32_0 : i32, i32
  }
  func.func @transform_5(%arg0: i32) -> (i32, i32) {
    %c0_i32 = arith.constant 0 : i32
    %c0_i32_0 = arith.constant 0 : i32
    %c0_i32_1 = arith.constant 0 : i32
    return %c0_i32, %c0_i32_0 : i32, i32
  }
  func.func @transform_6(%arg0: i32) -> (i32, i32) {
    %c0_i32 = arith.constant 0 : i32
    %c0_i32_0 = arith.constant 0 : i32
    %c0_i32_1 = arith.constant 0 : i32
    return %c0_i32, %c0_i32_0 : i32, i32
  }
  func.func @transform_7(%arg0: i32) -> (i32, i32) {
    %c0_i32 = arith.constant 0 : i32
    %c0_i32_0 = arith.constant 0 : i32
    %c0_i32_1 = arith.constant 0 : i32
    return %c0_i32, %c0_i32_0 : i32, i32
  }
  func.func @transform_8(%arg0: i32) -> (i32, i32) {
    %c0_i32 = arith.constant 0 : i32
    %c0_i32_0 = arith.constant 0 : i32
    %c0_i32_1 = arith.constant 0 : i32
    return %c0_i32, %c0_i32_0 : i32, i32
  }
  func.func @transform_9(%arg0: i32) -> (i32, i32) {
    %c0_i32 = arith.constant 0 : i32
    %c0_i32_0 = arith.constant 0 : i32
    %c0_i32_1 = arith.constant 0 : i32
    return %c0_i32, %c0_i32_0 : i32, i32
  }
  func.func @transform_10(%arg0: i32) -> (i32, i32) {
    %c0_i32 = arith.constant 0 : i32
    %c0_i32_0 = arith.constant 0 : i32
    %c0_i32_1 = arith.constant 0 : i32
    return %c0_i32, %c0_i32_0 : i32, i32
  }
  func.func @transform_11(%arg0: i32) -> (i32, i32) {
    %c0_i32 = arith.constant 0 : i32
    %c0_i32_0 = arith.constant 0 : i32
    %c0_i32_1 = arith.constant 0 : i32
    return %c0_i32, %c0_i32_0 : i32, i32
  }
  func.func @transform_12(%arg0: i32) -> (i32, i32) {
    %c0_i32 = arith.constant 0 : i32
    %c0_i32_0 = arith.constant 0 : i32
    %c0_i32_1 = arith.constant 0 : i32
    return %c0_i32, %c0_i32_0 : i32, i32
  }
  func.func @transform_13(%arg0: i32) -> (i32, i32) {
    %c0_i32 = arith.constant 0 : i32
    %c0_i32_0 = arith.constant 0 : i32
    %c0_i32_1 = arith.constant 0 : i32
    return %c0_i32, %c0_i32_0 : i32, i32
  }
  func.func @transform_14(%arg0: i32) -> (i32, i32) {
    %c0_i32 = arith.constant 0 : i32
    %c0_i32_0 = arith.constant 0 : i32
    %c0_i32_1 = arith.constant 0 : i32
    return %c0_i32, %c0_i32_0 : i32, i32
  }
  func.func @transform_15(%arg0: i32) -> (i32, i32) {
    %c0_i32 = arith.constant 0 : i32
    %c0_i32_0 = arith.constant 0 : i32
    %c0_i32_1 = arith.constant 0 : i32
    return %c0_i32, %c0_i32_0 : i32, i32
  }
  func.func @transform_16(%arg0: i32) -> (i32, i32) {
    %c0_i32 = arith.constant 0 : i32
    %c0_i32_0 = arith.constant 0 : i32
    %c0_i32_1 = arith.constant 0 : i32
    return %c0_i32, %c0_i32_0 : i32, i32
  }
  func.func @transform_17(%arg0: i32) -> (i32, i32) {
    %c0_i32 = arith.constant 0 : i32
    %c0_i32_0 = arith.constant 0 : i32
    return %arg0, %c0_i32 : i32, i32
  }
}

</mosaic_0001>

<bundles_post_ra>
// kernel: tpu_custom_call.1
= control target key start
LH: loop header
LB: loop body
LE: loop exit
PB: predicated region body
PF: predicated region fallthrough
CT: control target
= control target key end

     0   :  { %s19484_s0 = inlined_call_operand.hbm [shape: f32[16,37], index: 0, kind: input, shape index: {}]   ;;  %s19485_s1 = inlined_call_operand.hbm [shape: bf16[37,96], index: 1, kind: input, shape index: {}]   ;;  %s19486_s2 = inlined_call_operand.vmem [shape: bf16[96,96], index: 2, kind: input, shape index: {}]   ;;  %s19487_s3 = inlined_call_operand.vmem [shape: bf16[96,24], index: 3, kind: input, shape index: {}]   ;;  %s19488_s4 = inlined_call_operand.hbm [shape: f32[6,96], index: 4, kind: input, shape index: {}]   ;;  %s19489_s5 = inlined_call_operand.vmem [shape: bf16[96,96], index: 5, kind: input, shape index: {}]   ;;  %s19490_s6 = inlined_call_operand.vmem [shape: bf16[96,96], index: 6, kind: input, shape index: {}]   ;;  %s19491_s7 = inlined_call_operand.hbm [shape: bf16[37,96], index: 7, kind: input, shape index: {}]   ;;  %s19492_s8 = inlined_call_operand.hbm [shape: bf16[96,96], index: 8, kind: input, shape index: {}]   ;;  %s19493_s9 = inlined_call_operand.vmem [shape: bf16[96,96], index: 9, kind: input, shape index: {}]   ;;  %s19494_s10 = inlined_call_operand.vmem [shape: bf16[96,3], index: 10, kind: input, shape index: {}]   ;;  %s19495_s11 = inlined_call_operand.vmem [shape: f32[96,96], index: 11, kind: input, shape index: {}]   ;;  %s19496_s12 = inlined_call_operand.hbm [shape: f32[37,96], index: 12, kind: input, shape index: {}]   ;;  %s19497_s13 = inlined_call_operand.vmem [shape: f32[37,24], index: 13, kind: input, shape index: {}]   ;;  %s19498_s14 = inlined_call_operand.vmem [shape: f32[37,6], index: 14, kind: input, shape index: {}]   ;;  %s19499_s15 = inlined_call_operand.vmem [shape: f32[24,6], index: 15, kind: input, shape index: {}]   ;;  %s19500_s16 = inlined_call_operand.vmem [shape: f32[17,96], index: 16, kind: input, shape index: {}]   ;;  %s19501_s17 = inlined_call_operand.hbm [shape: f32[16,27], index: 17, kind: output, shape index: {}]  }
   0x1   :  { %19520 = sst [smem:[#allocation19_spill]] %s19484_s0 }
   0x2   :  { %19521 = sst [smem:[#allocation20_spill]] %s19485_s1 }
   0x3   :  { %19522 = sst [smem:[#allocation21_spill]] %s19486_s2 }
   0x4   :  { %19523 = sst [smem:[#allocation22_spill]] %s19487_s3 }
   0x5   :  { %19524 = sst [smem:[#allocation23_spill]] %s19488_s4 }
   0x6   :  { %19525 = sst [smem:[#allocation24_spill]] %s19489_s5 }
   0x7   :  { %19526 = sst [smem:[#allocation25_spill]] %s19490_s6 }
   0x8   :  { %19527 = sst [smem:[#allocation26_spill]] %s19491_s7 }
   0x9   :  { %19528 = sst [smem:[#allocation27_spill]] %s19492_s8 }
   0xa   :  { %19529 = sst [smem:[#allocation28_spill]] %s19493_s9 }
   0xb   :  { %19530 = sst [smem:[#allocation29_spill]] %s19494_s10 }
   0xc   :  { %19531 = sst [smem:[#allocation30_spill]] %s19499_s15 }
   0xd   :  { %19532 = sst [smem:[#allocation31_spill]] %s19501_s17 }
   0xe   :  { %22 = vsyncpa [#allocation3], 0 }
   0xf   :  { %24 = vsyncpa [#allocation3 + $0x1], 0 }
  0x10   :  { %25 = vsyncpa [#allocation6], 0 }
  0x11   :  { %26 = vsyncpa [#allocation9], 0 }
  0x12   :  { %27 = vsyncpa [#allocation12], 0 }
  0x13   :  { %28 = vsyncpa [#allocation4], 0 }
  0x14   :  { %30 = vsyncpa [#allocation4 + $0x1], 0  ;;  %s17006_s24 = smov 0   ;;  %s17008_s25 = smov 0  }
  0x15   :  { %s17010_s26 = smov 0   ;;  %s17012_s27 = smov 0  }
  0x16 LB: > { %s16900_s28 = smov [#allocation5]   ;;  %s17027_s0 = sadd.s32 4294967295, %s16898_s27   ;;  %s16898_s27 = sphi %s17012_s27, %s19569_s27   ;;  %s16894_s26 = sphi %s17010_s26, %s19568_s26   ;;  %s16890_s25 = sphi %s17008_s25, %s19567_s25   ;;  %s16886_s24 = sphi %s17006_s24, %s19566_s24  }
  0x17   : > { %s441_s29 = sshll.u32 %s16900_s28, 4  ;;  %p11282_p0 = scmp.ge.s32.totalorder %s16898_s27, 1  ;;  %s17032_s29 = int_to_ptr.vmem [resolvable:$true] %s441_s29 }
  0x18   : > { %p19513_p1 = scmp.eq.s32.totalorder %s17027_s0, 0  ;;  %p429_p2 = scmp.lt.s32.totalorder %s16898_s27, 3 }
  0x19   : > { %s16901_s18 = smov [#allocation8]   ;;  %s16902_s20 = smov [#allocation7]  }
  0x1a   : > { %p17034_p3 = pnand %p11282_p0, %p429_p2  ;;  %s477_s19 = sshll.u32 %s16901_s18, 4  ;;  %s17047_s19 = int_to_ptr.vmem [resolvable:$true] %s477_s19 }
  0x1b   : > { %s461_s21 = sshll.u32 %s16902_s20, 4  ;;  %s19535_s28 = sld [smem:[#allocation20_spill]]  ;;  %s17049_s21 = int_to_ptr.vmem [resolvable:$true] %s461_s21 }
  0x1c   : > { %s19533_s30 = scalar_select %p17034_p3, 1, 0 }
  0x1d   : > { %p16502_p5 = pneg %p17034_p3 }
  0x1f   : > { %p17043_p6 = pnand %p16502_p5, %p19513_p1 }
  0x21   : > { %s16650_s17 = scalar_lea.hbm %s19535_s28, 320  ;;  %p17059_p8 = pneg %p17043_p6 }
  0x22   : > { %p16651_p7 = scmp.ne.s32.totalorder %s19535_s28, %s16650_s17  ;;  %p16657_p11 = scmp.lt.u32.totalorder %s16650_s17, %s19535_s28 }
  0x24   : > { %p16653_p9 = pnand %p17059_p8, %p16651_p7 }
  0x26   : > { %p16654_p10 = pneg %p16653_p9 }
  0x28   : > { %p16659_p12 = pnand %p16657_p11, %p16654_p10 }
  0x2a   : > { %16662 = shalt.err (!%p16659_p12)
}
  0x2b   : > { %s16663_s9 = scalar_lea.vmem %s17032_s29, 320  ;;  %p16671_p5 = scmp.lt.s32.totalorder %s17032_s29, %s17032_s29 }
  0x2c   : > { %p16664_p13 = scmp.ne.s32.totalorder %s17032_s29, %s16663_s9  ;;  %p16672_p4 = scmp.lt.s32.totalorder %s16663_s9, %s16663_s9 }
  0x2e   : > { %p16666_p0 = pnand %p16664_p13, %p17059_p8  ;;  %p16673_p7 = por %p16672_p4, %p16671_p5 }
  0x30   : > { %p16667_p2 = pneg %p16666_p0 }
  0x32   : > { %p16674_p9 = pnand %p16673_p7, %p16667_p2 }
  0x34   : > { %16677 = shalt.err (!%p16674_p9)
}
  0x35   : > { %s19512_s10 = smov 64   ;;  %s16904_s6 = smov 4  }
  0x36   : > { %16505 = dma.hbm_to_vmem [thread:$0]  (!%p17043_p6), %s19535_s28, 320, %s17032_s29, [#allocation6], %s19512_s10, %s19512_s10, %s16904_s6  }
  0x37   : > { %s19537_s7 = sld [smem:[#allocation26_spill]] }
  0x3d   : > { %s16678_s9 = scalar_lea.hbm %s19537_s7, 320 }
  0x3e   : > { %p16679_p4 = scmp.ne.s32.totalorder %s19537_s7, %s16678_s9  ;;  %p16685_p12 = scmp.lt.u32.totalorder %s16678_s9, %s19537_s7 }
  0x40   : > { %p16681_p10 = pnand %p16679_p4, %p17059_p8 }
  0x42   : > { %p16682_p11 = pneg %p16681_p10 }
  0x44   : > { %p16687_p13 = pnand %p16685_p12, %p16682_p11 }
  0x46   : > { %16690 = shalt.err (!%p16687_p13)
}
  0x47   : > { %s16691_s29 = scalar_lea.vmem %s17047_s19, 320  ;;  %p16699_p7 = scmp.lt.s32.totalorder %s17047_s19, %s17047_s19 }
  0x48   : > { %p16692_p0 = scmp.ne.s32.totalorder %s17047_s19, %s16691_s29  ;;  %p16700_p9 = scmp.lt.s32.totalorder %s16691_s29, %s16691_s29 }
  0x4a   : > { %p16694_p2 = pnand %p16692_p0, %p17059_p8  ;;  %p16701_p4 = por %p16700_p9, %p16699_p7 }
  0x4c   : > { %p16695_p5 = pneg %p16694_p2 }
  0x4e   : > { %p16702_p10 = pnand %p16701_p4, %p16695_p5 }
  0x50   : > { %16705 = shalt.err (!%p16702_p10)
}
  0x51   : > { %16511 = dma.hbm_to_vmem [thread:$0]  (!%p17043_p6), %s19537_s7, 320, %s17047_s19, [#allocation9], %s19512_s10, %s19512_s10, %s16904_s6  }
  0x52   : > { %s19538_s4 = sld [smem:[#allocation23_spill]] }
  0x58   : > { %s16706_s17 = scalar_lea.hbm %s19538_s4, 128 }
  0x59   : > { %p16707_p11 = scmp.ne.s32.totalorder %s19538_s4, %s16706_s17  ;;  %p16713_p0 = scmp.lt.u32.totalorder %s16706_s17, %s19538_s4 }
  0x5b   : > { %p16709_p12 = pnand %p16707_p11, %p17059_p8 }
  0x5d   : > { %p16710_p13 = pneg %p16709_p12 }
  0x5f   : > { %p16715_p2 = pnand %p16713_p0, %p16710_p13 }
  0x61   : > { %16718 = shalt.err (!%p16715_p2)
}
  0x62   : > { %s16719_s19 = scalar_lea.vmem %s17049_s21, 128  ;;  %p16727_p4 = scmp.lt.s32.totalorder %s17049_s21, %s17049_s21 }
  0x63   : > { %p16720_p5 = scmp.ne.s32.totalorder %s17049_s21, %s16719_s19  ;;  %p16728_p10 = scmp.lt.s32.totalorder %s16719_s19, %s16719_s19 }
  0x65   : > { %p16722_p7 = pnand %p16720_p5, %p17059_p8  ;;  %p16729_p11 = por %p16728_p10, %p16727_p4 }
  0x67   : > { %p16723_p9 = pneg %p16722_p7 }
  0x69   : > { %p16730_p12 = pnand %p16729_p11, %p16723_p9 }
  0x6b   : > { %16733 = shalt.err (!%p16730_p12)
}
  0x6c   : > { %16508 = dma.hbm_to_vmem [thread:$0]  (!%p17043_p6), %s19538_s4, 128, %s17049_s21, [#allocation6]  }
  0x6d   : > { %s16905_s3 = smov [#allocation10]   ;;  %s16906_s15 = smov [#allocation11]  }
  0x6e   : > { %s490_s5 = sshll.u32 %s16905_s3, 4  ;;  %s512_s17 = sshll.u32 %s16906_s15, 4  ;;  %s491_s5 = int_to_ptr.vmem [resolvable:$true] %s490_s5  ;;  %s513_s17 = int_to_ptr.vmem [resolvable:$true] %s512_s17 }
  0x6f   : > { %s19539_s8 = sld [smem:[#allocation27_spill]] }
  0x75   : > { %s16734_s20 = scalar_lea.hbm %s19539_s8, 768 }
  0x76   : > { %p16735_p13 = scmp.ne.s32.totalorder %s19539_s8, %s16734_s20  ;;  %p16741_p5 = scmp.lt.u32.totalorder %s16734_s20, %s19539_s8 }
  0x78   : > { %p16737_p0 = pnand %p16735_p13, %p17059_p8 }
  0x7a   : > { %p16738_p2 = pneg %p16737_p0 }
  0x7c   : > { %p16743_p7 = pnand %p16741_p5, %p16738_p2 }
  0x7e   : > { %16746 = shalt.err (!%p16743_p7)
}
  0x7f   : > { %s16747_s21 = scalar_lea.vmem %s491_s5, 768  ;;  %p16755_p11 = scmp.lt.s32.totalorder %s491_s5, %s491_s5 }
  0x80   : > { %p16748_p9 = scmp.ne.s32.totalorder %s491_s5, %s16747_s21  ;;  %p16756_p12 = scmp.lt.s32.totalorder %s16747_s21, %s16747_s21 }
  0x82   : > { %p16750_p4 = pnand %p16748_p9, %p17059_p8  ;;  %p16757_p1 = por %p16756_p12, %p16755_p11 }
  0x84   : > { %p16751_p10 = pneg %p16750_p4 }
  0x86   : > { %p16758_p3 = pnand %p16757_p1, %p16751_p10 }
  0x88   : > { %16761 = shalt.err (!%p16758_p3)
}
  0x89   : > { %s19540_s2 = smov 64   ;;  %s16762_s23 = scalar_lea.hbm %s19496_s12, 640 }
  0x8a   : > { %16514 = dma.hbm_to_vmem [thread:$0]  (!%p17043_p6), %s19539_s8, 768, %s491_s5, [#allocation9], %s19540_s2, %s19540_s2, %s16904_s6  }
  0x8b   : > { %p16763_p1 = scmp.ne.s32.totalorder %s19496_s12, %s16762_s23  ;;  %p16769_p0 = scmp.lt.u32.totalorder %s16762_s23, %s19496_s12 }
  0x8d   : > { %p16765_p3 = pnand %p16763_p1, %p17059_p8 }
  0x8f   : > { %p16766_p13 = pneg %p16765_p3 }
  0x91   : > { %p16771_p2 = pnand %p16769_p0, %p16766_p13 }
  0x93   : > { %16774 = shalt.err (!%p16771_p2)
}
  0x94   : > { %s16775_s21 = scalar_lea.vmem %s513_s17, 640  ;;  %p16783_p4 = scmp.lt.s32.totalorder %s513_s17, %s513_s17 }
  0x95   : > { %p16776_p5 = scmp.ne.s32.totalorder %s513_s17, %s16775_s21  ;;  %p16784_p10 = scmp.lt.s32.totalorder %s16775_s21, %s16775_s21 }
  0x97   : > { %p16778_p7 = pnand %p16776_p5, %p17059_p8  ;;  %p16785_p11 = por %p16784_p10, %p16783_p4 }
  0x99   : > { %p16779_p9 = pneg %p16778_p7 }
  0x9b   : > { %p16786_p12 = pnand %p16785_p11, %p16779_p9 }
  0x9d   : > { %16789 = shalt.err (!%p16786_p12)
}
  0x9e   : > { %s16907_s6 = smov 128   ;;  %s16908_s18 = smov 8  }
  0x9f   : > { %16517 = dma.hbm_to_vmem [thread:$0]  (!%p17043_p6), %s19496_s12, 640, %s513_s17, [#allocation12], %s16907_s6, %s16907_s6, %s16908_s18  }
  0xa0   : > { %s11281_s10 = sadd.s32 4294967294, %s16898_s27   ;;  %s17173_s3 = sadd.s32 1, %s16898_s27  }
  0xa1   : > { %s43_s15 = sadd.s32 1, %s16894_s26  ;;  %s40_s22 = ssub.s32 %s16898_s27, %s17173_s3 }
  0xa2   : > { %p50_p8 = scmp.ne.s32.totalorder %s16894_s26, %s16890_s25  ;;  %p41_p1 = scmp.eq.s32.totalorder %s40_s22, 0 }
  0xa3   : > { %p51_p3 = scmp.eq.s32.totalorder %s16898_s27, 0  ;;  %p56_p13 = scmp.ne.s32.totalorder %s16890_s25, %s16886_s24 }
  0xa4   : > { %p416_p0 = scmp.eq.s32.totalorder %s17027_s0, 1  ;;  %p19541_p5 = scmp.eq.s32.totalorder %s17027_s0, 0 }
  0xa5   : > { %s17185_s23 = scalar_select %p41_p1, %s16894_s26, %s43_s15  }
  0xa6   : > { %p52_p2 = por %p51_p3, %p50_p8  ;;  %p17189_p7 = por %p19541_p5, %p56_p13 }
  0xa7   : > { %p17193_p6 = por %p416_p0, %p50_p8  ;;  %p422_p9 = scmp.eq.s32.totalorder %s11281_s10, 1 }
  0xa8   : > { %p16531_p4 = scmp.lt.s32.totalorder %s16898_s27, 2  ;;  %s538_s20 = sand.u32 1, %s16894_s26  }
  0xa9   : > { %s19543_s17 = scalar_select %p17193_p6, 1, 0 }
  0xaa   : > { %p17199_p10 = por %p422_p9, %p56_p13  ;;  %s11289_s19 = sshll.u32 %s538_s20, 3 }
  0xab   : > { %s11290_s29 = sshll.u32 %s16898_s27, 7  ;;  %s19545_s18 = sld [smem:[#allocation19_spill]] }
  0xac   : > { %s19544_s9 = scalar_select %p17199_p10, 1, 0 }
  0xad   : > { %s542_s2 = scalar_lea.vmem [#allocation2], %s11289_s19  ;;  %p17209_p11 = pnand %p16531_p4, %p52_p2 }
  0xae   : > { %s549_s15 = sshll.u32 %s542_s2, 4  ;;  %s539_s22 = scalar_lea.sflag [#allocation3], %s538_s20  ;;  %s17213_s15 = int_to_ptr.vmem [resolvable:$true] %s549_s15 }
  0xaf   : > { %p16792_p8 = pneg %p17209_p11 }
  0xb1   : > { %s17207_s5 = scalar_lea.hbm %s19545_s18, %s11290_s29  ;;  %s16795_s21 = scalar_lea.hbm %s19545_s18, 256 }
  0xb2   : > { %s16790_s4 = scalar_lea.hbm %s17207_s5, 128  ;;  %p16796_p13 = scmp.lt.u32.totalorder %s17207_s5, %s19545_s18 }
  0xb3   : > { %p16791_p12 = scmp.ne.s32.totalorder %s17207_s5, %s16790_s4  ;;  %p16797_p0 = scmp.lt.u32.totalorder %s16795_s21, %s16790_s4 }
  0xb4   : > { %p16799_p5 = scmp.lt.u32.totalorder %s16790_s4, %s17207_s5 }
  0xb5   : > { %p16793_p1 = pnand %p16792_p8, %p16791_p12  ;;  %p16798_p2 = por %p16797_p0, %p16796_p13 }
  0xb7   : > { %p16794_p3 = pneg %p16793_p1  ;;  %p16800_p9 = por %p16799_p5, %p16798_p2 }
  0xb9   : > { %p16801_p4 = pnand %p16800_p9, %p16794_p3 }
  0xbb   : > { %16804 = shalt.err (!%p16801_p4)
}
  0xbc   : > { %s16805_s20 = scalar_lea.vmem %s17213_s15, 128  ;;  %s16909_s29 = smov [#allocation2]  }
  0xbd   : > { %p16806_p12 = scmp.ne.s32.totalorder %s17213_s15, %s16805_s20  ;;  %s16810_s19 = sshll.u32 %s16909_s29, 4  ;;  %s16811_s19 = int_to_ptr.vmem [resolvable:$false] %s16810_s19 }
  0xbe   : > { %s16812_s6 = scalar_lea.vmem %s16811_s19, 256  ;;  %p16813_p6 = scmp.lt.s32.totalorder %s17213_s15, %s16811_s19 }
  0xbf   : > { %p16808_p1 = pnand %p16806_p12, %p16792_p8  ;;  %p16814_p13 = scmp.lt.s32.totalorder %s16812_s6, %s16805_s20 }
  0xc1   : > { %p16809_p10 = pneg %p16808_p1  ;;  %p16815_p0 = por %p16814_p13, %p16813_p6 }
  0xc3   : > { %p16816_p2 = pnand %p16815_p0, %p16809_p10 }
  0xc5   : > { %16819 = shalt.err (!%p16816_p2)
}
  0xc6   : > { %16521 = dma.hbm_to_vmem [thread:$0]  (!%p17209_p11), %s17207_s5, 128, %s17213_s15, %s539_s22  }
  0xc7   : > { %p19547_p3 = scmp.ne.s32.totalorder %s19533_s30, 0 }
  0xc8   : > { %s17243_s4 = sand.u32 (!%p19547_p3), 1, %s16890_s25  }
  0xc9   : > { %558 = sbr.rel (%p19547_p3) target bundleno = 5232 (0x1470), region = 88  ;;  %s19516_s21 = sshll.u32 (!%p19547_p3), %s17243_s4, 3 }
  0xca   : > { %s561_s2 = scalar_lea.sflag (!%p19547_p3), [#allocation3], %s17243_s4  ;;  %s564_s20 = scalar_lea.vmem (!%p19547_p3), [#allocation2], %s19516_s21 }
  0xd0   : > { %16865 = dma.done.wait (%p17189_p7), %s561_s2, 128  }
  0xd1   : > { %16867 = vsyncadd (%p17189_p7), %s561_s2, 4294967168  ;;  %p19548_p6 = scmp.eq.s32.totalorder %s17027_s0, 0 }
  0xd3   : > { %16869 = dma.done.wait (%p19548_p6), [#allocation6], 448   ;;  %p19549_p10 = pmov %p19548_p6 }
  0xd4   : > { %p19550_p11 = pmov %p19548_p6 }
  0xd5   : > { %16871 = vsyncadd (%p19549_p10), [#allocation6], 4294966848 }
  0xd6   : > { %16873 = dma.done.wait (%p19550_p11), [#allocation9], 1088   ;;  %p19551_p8 = pmov %p19548_p6 }
  0xd7   : > { %p19552_p5 = pmov %p19548_p6 }
  0xd8   : > { %16875 = vsyncadd (%p19551_p8), [#allocation9], 4294966208 }
  0xd9   : > { %16877 = dma.done.wait (%p19552_p5), [#allocation12], 640   ;;  %p19553_p9 = pmov %p19552_p5 }
  0xda   : > { %v16910_v0 = vmov 0.0|0.0   ;;  %vm16911_vm0 = vmmov 0   ;;  %v16912_v1 = vmov 0.0   ;;  %vm662_vm1 = vcmask 1044480   ;;  %v653_v2 = vld [vmem:[#allocation11] sm:$0xff]  ;;  %v654_v3 = vld [vmem:[#allocation11 + $0x8] sm:$0xff] }
  0xdb   : > { %16879 = vsyncadd (%p19553_p9), [#allocation12], 4294966656  ;;  %14892 = vmatprep.subr.bf16.mxu0 %v16910_v0  ;;  %14898 = vmatprep.subr.bf16.mxu1 %v16910_v0  ;;  %v655_v4 = vld [vmem:[#allocation11 + $0x10] sm:$0xff]  ;;  %vm658_vm2 = vcmask 302080   ;;  %v667_v5 = vand.u32 4294901760, %v653_v2  ;;  %v670_v6 = vand.u32 4294901760, %v654_v3 }
  0xdc   : > { %12508 = vmatprep.mubr.msk.f32.mxu0 %vm16911_vm0, %v16912_v1  ;;  %12521 = vmatprep.mubr.msk.f32.mxu1 %vm16911_vm0, %v16912_v1  ;;  %v656_v7 = vld [vmem:[#allocation11 + $0x18] sm:$0xff]  ;;  %v673_v8 = vand.u32 4294901760, %v655_v4  ;;  %v657_v9 = vld [vmem:[#allocation11 + $0x20] sm:$0x1f]  ;;  %v17319_v32 = vld [vmem:[%s19497_s13] sm:$0xff]  ;;  %vm2203_vm3 = vcmask 1041408  }
  0xdd   : > { %v676_v10 = vand.u32 4294901760, %v656_v7  ;;  %v664_v11 = vsel %vm662_vm1, %v657_v9, 0  ;;  %v17272_v12 = vld [vmem:[%s564_s20] sm:$0xff]  ;;  %v17274_v13 = vpack.c.bf16 %v670_v6, %v667_v5  ;;  %v17276_v14 = vsub.f32 %v653_v2, %v667_v5  ;;  %v17335_v40 = vld [vmem:[%s19497_s13 + $0x10] sm:$0xff]  ;;  %v17342_v43 = vld [vmem:[%s19497_s13 + $0x18] sm:$0xff]  ;;  %s19554_s10 = sld [smem:[#allocation21_spill]] }
  0xde   : > { %v17278_v15 = vsub.f32 %v654_v3, %v670_v6  ;;  %v17280_v16 = vsub.f32 %v655_v4, %v673_v8  ;;  %v17284_v18 = vand.u32 4294901760, %v664_v11  ;;  %v660_v19 = vsel %vm658_vm2, %v17272_v12, 0  ;;  %v17324_v33 = vld [vmem:[%s19497_s13 + $0x8] sm:$0xff]  ;;  %v1168_v54 = vld [vmem:[%s19497_s13 + $0x20] sm:$0x1f]  ;;  %v17400_v61 = vld [vmem:[%s19498_s14 + $0x10] sm:$0xff] }
  0xdf   : > { %v17282_v17 = vsub.f32 %v656_v7, %v676_v10  ;;  %14894 = vmatpush3.bf16.msra.mxu0 %v17274_v13  ;;  %v17289_v20 = vpack.c.bf16 %v676_v10, %v673_v8  ;;  %v749_v21 = vand.u32 4294901760, %v17276_v14  ;;  %v17293_v23 = vand.u32 4294901760, %v660_v19  ;;  %v17380_v56 = vld [vmem:[%s19498_s14] sm:$0xff]  ;;  %v17394_v59 = vld [vmem:[%s19498_s14 + $0x8] sm:$0xff]  ;;  %v17418_v8 = vld [vmem:[%s19498_s14 + $0x18] sm:$0xff]  ;;  %s19555_s19 = sld [smem:[#allocation22_spill]] }
  0xe0   : > { %v756_v22 = vand.u32 4294901760, %v17278_v15  ;;  %14895 = vmatprep.subr.bf16.mxu0 %v16910_v0  ;;  %v763_v24 = vand.u32 4294901760, %v17280_v16  ;;  %v17299_v26 = vsub.f32 %v664_v11, %v17284_v18  ;;  %v14905_v44 = vpack.c.bf16 %v17278_v15, %v17276_v14  ;;  %s19556_s30 = sld [smem:[#allocation30_spill]]  ;;  %s19557_s2 = sld [smem:[#allocation24_spill]] }
  0xe1   : > { %v770_v25 = vand.u32 4294901760, %v17282_v17  ;;  %v750_v27 = vsub.f32 %v17276_v14, %v749_v21  ;;  %v17308_v29 = vsub.f32 %v660_v19, %v17293_v23  ;;  %v1173_v45 = vand.u32 4294901760, %v17319_v32  ;;  %s19558_s21 = sld [smem:[#allocation25_spill]]  ;;  %s19559_s15 = sld [smem:[#allocation28_spill]] }
  0xe2   : > { %v757_v28 = vsub.f32 %v17278_v15, %v756_v22  ;;  %v764_v30 = vsub.f32 %v17280_v16, %v763_v24  ;;  %v777_v37 = vand.u32 4294901760, %v17299_v26  ;;  %v1176_v46 = vand.u32 4294901760, %v17324_v33  ;;  %s16914_s7 = smov 24   ;;  %s11358_s6 = sshll.u32 %s17027_s0, 7 }
  0xe3   : > { %v771_v31 = vsub.f32 %v17282_v17, %v770_v25  ;;  %14897 = vmatpush3.bf16.msra.mxu0 %v17289_v20  ;;  %v751_v34 = vand.u32 4294901760, %v750_v27  ;;  %v17328_v36 = vand.u32 4294901760, %v17308_v29  ;;  %v1179_v50 = vand.u32 4294901760, %v17335_v40  ;;  %s19561_s20 = sshll.u32 %s17243_s4, 3  ;;  %s19562_s29 = sld [smem:[#allocation31_spill]] }
  0xe4   : > { %v758_v35 = vand.u32 4294901760, %v757_v28  ;;  %12506 = vmatprep.subr.mxu0 %v16912_v1  ;;  %v765_v38 = vand.u32 4294901760, %v764_v30  ;;  %v778_v49 = vsub.f32 %v17299_v26, %v777_v37  ;;  %v17360_v51 = vsub.f32 %v17319_v32, %v1173_v45  ;;  %v1674_v30 = vld [vmem:[%s19498_s14 + $0x20] sm:$0x1f]  ;;  %s634_s1 = scalar_lea.vmem [#allocation13], %s19561_s20  ;;  %s11150_s0 = scalar_lea.sflag [#allocation4], %s17243_s4 }
  0xe5   : > { %v772_v39 = vand.u32 4294901760, %v771_v31  ;;  %v739_v42 = vsub.f32 %v17308_v29, %v17328_v36  ;;  %v17365_v52 = vsub.f32 %v17324_v33, %v1176_v46  ;;  %v1182_v53 = vand.u32 4294901760, %v17342_v43  ;;  %s11163_s5 = sshll.u32 %s634_s1, 4  ;;  %p19563_p4 = scmp.ne.s32.totalorder %s19543_s17, 0  ;;  %s19440_s5 = int_to_ptr.vmem [resolvable:$true] %s11163_s5 }
  0xe6   : > { %v14899_v41 = vpack.c.bf16 %v758_v35, %v751_v34  ;;  %v17375_v55 = vsub.f32 %v17335_v40, %v1179_v50  ;;  %v14908_v57 = vpack.c.bf16 %v17282_v17, %v17280_v16  ;;  %v779_v60 = vand.u32 4294901760, %v778_v49  ;;  %s16915_s20 = smov [#allocation13]  }
  0xe7   : > { %12507 = vmatpush3.msra.mxu0 %v17284_v18  ;;  %v17349_v47 = vand.u32 4294901760, %v739_v42  ;;  %v14902_v48 = vpack.c.bf16 %v772_v39, %v765_v38  ;;  %v17389_v58 = vsub.f32 %v17342_v43, %v1182_v53  ;;  %v1170_v62 = vsel %vm662_vm1, %v1168_v54, 0 }
  0xe8   : > { %14900 = vmatpush3.bf16.msra.mxu1 %v14899_v41  ;;  %14904 = vmatprep.subr.bf16.mxu0 %v16910_v0  ;;  %v1255_v63 = vand.u32 4294901760, %v17360_v51  ;;  %v1262_v2 = vand.u32 4294901760, %v17365_v52  ;;  %v1679_v3 = vand.u32 4294901760, %v17380_v56  ;;  %v1269_v4 = vand.u32 4294901760, %v17375_v55 }
  0xe9   : > { %14901 = vmatprep.subr.bf16.mxu1 %v16910_v0  ;;  %12509 = vmatmul.mubr.f32.vlgmr.msra.gmra.mrb[0].mxu0 %v17349_v47  ;;  %v1682_v5 = vand.u32 4294901760, %v17394_v59  ;;  %v1276_v6 = vand.u32 4294901760, %v17389_v58  ;;  %v17421_v9 = vand.u32 4294901760, %v1170_v62  ;;  %v14917_v11 = vpack.c.bf16 %v756_v22, %v749_v21 }
  0xea   : > { %14906 = vmatpush3.bf16.msra.mxu0 %v14905_v44  ;;  %12534 = vmatprep.mubr.msk.f32.mxu0 %vm16911_vm0, %v16912_v1  ;;  %v17413_v7 = vsub.f32 %v17380_v56, %v1679_v3  ;;  %v1256_v19 = vsub.f32 %v17360_v51, %v1255_v63  ;;  %v1263_v27 = vsub.f32 %v17365_v52, %v1262_v2  ;;  %v1685_v28 = vand.u32 4294901760, %v17400_v61 }
  0xeb   : > { %14907 = vmatprep.subr.bf16.mxu0 %v16910_v0  ;;  %v17426_v10 = vsub.f32 %v17394_v59, %v1682_v5  ;;  %v17448_v14 = vsub.f32 %v1170_v62, %v17421_v9  ;;  %v17453_v15 = vsub.f32 %v17375_v55, %v1269_v4  ;;  %v1688_v21 = vand.u32 4294901760, %v17418_v8 }
  0xec   : > { %14903 = vmatpush3.bf16.msra.mxu1 %v14902_v48  ;;  %v1761_v22 = vand.u32 4294901760, %v17413_v7  ;;  %v1277_v31 = vsub.f32 %v17389_v58, %v1276_v6  ;;  %v17466_v35 = vsub.f32 %v17400_v61, %v1685_v28  ;;  %v1676_v39 = vsel %vm662_vm1, %v1674_v30, 0 }
  0xed   : > { %12519 = vmatprep.subr.mxu1 %v16912_v1  ;;  %v1768_v34 = vand.u32 4294901760, %v17426_v10  ;;  %v17469_v38 = vsub.f32 %v17418_v8, %v1688_v21  ;;  %v14920_v41 = vpack.c.bf16 %v770_v25, %v763_v24  ;;  %v1257_v42 = vand.u32 4294901760, %v1256_v19 }
  0xee   : > { %14909 = vmatpush3.bf16.msra.mxu0 %v14908_v57  ;;  %v1264_v44 = vand.u32 4294901760, %v1263_v27  ;;  %v1271_v48 = vand.u32 4294901760, %v17453_v15  ;;  %v1283_v49 = vand.u32 4294901760, %v17448_v14  ;;  %v1762_v16 = vsub.f32 %v17413_v7, %v1761_v22  ;;  %v645_v15 = vld [vmem:[%s19495_s11 + $0x20] sm:$0xff] }
  0xef   : > { %12532 = vmatprep.subr.mxu0 %v16912_v1  ;;  %v1769_v17 = vsub.f32 %v17426_v10, %v1768_v34  ;;  %v1278_v24 = vand.u32 4294901760, %v1277_v31  ;;  %v17489_v25 = vand.u32 4294901760, %v1676_v39  ;;  %v1775_v54 = vand.u32 4294901760, %v17466_v35  ;;  %v646_v31 = vld [vmem:[%s19495_s11 + $0x28] sm:$0xff] }
  0xf0   : > { %12520 = vmatpush3.msra.mxu1 %v779_v60  ;;  %v1782_v57 = vand.u32 4294901760, %v17469_v38  ;;  %v1763_v60 = vand.u32 4294901760, %v1762_v16  ;;  %v17501_v62 = vpack.c.bf16 %v1176_v46, %v1173_v45  ;;  %v17516_v32 = vpack.c.bf16 %v1182_v53, %v1179_v50  ;;  %v649_v16 = vld [vmem:[%s19495_s11 + $0x40] sm:$0xff] }
  0xf1   : > { %12522 = vmatmul.mubr.f32.vlgmr.msra.gmra.mrb[0].mxu1 %v17293_v23  ;;  %14910 = vmatprep.subr.bf16.mxu1 %v16910_v0  ;;  %v1770_v61 = vand.u32 4294901760, %v1769_v17  ;;  %v1776_v33 = vsub.f32 %v17466_v35, %v1775_v54  ;;  %v14938_v40 = vpack.c.bf16 %v1278_v24, %v1271_v48  ;;  %v1284_v43 = vsub.f32 %v17448_v14, %v1283_v49  ;;  %v650_v17 = vld [vmem:[%s19495_s11 + $0x48] sm:$0xff] }
  0xf2   : > { %14912 = vmatpush3.bf16.msra.mxu1 %v17274_v13  ;;  %12547 = vmatprep.mubr.msk.f32.mxu1 %vm16911_vm0, %v16912_v1  ;;  %v14941_v59 = vpack.c.bf16 %v17365_v52, %v17360_v51  ;;  %v14980_v19 = vpack.c.bf16 %v17469_v38, %v17466_v35  ;;  %v14953_v27 = vpack.c.bf16 %v1262_v2, %v1255_v63  ;;  %vm2204_vm4 = vcmask 1042432  }
  0xf3   : > { %12533 = vmatpush3.msra.mxu0 %v17299_v26  ;;  %14913 = vmatprep.subr.bf16.mxu1 %v16910_v0  ;;  %v14935_v26 = vpack.c.bf16 %v1264_v44, %v1257_v42  ;;  %v14971_v45 = vpack.c.bf16 %v1770_v61, %v1763_v60  ;;  %v1777_v46 = vand.u32 4294901760, %v1776_v33  ;;  %v1285_v56 = vand.u32 4294901760, %v1284_v43  ;;  %v648_v42 = vld [vmem:[%s19495_s11 + $0x38] sm:$0xff]  ;;  %v651_v61 = vld [vmem:[%s19495_s11 + $0x50] sm:$0xff] }
  0xf4   : > { %12535 = vmatmul.mubr.f32.vlgmr.msra.gmra.mrb[2].mxu0 %v17308_v29  ;;  %14916 = vmatprep.subr.bf16.mxu0 %v16910_v0  ;;  %v14956_v51 = vpack.c.bf16 %v1276_v6, %v1269_v4  ;;  %v17652_v4 = vpack.c.bf16 %v17272_v12, %v17272_v12  ;;  %v14989_v6 = vpack.c.bf16 %v1768_v34, %v1761_v22  ;;  %v2267_v34 = vand.u32 4294901760, %v645_v15 }
  0xf5   : > { %14918 = vmatpush3.bf16.msra.mxu0 %v14917_v11  ;;  %12560 = vmatprep.mubr.msk.f32.mxu0 %vm16911_vm0, %v16912_v1  ;;  %v14977_v11 = vpack.c.bf16 %v17426_v10, %v17413_v7  ;;  %v14992_v12 = vpack.c.bf16 %v1782_v57, %v1775_v54  ;;  %v641_v7 = vld [vmem:[%s19495_s11] sm:$0xff]  ;;  %v2270_v35 = vand.u32 4294901760, %v646_v31  ;;  %v2276_v48 = vand.u32 4294901760, %v648_v42 }
  0xf6   : > { %14915 = vmatpush3.bf16.msra.mxu1 %v17289_v20  ;;  %14919 = vmatprep.subr.bf16.mxu0 %v16910_v0  ;;  %v2255_v10 = vand.u32 4294901760, %v641_v7  ;;  %v2279_v24 = vand.u32 4294901760, %v649_v16  ;;  %vm2250_vm5 = vcmask 785408   ;;  %vm4849_vm6 = vcmask 195584  }
  0xf7   : > { %12545 = vmatprep.subr.mxu1 %v16912_v1  ;;  %vm5335_vm7 = vcmask 1045504   ;;  %vm5331_vm8 = vcmask 48128   ;;  %vm11130_vm9 = vcmask 23552   ;;  %vm11147_vm10 = vcmask 220160  }
  0xf9   : > { %14921 = vmatpush3.bf16.msra.mxu0 %v14920_v41  ;;  %v647_v41 = vld [vmem:[%s19495_s11 + $0x30] sm:$0xff] }
  0xfa   : > { %12546 = vmatpush3.msra.mxu1 %v17284_v18  ;;  %12558 = vmatprep.subr.mxu0 %v16912_v1  ;;  %v2273_v44 = vand.u32 4294901760, %v647_v41 }
  0xfb   : > { %12548 = vmatmul.mubr.f32.vlgmr.msra.gmra.mrb[2].mxu1 %v17328_v36  ;;  %14922 = vmatprep.subr.bf16.mxu1 %v16910_v0 }
  0xfc   : > { %14924 = vmatpush3.bf16.msra.mxu1 %v17274_v13  ;;  %12573 = vmatprep.mubr.msk.f32.mxu1 %vm16911_vm0, %v16912_v1  ;;  %v17527_v13 = vpack.c.bf16 %v1682_v5, %v1679_v3 }
  0xfd   : > { %12559 = vmatpush3.msra.mxu0 %v777_v37  ;;  %14925 = vmatprep.subr.bf16.mxu1 %v16910_v0  ;;  %v1783_v37 = vsub.f32 %v17469_v38, %v1782_v57  ;;  %v17740_v57 = vsub.f32 %v641_v7, %v2255_v10 }
  0xfe   : > { %12561 = vmatmul.mubr.f32.vlgmr.msra.gmra.mrb[4].mxu0 %v17293_v23  ;;  %14928 = vmatprep.subr.bf16.mxu0 %v16910_v0 }
  0xff   : > { %14930 = vmatpush3.bf16.msra.mxu0 %v17501_v62  ;;  %12586 = vmatprep.mubr.msk.f32.mxu0 %vm16911_vm0, %v16912_v1  ;;  %v1784_v50 = vand.u32 4294901760, %v1783_v37 }
 0x100   : > { %14927 = vmatpush3.bf16.msra.mxu1 %v17289_v20  ;;  %14931 = vmatprep.subr.bf16.mxu0 %v16910_v0  ;;  %v17535_v20 = vpack.c.bf16 %v1688_v21, %v1685_v28 }
 0x101   : > { %12571 = vmatprep.subr.mxu1 %v16912_v1  ;;  %v14974_v3 = vpack.c.bf16 %v1784_v50, %v1777_v46 }
 0x103   : > { %14933 = vmatpush3.bf16.msra.mxu0 %v17516_v32 }
 0x104   : > { %12572 = vmatpush3.msra.mxu1 %v17284_v18  ;;  %12584 = vmatprep.subr.mxu0 %v16912_v1  ;;  %v17544_v18 = vsub.f32 %v1676_v39, %v17489_v25  ;;  %v17712_v39 = vpack.c.bf16 %v2270_v35, %v2267_v34 }
 0x105   : > { %12574 = vmatmul.mubr.f32.vlgmr.msra.gmra.mrb[4].mxu1 %v17293_v23  ;;  %14964 = vmatprep.subr.bf16.mxu1 %v16910_v0 }
 0x106   : > { %14966 = vmatpush3.bf16.msra.mxu1 %v17527_v13  ;;  %12664 = vmatprep.mubr.msk.f32.mxu1 %vm16911_vm0, %v16912_v1  ;;  %v1789_v53 = vand.u32 4294901760, %v17544_v18 }
 0x107   : > { %12585 = vmatpush3.msra.mxu0 %v17421_v9  ;;  %14967 = vmatprep.subr.bf16.mxu1 %v16910_v0 }
 0x108   : > { %14934 = vmatprep.subr.bf16.mxu0 %v16910_v0  ;;  %12587 = vmatmul.mubr.f32.vlgmr.msra.gmra.mrb[6].mxu0 %v17349_v47  ;;  %v1790_v5 = vsub.f32 %v17544_v18, %v1789_v53 }
 0x109   : > { %14936 = vmatpush3.bf16.msra.mxu0 %v14935_v26  ;;  %12599 = vmatprep.mubr.msk.f32.mxu0 %vm16911_vm0, %v16912_v1  ;;  %v2344_v26 = vand.u32 4294901760, %v17740_v57 }
 0x10a   : > { %14937 = vmatprep.subr.bf16.mxu0 %v16910_v0  ;;  %14969 = vmatpush3.bf16.msra.mxu1 %v17535_v20  ;;  %v1791_v8 = vand.u32 4294901760, %v1790_v5  ;;  %v17782_v5 = vsub.f32 %v645_v15, %v2267_v34 }
 0x10b   : > { %12662 = vmatprep.subr.mxu1 %v16912_v1  ;;  %v2345_v33 = vsub.f32 %v17740_v57, %v2344_v26 }
 0x10d   : > { %14939 = vmatpush3.bf16.msra.mxu0 %v14938_v40 }
 0x10e   : > { %12597 = vmatprep.subr.mxu0 %v16912_v1  ;;  %12663 = vmatpush3.msra.mxu1 %v17489_v25 }
 0x10f   : > { %14970 = vmatprep.subr.bf16.mxu1 %v16910_v0  ;;  %12665 = vmatmul.mubr.f32.vlgmr.msra.gmra.mrb[6].mxu1 %v17349_v47  ;;  %v14944_v47 = vpack.c.bf16 %v17389_v58, %v17375_v55  ;;  %v16585_v55 = vld [vmem:[#allocation5 + $0x8] sm:$0xff]   ;;  %v16586_v58 = vld [vmem:[#allocation5 + $0x10] ss:$0 sps:$4 sm:$0x77]  }
 0x110   : > { %14972 = vmatpush3.bf16.msra.mxu1 %v14971_v45  ;;  %12677 = vmatprep.mubr.msk.f32.mxu1 %vm16911_vm0, %v16912_v1  ;;  %v2346_v45 = vand.u32 4294901760, %v2345_v33 }
 0x111   : > { %12598 = vmatpush3.msra.mxu0 %v1285_v56  ;;  %14973 = vmatprep.subr.bf16.mxu1 %v16910_v0 }
 0x112   : > { %14940 = vmatprep.subr.bf16.mxu0 %v16910_v0  ;;  %12600 = vmatmul.mubr.f32.vlgmr.msra.gmra.mrb[6].mxu0 %v17293_v23 }
 0x113   : > { %14942 = vmatpush3.bf16.msra.mxu0 %v14941_v59  ;;  %12612 = vmatprep.mubr.msk.f32.mxu0 %vm16911_vm0, %v16912_v1 }
 0x114   : > { %14943 = vmatprep.subr.bf16.mxu0 %v16910_v0  ;;  %14975 = vmatpush3.bf16.msra.mxu1 %v14974_v3 }
 0x115   : > { %12675 = vmatprep.subr.mxu1 %v16912_v1 }
 0x117   : > { %14945 = vmatpush3.bf16.msra.mxu0 %v14944_v47  ;;  %v17784_v47 = vsub.f32 %v646_v31, %v2270_v35 }
 0x118   : > { %12610 = vmatprep.subr.mxu0 %v16912_v1  ;;  %12676 = vmatpush3.msra.mxu1 %v1791_v8 }
 0x119   : > { %14976 = vmatprep.subr.bf16.mxu1 %v16910_v0  ;;  %12678 = vmatmul.mubr.f32.vlgmr.msra.gmra.mrb[6].mxu1 %v17293_v23 }
 0x11a   : > { %14978 = vmatpush3.bf16.msra.mxu1 %v14977_v11  ;;  %12690 = vmatprep.mubr.msk.f32.mxu1 %vm16911_vm0, %v16912_v1 }
 0x11b   : > { %12611 = vmatpush3.msra.mxu0 %v17448_v14  ;;  %14979 = vmatprep.subr.bf16.mxu1 %v16910_v0  ;;  %v644_v14 = vld [vmem:[%s19495_s11 + $0x18] sm:$0xff] }
 0x11c   : > { %14946 = vmatprep.subr.bf16.mxu0 %v16910_v0  ;;  %12613 = vmatmul.mubr.f32.vlgmr.msra.gmra.mrb[6].mxu0 %v17308_v29  ;;  %v2264_v22 = vand.u32 4294901760, %v644_v14 }
 0x11d   : > { %14948 = vmatpush3.bf16.msra.mxu0 %v17501_v62  ;;  %12625 = vmatprep.mubr.msk.f32.mxu0 %vm16911_vm0, %v16912_v1 }
 0x11e   : > { %14949 = vmatprep.subr.bf16.mxu0 %v16910_v0  ;;  %14981 = vmatpush3.bf16.msra.mxu1 %v14980_v19  ;;  %v17766_v43 = vsub.f32 %v644_v14, %v2264_v22  ;;  %v2372_v19 = vand.u32 4294901760, %v17782_v5 }
 0x11f   : > { %12688 = vmatprep.subr.mxu1 %v16912_v1 }
 0x121   : > { %14951 = vmatpush3.bf16.msra.mxu0 %v17516_v32 }
 0x122   : > { %12623 = vmatprep.subr.mxu0 %v16912_v1  ;;  %12689 = vmatpush3.msra.mxu1 %v17544_v18 }
 0x123   : > { %14982 = vmatprep.subr.bf16.mxu1 %v16910_v0  ;;  %12691 = vmatmul.mubr.f32.vlgmr.msra.gmra.mrb[6].mxu1 %v17308_v29  ;;  %v16584_v29 = vld [vmem:[#allocation5] sm:$0xff]  }
 0x124   : > { %14984 = vmatpush3.bf16.msra.mxu1 %v17527_v13  ;;  %12703 = vmatprep.mubr.msk.f32.mxu1 %vm16911_vm0, %v16912_v1 }
 0x125   : > { %12624 = vmatpush3.msra.mxu0 %v17421_v9  ;;  %14985 = vmatprep.subr.bf16.mxu1 %v16910_v0 }
 0x126   : > { %14952 = vmatprep.subr.bf16.mxu0 %v16910_v0  ;;  %12626 = vmatmul.mubr.f32.vlgmr.msra.gmra.mrb[6].mxu0 %v17328_v36 }
 0x127   : > { %14954 = vmatpush3.bf16.msra.mxu0 %v14953_v27  ;;  %12638 = vmatprep.mubr.msk.f32.mxu0 %vm16911_vm0, %v16912_v1  ;;  %v2379_v27 = vand.u32 4294901760, %v17784_v47 }
 0x128   : > { %14955 = vmatprep.subr.bf16.mxu0 %v16910_v0  ;;  %14987 = vmatpush3.bf16.msra.mxu1 %v17535_v20 }
 0x129   : > { %12701 = vmatprep.subr.mxu1 %v16912_v1 }
 0x12b   : > { %14957 = vmatpush3.bf16.msra.mxu0 %v14956_v51 }
 0x12c   : > { %12636 = vmatprep.subr.mxu0 %v16912_v1  ;;  %12702 = vmatpush3.msra.mxu1 %v17489_v25 }
 0x12d   : > { %14988 = vmatprep.subr.bf16.mxu1 %v16910_v0  ;;  %12704 = vmatmul.mubr.f32.vlgmr.msra.gmra.mrb[6].mxu1 %v17328_v36  ;;  %v16913_v36 = vmov 65535  }
 0x12e   : > { %12716 = vmatprep.mubr.msk.f32.mxu1 %vm16911_vm0, %v16912_v1  ;;  %v2205_v52 = vsel %vm2203_vm3, 4294967295, %v16913_v36  ;;  %14990 = vmatpush3.bf16.msra.mxu1 %v14989_v6  ;;  %v2380_v36 = vsub.f32 %v17784_v47, %v2379_v27 }
 0x12f   : > { %12637 = vmatpush3.msra.mxu0 %v1283_v49  ;;  %v17646_v63 = vsel %vm2204_vm4, %v2205_v52, 0  ;;  %14991 = vmatprep.subr.bf16.mxu1 %v16910_v0  ;;  %v17726_v49 = vpack.c.bf16 %v2276_v48, %v2273_v44  ;;  %v17796_v52 = vsub.f32 %v647_v41, %v2273_v44 }
 0x130   : > { %14958 = vmatprep.subr.bf16.mxu0 %v16910_v0  ;;  %12639 = vmatmul.mubr.f32.vlgmr.msra.gmra.mrb[6].mxu0 %v17293_v23  ;;  %v2208_v2 = vand.u32 %v16586_v58, %v17646_v63 }
 0x131   : > { %14960 = vmatpush3.bf16.msra.mxu0 %v17501_v62  ;;  %12651 = vmatprep.mubr.msk.f32.mxu0 %vm16911_vm0, %v16912_v1  ;;  %v652_v62 = vld [vmem:[%s19495_s11 + $0x58] sm:$0xff]  ;;  %v2386_v6 = vand.u32 4294901760, %v17796_v52 }
 0x132   : > { %14961 = vmatprep.subr.bf16.mxu0 %v16910_v0  ;;  %14993 = vmatpush3.bf16.msra.mxu1 %v14992_v12 }
 0x133   : > { %12714 = vmatprep.subr.mxu1 %v16912_v1 }
 0x135   : > { %14963 = vmatpush3.bf16.msra.mxu0 %v17516_v32  ;;  %v2285_v32 = vand.u32 4294901760, %v651_v61 }
 0x136   : > { %12649 = vmatprep.subr.mxu0 %v16912_v1  ;;  %12715 = vmatpush3.msra.mxu1 %v1789_v53  ;;  %v2365_v53 = vand.u32 4294901760, %v17766_v43 }
 0x137   : > { %14994 = vmatprep.subr.bf16.mxu1 %v16910_v0  ;;  %12717 = vmatmul.mubr.f32.vlgmr.msra.gmra.mrb[6].mxu1 %v17293_v23  ;;  %v17822_v35 = vsub.f32 %v651_v61, %v2285_v32 }
 0x138   : > { %14996 = vmatpush3.bf16.msra.mxu1 %v17527_v13  ;;  %12729 = vmatprep.mubr.msk.f32.mxu1 %vm16911_vm0, %v16912_v1  ;;  %v2288_v13 = vand.u32 4294901760, %v652_v62  ;;  %v2366_v3 = vsub.f32 %v17766_v43, %v2365_v53 }
 0x139   : > { %12650 = vmatpush3.msra.mxu0 %v17421_v9  ;;  %14997 = vmatprep.subr.bf16.mxu1 %v16910_v0  ;;  %v642_v9 = vld [vmem:[%s19495_s11 + $0x8] sm:$0xff] }
 0x13a   : > { %12652 = vmatmul.mubr.f32.vlgmr.msra.gmra.mrb[6].mxu0 %v17293_v23  ;;  %12732 = vmatprep.subr.bf16.mxu0 %v16912_v1  ;;  %v2258_v28 = vand.u32 4294901760, %v642_v9  ;;  %v17756_v18 = vpack.c.bf16 %v2288_v13, %v2285_v32  ;;  %v2367_v11 = vand.u32 4294901760, %v2366_v3  ;;  %v17824_v41 = vsub.f32 %v652_v62, %v2288_v13 }
 0x13b   : > { %12733 = vmatpush3.bf16.msra.mxu0 %v16584_v29  ;;  %12738 = vmatprep.mubr.msk.bf16.mxu0 %vm16911_vm0, %v16912_v1  ;;  %v2373_v29 = vsub.f32 %v17782_v5, %v2372_v19 }
 0x13c   : > { %12734 = vmatprep.subr.bf16.mxu0 %v16912_v1  ;;  %14999 = vmatpush3.bf16.msra.mxu1 %v17535_v20  ;;  %v17690_v30 = vpack.c.bf16 %v2258_v28, %v2255_v10  ;;  %v17742_v60 = vsub.f32 %v642_v9, %v2258_v28  ;;  %v2387_v9 = vsub.f32 %v17796_v52, %v2386_v6 }
 0x13d   : > { %12727 = vmatprep.subr.mxu1 %v16912_v1  ;;  %v2374_v58 = vand.u32 4294901760, %v2373_v29  ;;  %v17807_v10 = vsub.f32 %v649_v16, %v2279_v24  ;;  %v2414_v16 = vand.u32 4294901760, %v17822_v35 }
 0x13e   : > { %v2351_v20 = vand.u32 4294901760, %v17742_v60  ;;  %v2388_v14 = vand.u32 4294901760, %v2387_v9 }
 0x13f   : > { %12735 = vmatpush3.bf16.msra.mxu0 %v16585_v55  ;;  %v17798_v55 = vsub.f32 %v648_v42, %v2276_v48  ;;  %v2400_v15 = vand.u32 4294901760, %v17807_v10 }
 0x140   : > { %12736 = vmatprep.subr.bf16.mxu0 %v16912_v1  ;;  %12728 = vmatpush3.msra.mxu1 %v17489_v25  ;;  %v2282_v25 = vand.u32 4294901760, %v650_v17  ;;  %v2352_v37 = vsub.f32 %v17742_v60, %v2351_v20 }
 0x141   : > { %12730 = vmatmul.mubr.f32.vlgmr.msra.gmra.mrb[6].mxu1 %v17293_v23  ;;  %15000 = vmatprep.subr.bf16.mxu1 %v16910_v0  ;;  %v643_v23 = vld [vmem:[%s19495_s11 + $0x10] sm:$0xff]  ;;  %v2393_v12 = vand.u32 4294901760, %v17798_v55  ;;  %v2401_v31 = vsub.f32 %v17807_v10, %v2400_v15 }
 0x142   : > { %12766 = vmatprep.mubr.msk.f32.mxu1 %vm16911_vm0, %v16912_v1  ;;  %15002 = vmatpush3.bf16.msra.mxu1 %v17690_v30  ;;  %v2261_v21 = vand.u32 4294901760, %v643_v23  ;;  %v17738_v54 = vpack.c.bf16 %v2282_v25, %v2279_v24  ;;  %v2353_v46 = vand.u32 4294901760, %v2352_v37  ;;  %v17809_v28 = vsub.f32 %v650_v17, %v2282_v25 }
 0x143   : > { %12737 = vmatpush3.bf16.msra.mxu0 %v2208_v2  ;;  %15003 = vmatprep.subr.bf16.mxu1 %v16910_v0  ;;  %v2381_v2 = vand.u32 4294901760, %v2380_v36  ;;  %v2402_v44 = vand.u32 4294901760, %v2401_v31  ;;  %v2421_v17 = vand.u32 4294901760, %v17824_v41  ;;  %v2415_v25 = vsub.f32 %v17822_v35, %v2414_v16 }
 0x144   : > { %15108 = vmatprep.subr.bf16.mxu0 %v16910_v0  ;;  %v17708_v38 = vpack.c.bf16 %v2264_v22, %v2261_v21  ;;  %v17764_v40 = vsub.f32 %v643_v23, %v2261_v21  ;;  %v17774_v56 = vpack.c.bf16 %v2353_v46, %v2346_v45  ;;  %v2394_v23 = vsub.f32 %v17798_v55, %v2393_v12 }
 0x145   : > { %v17802_v7 = vpack.c.bf16 %v2381_v2, %v2374_v58  ;;  %v2407_v21 = vand.u32 4294901760, %v17809_v28  ;;  %v2422_v61 = vsub.f32 %v17824_v41, %v2421_v17  ;;  %v2416_v62 = vand.u32 4294901760, %v2415_v25 }
 0x146   : > { %12739 = vmatmul.mubr.msk.bf16.vlgmr.msra.gmra.mrb[8].mxu0 %vm658_vm2, %v17652_v4  ;;  %15005 = vmatpush3.bf16.msra.mxu1 %v17708_v38  ;;  %v2358_v50 = vand.u32 4294901760, %v17764_v40  ;;  %v2395_v22 = vand.u32 4294901760, %v2394_v23  ;;  %v17842_v45 = vpack.c.bf16 %v17742_v60, %v17740_v57  ;;  %v17846_v46 = vpack.c.bf16 %v17766_v43, %v17764_v40  ;;  %v16587_v43 = vld [vmem:[%s19554_s10] sm:$0xff]  }
 0x147   : > { %12928 = vmatprep.mubr.msk.f32.mxu0 %vm16911_vm0, %v16912_v1  ;;  %15110 = vmatpush3.bf16.msra.mxu0 %v17690_v30  ;;  %v2408_v34 = vsub.f32 %v17809_v28, %v2407_v21  ;;  %v2423_v32 = vand.u32 4294901760, %v2422_v61  ;;  %v17854_v2 = vpack.c.bf16 %v17798_v55, %v17796_v52  ;;  %v17858_v23 = vpack.c.bf16 %v17809_v28, %v17807_v10 }
 0x148   : > { %15111 = vmatprep.subr.bf16.mxu0 %v16910_v0  ;;  %15006 = vmatprep.subr.bf16.mxu1 %v16910_v0  ;;  %v2359_v59 = vsub.f32 %v17764_v40, %v2358_v50  ;;  %v17826_v42 = vpack.c.bf16 %v2395_v22, %v2388_v14  ;;  %v18007_v57 = vpack.c.bf16 %v2365_v53, %v2358_v50  ;;  %v16588_v50 = vld [vmem:[%s19554_s10 + $0x8] sm:$0xff]   ;;  %v16589_v53 = vld [vmem:[%s19554_s10 + $0x10] sm:$0xff]  }
 0x149   : > { %v2409_v48 = vand.u32 4294901760, %v2408_v34  ;;  %v17838_v13 = vpack.c.bf16 %v2423_v32, %v2416_v62  ;;  %v2181_v32 = vlaneseq  ;;  %v18023_v60 = vpack.c.bf16 %v2379_v27, %v2372_v19  ;;  %v16592_v19 = vld [vmem:[%s19554_s10 + $0x28] sm:$0xff]  }
 0x14a   : > { %15008 = vmatpush3.bf16.msra.mxu1 %v17712_v39  ;;  %v2360_v8 = vand.u32 4294901760, %v2359_v59  ;;  %v18053_v40 = vpack.c.bf16 %v2421_v17, %v2414_v16 }
 0x14b   : > { %15113 = vmatpush3.bf16.msra.mxu0 %v17708_v38  ;;  %15009 = vmatprep.subr.bf16.mxu1 %v16910_v0  ;;  %v17830_v24 = vpack.c.bf16 %v2409_v48, %v2402_v44  ;;  %v17862_v48 = vpack.c.bf16 %v17824_v41, %v17822_v35 }
 0x14c   : > { %15114 = vmatprep.subr.bf16.mxu0 %v16910_v0  ;;  %v17788_v51 = vpack.c.bf16 %v2367_v11, %v2360_v8  ;;  %v17850_v11 = vpack.c.bf16 %v17784_v47, %v17782_v5  ;;  %v16590_v5 = vld [vmem:[%s19554_s10 + $0x18] sm:$0xff]   ;;  %v16591_v47 = vld [vmem:[%s19554_s10 + $0x20] sm:$0xff]   ;;  %s16824_s10 = sshll.u32 %s16915_s20, 4  ;;  %s16825_s10 = int_to_ptr.vmem [resolvable:$false] %s16824_s10 }
 0x14d   : > { %p16827_p13 = scmp.lt.s32.totalorder %s19440_s5, %s16825_s10 }
 0x14e   : > { %15011 = vmatpush3.bf16.msra.mxu1 %v17726_v49 }
 0x14f   : > { %15116 = vmatpush3.bf16.msra.mxu0 %v17712_v39  ;;  %15012 = vmatprep.subr.bf16.mxu1 %v16910_v0 }
 0x150   : > { %15117 = vmatprep.subr.bf16.mxu0 %v16910_v0 }
 0x152   : > { %15014 = vmatpush3.bf16.msra.mxu1 %v17738_v54 }
 0x153   : > { %15119 = vmatpush3.bf16.msra.mxu0 %v17726_v49  ;;  %15015 = vmatprep.subr.bf16.mxu1 %v16910_v0 }
 0x154   : > { %15120 = vmatprep.subr.bf16.mxu0 %v16910_v0 }
 0x156   : > { %15017 = vmatpush3.bf16.msra.mxu1 %v17756_v18 }
 0x157   : > { %15122 = vmatpush3.bf16.msra.mxu0 %v17738_v54  ;;  %15018 = vmatprep.subr.bf16.mxu1 %v16910_v0 }
 0x158   : > { %15123 = vmatprep.subr.bf16.mxu0 %v16910_v0 }
 0x15b   : > { %15125 = vmatpush3.bf16.msra.mxu0 %v17756_v18 }
 0x15c   : > { %15126 = vmatprep.subr.bf16.mxu0 %v16910_v0 }
 0x1bc   : > { %v742_v33 = vpop.f32.mrb[0].mxu0 }
 0x1bd   : > { %v12510_v37 = vpop.f32.mrb[1].mxu0 }
 0x1c4   : > { %v838_v59 = vpop.f32.mrb[0].mxu1 }
 0x1c5   : > { %v839_v3 = vadd.f32 %v838_v59, %v742_v33  ;;  %v12523_v8 = vpop.f32.mrb[1].mxu1  ;;  %v17868_v59 = vshrl.u32 %v2181_v32, 7 }
 0x1c6   : > { %v17874_v8 = vld [vmem:[%s19500_s16] sm:$0xff] }
 0x1c7   : > { %v920_v29 = vpop.f32.mrb[2].mxu0  ;;  %v3450_v35 = vsub.s32 2, %v17868_v59 }
 0x1c8   : > { %v921_v36 = vadd.f32 %v920_v29, %v839_v3  ;;  %v12536_v58 = vpop.f32.mrb[3].mxu0  ;;  %v2183_v3 = vsub.s32 0, %v17868_v59 }
 0x1ca   : > { %v2184_v29 = vrot.slane %v17874_v8, %v2183_v3 }
 0x1ce   : > { %v998_v9 = vpop.f32.mrb[2].mxu1 }
 0x1cf   : > { %v999_v14 = vadd.f32 %v998_v9, %v921_v36  ;;  %v12549_v22 = vpop.f32.mrb[3].mxu1 }
 0x1d1   : > { %v1084_v31 = vpop.f32.mrb[4].mxu0 }
 0x1d2   : > { %v1085_v34 = vadd.f32 %v1084_v31, %v999_v14  ;;  %v12562_v44 = vpop.f32.mrb[5].mxu0 }
 0x1d8   : > { %v1160_v25 = vpop.f32.mrb[4].mxu1 }
 0x1d9   : > { %v17864_v61 = vadd.f32 %v1160_v25, %v1085_v34  ;;  %v12575_v62 = vpop.f32.mrb[5].mxu1 }
 0x20d   : > { %v17866_v33 = vpop.f32.mrb[6].mxu0 }
 0x20e   : > { %v12653_v37 = vpop.f32.mrb[7].mxu0 }
 0x219   : > { %v2244_v36 = vpop.f32.mrb[8].mxu0 }
 0x21a   : > { %v17879_v58 = vadd.f32 %v2244_v36, %v2184_v29  ;;  %v12740_v9 = vpop.f32.mrb[9].mxu0 }
 0x21b   : > { %v2247_v14 = vpop.f32.mrb[10].mxu0 }
 0x21c   : > { %v2252_v22 = vsel %vm2250_vm5, %v17879_v58, 0  ;;  %v2843_v31 = vmul.f32 %v17879_v58, %v17879_v58  ;;  %v12741_v34 = vpop.f32.mrb[11].mxu0 }
 0x21d   : > { %v17885_v44 = vand.u32 4294901760, %v2252_v22  ;;  %v17916_v34 = vpop.f32.mrb[6].mxu1 }
 0x21e   : > { %v2845_v25 = vsel %vm2250_vm5, %v2843_v31, 0 }
 0x21f   : > { %v17889_v62 = vsub.f32 %v2252_v22, %v17885_v44  ;;  %v17891_v32 = vand.u32 4294901760, %v2845_v25 }
 0x221   : > { %v17894_v37 = vsub.f32 %v2845_v25, %v17891_v32  ;;  %v2333_v29 = vand.u32 4294901760, %v17889_v62  ;;  %v12731_v25 = vpop.f32.mrb[7].mxu1 }
 0x223   : > { %v2334_v36 = vsub.f32 %v17889_v62, %v2333_v29  ;;  %v2926_v9 = vand.u32 4294901760, %v17894_v37 }
 0x225   : > { %v2335_v14 = vand.u32 4294901760, %v2334_v36  ;;  %v2927_v31 = vsub.f32 %v17894_v37, %v2926_v9  ;;  %v17995_v36 = vpack.c.bf16 %v2351_v20, %v2344_v26  ;;  %v18033_v26 = vpack.c.bf16 %v2393_v12, %v2386_v6 }
 0x226   : > { %v18043_v20 = vpack.c.bf16 %v2407_v21, %v2400_v15  ;;  %v3445_v21 = vsub.s32 1, %v17868_v59 }
 0x227   : > { %12767 = vmatmul.mubr.f32.vlgmr.msra.gmra.mrb[8].mxu1 %v2335_v14  ;;  %v2928_v22 = vand.u32 4294901760, %v2927_v31 }
 0x228   : > { %15020 = vmatpush3.bf16.msra.mxu1 %v17774_v56  ;;  %12793 = vmatprep.mubr.msk.f32.mxu1 %vm16911_vm0, %v16912_v1  ;;  %v3446_v16 = vrot.slane %v17874_v8, %v3445_v21 }
 0x229   : > { %12929 = vmatmul.mubr.f32.vlgmr.msra.gmra.mrb[12].mxu0 %v2928_v22  ;;  %15021 = vmatprep.subr.bf16.mxu1 %v16910_v0 }
 0x22a   : > { %15128 = vmatpush3.bf16.msra.mxu0 %v17774_v56  ;;  %12955 = vmatprep.mubr.msk.f32.mxu0 %vm16911_vm0, %v16912_v1 }
 0x22b   : > { %15129 = vmatprep.subr.bf16.mxu0 %v16910_v0 }
 0x22c   : > { %15023 = vmatpush3.bf16.msra.mxu1 %v17788_v51 }
 0x22d   : > { %15024 = vmatprep.subr.bf16.mxu1 %v16910_v0 }
 0x22e   : > { %15131 = vmatpush3.bf16.msra.mxu0 %v17788_v51 }
 0x22f   : > { %15132 = vmatprep.subr.bf16.mxu0 %v16910_v0 }
 0x230   : > { %15026 = vmatpush3.bf16.msra.mxu1 %v17802_v7 }
 0x231   : > { %15027 = vmatprep.subr.bf16.mxu1 %v16910_v0 }
 0x232   : > { %15134 = vmatpush3.bf16.msra.mxu0 %v17802_v7 }
 0x233   : > { %15135 = vmatprep.subr.bf16.mxu0 %v16910_v0 }
 0x234   : > { %15029 = vmatpush3.bf16.msra.mxu1 %v17826_v42 }
 0x235   : > { %15030 = vmatprep.subr.bf16.mxu1 %v16910_v0 }
 0x236   : > { %15137 = vmatpush3.bf16.msra.mxu0 %v17826_v42 }
 0x237   : > { %15138 = vmatprep.subr.bf16.mxu0 %v16910_v0 }
 0x238   : > { %15032 = vmatpush3.bf16.msra.mxu1 %v17830_v24 }
 0x239   : > { %15033 = vmatprep.subr.bf16.mxu1 %v16910_v0 }
 0x23a   : > { %15140 = vmatpush3.bf16.msra.mxu0 %v17830_v24 }
 0x23b   : > { %15141 = vmatprep.subr.bf16.mxu0 %v16910_v0 }
 0x23c   : > { %15035 = vmatpush3.bf16.msra.mxu1 %v17838_v13 }
 0x23d   : > { %15036 = vmatprep.subr.bf16.mxu1 %v16910_v0 }
 0x23e   : > { %15143 = vmatpush3.bf16.msra.mxu0 %v17838_v13 }
 0x23f   : > { %12794 = vmatmul.mubr.f32.vlgmr.msra.gmra.mrb[8].mxu1 %v17885_v44  ;;  %15144 = vmatprep.subr.bf16.mxu0 %v16910_v0 }
 0x240   : > { %15038 = vmatpush3.bf16.msra.mxu1 %v17842_v45  ;;  %12820 = vmatprep.mubr.msk.f32.mxu1 %vm16911_vm0, %v16912_v1 }
 0x241   : > { %12956 = vmatmul.mubr.f32.vlgmr.msra.gmra.mrb[12].mxu0 %v17891_v32  ;;  %15039 = vmatprep.subr.bf16.mxu1 %v16910_v0 }
 0x242   : > { %15146 = vmatpush3.bf16.msra.mxu0 %v17842_v45  ;;  %12982 = vmatprep.mubr.msk.f32.mxu0 %vm16911_vm0, %v16912_v1 }
 0x243   : > { %15147 = vmatprep.subr.bf16.mxu0 %v16910_v0 }
 0x244   : > { %15041 = vmatpush3.bf16.msra.mxu1 %v17846_v46 }
 0x245   : > { %15042 = vmatprep.subr.bf16.mxu1 %v16910_v0 }
 0x246   : > { %15149 = vmatpush3.bf16.msra.mxu0 %v17846_v46 }
 0x247   : > { %15150 = vmatprep.subr.bf16.mxu0 %v16910_v0 }
 0x248   : > { %15044 = vmatpush3.bf16.msra.mxu1 %v17850_v11 }
 0x249   : > { %15045 = vmatprep.subr.bf16.mxu1 %v16910_v0 }
 0x24a   : > { %15152 = vmatpush3.bf16.msra.mxu0 %v17850_v11 }
 0x24b   : > { %15153 = vmatprep.subr.bf16.mxu0 %v16910_v0 }
 0x24c   : > { %15047 = vmatpush3.bf16.msra.mxu1 %v17854_v2 }
 0x24d   : > { %15048 = vmatprep.subr.bf16.mxu1 %v16910_v0 }
 0x24e   : > { %15155 = vmatpush3.bf16.msra.mxu0 %v17854_v2 }
 0x24f   : > { %15156 = vmatprep.subr.bf16.mxu0 %v16910_v0 }
 0x250   : > { %15050 = vmatpush3.bf16.msra.mxu1 %v17858_v23 }
 0x251   : > { %15051 = vmatprep.subr.bf16.mxu1 %v16910_v0 }
 0x252   : > { %15158 = vmatpush3.bf16.msra.mxu0 %v17858_v23 }
 0x253   : > { %15159 = vmatprep.subr.bf16.mxu0 %v16910_v0 }
 0x254   : > { %15053 = vmatpush3.bf16.msra.mxu1 %v17862_v48 }
 0x255   : > { %15054 = vmatprep.subr.bf16.mxu1 %v16910_v0 }
 0x256   : > { %15161 = vmatpush3.bf16.msra.mxu0 %v17862_v48 }
 0x257   : > { %12821 = vmatmul.mubr.f32.vlgmr.msra.gmra.mrb[8].mxu1 %v17889_v62  ;;  %15162 = vmatprep.subr.bf16.mxu0 %v16910_v0  ;;  %v3451_v62 = vrot.slane %v17874_v8, %v3450_v35 }
 0x258   : > { %15056 = vmatpush3.bf16.msra.mxu1 %v17690_v30  ;;  %12847 = vmatprep.mubr.msk.f32.mxu1 %vm16911_vm0, %v16912_v1 }
 0x259   : > { %12983 = vmatmul.mubr.f32.vlgmr.msra.gmra.mrb[12].mxu0 %v17894_v37  ;;  %15057 = vmatprep.subr.bf16.mxu1 %v16910_v0 }
 0x25a   : > { %15164 = vmatpush3.bf16.msra.mxu0 %v17690_v30  ;;  %13009 = vmatprep.mubr.msk.f32.mxu0 %vm16911_vm0, %v16912_v1 }
 0x25b   : > { %15165 = vmatprep.subr.bf16.mxu0 %v16910_v0 }
 0x25c   : > { %15059 = vmatpush3.bf16.msra.mxu1 %v17708_v38 }
 0x25d   : > { %15060 = vmatprep.subr.bf16.mxu1 %v16910_v0 }
 0x25e   : > { %15167 = vmatpush3.bf16.msra.mxu0 %v17708_v38 }
 0x25f   : > { %15168 = vmatprep.subr.bf16.mxu0 %v16910_v0 }
 0x260   : > { %15062 = vmatpush3.bf16.msra.mxu1 %v17712_v39 }
 0x261   : > { %15063 = vmatprep.subr.bf16.mxu1 %v16910_v0 }
 0x262   : > { %15170 = vmatpush3.bf16.msra.mxu0 %v17712_v39 }
 0x263   : > { %15171 = vmatprep.subr.bf16.mxu0 %v16910_v0 }
 0x264   : > { %15065 = vmatpush3.bf16.msra.mxu1 %v17726_v49 }
 0x265   : > { %15066 = vmatprep.subr.bf16.mxu1 %v16910_v0 }
 0x266   : > { %15173 = vmatpush3.bf16.msra.mxu0 %v17726_v49 }
 0x267   : > { %15174 = vmatprep.subr.bf16.mxu0 %v16910_v0 }
 0x268   : > { %15068 = vmatpush3.bf16.msra.mxu1 %v17738_v54 }
 0x269   : > { %15069 = vmatprep.subr.bf16.mxu1 %v16910_v0 }
 0x26a   : > { %15176 = vmatpush3.bf16.msra.mxu0 %v17738_v54 }
 0x26b   : > { %15177 = vmatprep.subr.bf16.mxu0 %v16910_v0 }
 0x26c   : > { %15071 = vmatpush3.bf16.msra.mxu1 %v17756_v18 }
 0x26d   : > { %15072 = vmatprep.subr.bf16.mxu1 %v16910_v0 }
 0x26e   : > { %15179 = vmatpush3.bf16.msra.mxu0 %v17756_v18 }
 0x26f   : > { %12848 = vmatmul.mubr.f32.vlgmr.msra.gmra.mrb[8].mxu1 %v2333_v29  ;;  %15180 = vmatprep.subr.bf16.mxu0 %v16910_v0 }
 0x270   : > { %15074 = vmatpush3.bf16.msra.mxu1 %v17995_v36  ;;  %12874 = vmatprep.mubr.msk.f32.mxu1 %vm16911_vm0, %v16912_v1 }
 0x271   : > { %13010 = vmatmul.mubr.f32.vlgmr.msra.gmra.mrb[12].mxu0 %v2926_v9  ;;  %15075 = vmatprep.subr.bf16.mxu1 %v16910_v0 }
 0x272   : > { %15182 = vmatpush3.bf16.msra.mxu0 %v17995_v36  ;;  %13036 = vmatprep.mubr.msk.f32.mxu0 %vm16911_vm0, %v16912_v1 }
 0x273   : > { %15183 = vmatprep.subr.bf16.mxu0 %v16910_v0 }
 0x274   : > { %15077 = vmatpush3.bf16.msra.mxu1 %v18007_v57 }
 0x275   : > { %15078 = vmatprep.subr.bf16.mxu1 %v16910_v0 }
 0x276   : > { %15185 = vmatpush3.bf16.msra.mxu0 %v18007_v57 }
 0x277   : > { %15186 = vmatprep.subr.bf16.mxu0 %v16910_v0 }
 0x278   : > { %15080 = vmatpush3.bf16.msra.mxu1 %v18023_v60 }
 0x279   : > { %15081 = vmatprep.subr.bf16.mxu1 %v16910_v0 }
 0x27a   : > { %15188 = vmatpush3.bf16.msra.mxu0 %v18023_v60 }
 0x27b   : > { %15189 = vmatprep.subr.bf16.mxu0 %v16910_v0 }
 0x27c   : > { %15083 = vmatpush3.bf16.msra.mxu1 %v18033_v26 }
 0x27d   : > { %15084 = vmatprep.subr.bf16.mxu1 %v16910_v0 }
 0x27e   : > { %15191 = vmatpush3.bf16.msra.mxu0 %v18033_v26 }
 0x27f   : > { %15192 = vmatprep.subr.bf16.mxu0 %v16910_v0 }
 0x280   : > { %15086 = vmatpush3.bf16.msra.mxu1 %v18043_v20 }
 0x281   : > { %15087 = vmatprep.subr.bf16.mxu1 %v16910_v0 }
 0x282   : > { %15194 = vmatpush3.bf16.msra.mxu0 %v18043_v20 }
 0x283   : > { %15195 = vmatprep.subr.bf16.mxu0 %v16910_v0 }
 0x284   : > { %15089 = vmatpush3.bf16.msra.mxu1 %v18053_v40 }
 0x285   : > { %15090 = vmatprep.subr.bf16.mxu1 %v16910_v0 }
 0x286   : > { %15197 = vmatpush3.bf16.msra.mxu0 %v18053_v40 }
 0x287   : > { %12875 = vmatmul.mubr.f32.vlgmr.msra.gmra.mrb[8].mxu1 %v17885_v44  ;;  %15198 = vmatprep.subr.bf16.mxu0 %v16910_v0 }
 0x288   : > { %15092 = vmatpush3.bf16.msra.mxu1 %v17690_v30  ;;  %12901 = vmatprep.mubr.msk.f32.mxu1 %vm16911_vm0, %v16912_v1 }
 0x289   : > { %13037 = vmatmul.mubr.f32.vlgmr.msra.gmra.mrb[12].mxu0 %v17891_v32  ;;  %15093 = vmatprep.subr.bf16.mxu1 %v16910_v0 }
 0x28a   : > { %15200 = vmatpush3.bf16.msra.mxu0 %v17690_v30  ;;  %13063 = vmatprep.mubr.msk.f32.mxu0 %vm16911_vm0, %v16912_v1 }
 0x28b   : > { %15201 = vmatprep.subr.bf16.mxu0 %v16910_v0 }
 0x28c   : > { %15095 = vmatpush3.bf16.msra.mxu1 %v17708_v38 }
 0x28d   : > { %15096 = vmatprep.subr.bf16.mxu1 %v16910_v0 }
 0x28e   : > { %15203 = vmatpush3.bf16.msra.mxu0 %v17708_v38 }
 0x28f   : > { %15204 = vmatprep.subr.bf16.mxu0 %v16910_v0 }
 0x290   : > { %15098 = vmatpush3.bf16.msra.mxu1 %v17712_v39 }
 0x291   : > { %15099 = vmatprep.subr.bf16.mxu1 %v16910_v0 }
 0x292   : > { %15206 = vmatpush3.bf16.msra.mxu0 %v17712_v39 }
 0x293   : > { %15207 = vmatprep.subr.bf16.mxu0 %v16910_v0 }
 0x294   : > { %15101 = vmatpush3.bf16.msra.mxu1 %v17726_v49 }
 0x295   : > { %15102 = vmatprep.subr.bf16.mxu1 %v16910_v0 }
 0x296   : > { %15209 = vmatpush3.bf16.msra.mxu0 %v17726_v49 }
 0x297   : > { %15210 = vmatprep.subr.bf16.mxu0 %v16910_v0 }
 0x298   : > { %15104 = vmatpush3.bf16.msra.mxu1 %v17738_v54 }
 0x299   : > { %15105 = vmatprep.subr.bf16.mxu1 %v16910_v0 }
 0x29a   : > { %15212 = vmatpush3.bf16.msra.mxu0 %v17738_v54 }
 0x29b   : > { %15213 = vmatprep.subr.bf16.mxu0 %v16910_v0 }
 0x29c   : > { %15107 = vmatpush3.bf16.msra.mxu1 %v17756_v18 }
 0x29d   : > { %13066 = vmatprep.subr.bf16.mxu1 %v16912_v1 }
 0x29e   : > { %15215 = vmatpush3.bf16.msra.mxu0 %v17756_v18 }
 0x29f   : > { %12902 = vmatmul.mubr.f32.vlgmr.msra.gmra.mrb[8].mxu1 %v17885_v44  ;;  %15216 = vmatprep.subr.bf16.mxu0 %v16910_v0 }
 0x2a0   : > { %13078 = vmatprep.mubr.msk.bf16.mxu1 %vm16911_vm0, %v16912_v1  ;;  %13067 = vmatpush3.bf16.msra.mxu1 %v16587_v43 }
 0x2a1   : > { %13064 = vmatmul.mubr.f32.vlgmr.msra.gmra.mrb[12].mxu0 %v17891_v32  ;;  %13068 = vmatprep.subr.bf16.mxu1 %v16912_v1 }
 0x2a2   : > { %15218 = vmatpush3.bf16.msra.mxu0 %v17690_v30  ;;  %13106 = vmatprep.mubr.msk.f32.mxu0 %vm16911_vm0, %v16912_v1 }
 0x2a3   : > { %15219 = vmatprep.subr.bf16.mxu0 %v16910_v0 }
 0x2a4   : > { %13069 = vmatpush3.bf16.msra.mxu1 %v16588_v50 }
 0x2a5   : > { %13070 = vmatprep.subr.bf16.mxu1 %v16912_v1 }
 0x2a6   : > { %15221 = vmatpush3.bf16.msra.mxu0 %v17708_v38 }
 0x2a7   : > { %15222 = vmatprep.subr.bf16.mxu0 %v16910_v0 }
 0x2a8   : > { %13071 = vmatpush3.bf16.msra.mxu1 %v16589_v53 }
 0x2a9   : > { %13072 = vmatprep.subr.bf16.mxu1 %v16912_v1 }
 0x2aa   : > { %15224 = vmatpush3.bf16.msra.mxu0 %v17712_v39 }
 0x2ab   : > { %15225 = vmatprep.subr.bf16.mxu0 %v16910_v0 }
 0x2ac   : > { %13073 = vmatpush3.bf16.msra.mxu1 %v16590_v5 }
 0x2ad   : > { %13074 = vmatprep.subr.bf16.mxu1 %v16912_v1 }
 0x2ae   : > { %15227 = vmatpush3.bf16.msra.mxu0 %v17726_v49 }
 0x2af   : > { %15228 = vmatprep.subr.bf16.mxu0 %v16910_v0 }
 0x2b0   : > { %13075 = vmatpush3.bf16.msra.mxu1 %v16591_v47 }
 0x2b1   : > { %13076 = vmatprep.subr.bf16.mxu1 %v16912_v1 }
 0x2b2   : > { %15230 = vmatpush3.bf16.msra.mxu0 %v17738_v54 }
 0x2b3   : > { %15231 = vmatprep.subr.bf16.mxu0 %v16910_v0 }
 0x2b4   : > { %13077 = vmatpush3.bf16.msra.mxu1 %v16592_v19 }
 0x2b5   : > { %15324 = vmatprep.subr.bf16.mxu1 %v16910_v0 }
 0x2b6   : > { %15233 = vmatpush3.bf16.msra.mxu0 %v17756_v18 }
 0x2b7   : > { %15234 = vmatprep.subr.bf16.mxu0 %v16910_v0 }
 0x372   : > { %v2839_v27 = vpop.f32.mrb[8].mxu1 }
 0x373   : > { %v3436_v52 = vmul.f32 %v2839_v27, %v2839_v27  ;;  %v12903_v55 = vpop.f32.mrb[9].mxu1  ;;  %v3439_v41 = vsub.f32 %v17879_v58, %v2839_v27  ;;  %v3469_v58 = vsub.s32 3, %v17868_v59 }
 0x374   : > { %v3432_v6 = vpop.f32.mrb[12].mxu0 }
 0x375   : > { %v3437_v12 = vsub.f32 %v3432_v6, %v3436_v52  ;;  %v13065_v10 = vpop.f32.mrb[13].mxu0  ;;  %v3470_v14 = vrot.slane %v17874_v8, %v3469_v58 }
 0x377   : > { %v3438_v28 = vmax.f32 %v3437_v12, 0.0 }
 0x379   : > { %v3440_v15 = vadd.f32 1e-05, %v3438_v28 }
 0x37b   : > { %16632 = vrsqrt.f32 %v3440_v15 }
 0x385   : > { %v16633_v17 = vpop.eup %16632 }
 0x386   : > { %v3442_v44 = vmul.f32 %v16633_v17, %v3439_v41  ;;  %v16594_v17 = vld [vmem:[%s19555_s19 + $0x8] sm:$0xff]  }
 0x388   : > { %v3447_v32 = vmul.f32 %v3446_v16, %v3442_v44  ;;  %v16593_v16 = vld [vmem:[%s19555_s19] sm:$0xff]   ;;  %v16595_v44 = vld [vmem:[%s19555_s19 + $0x10] sm:$0xff]  }
 0x38a   : > { %v3452_v37 = vadd.f32 %v3451_v62, %v3447_v32  ;;  %v16596_v62 = vld [vmem:[%s19555_s19 + $0x18] sm:$0xff]   ;;  %v16597_v32 = vld [vmem:[%s19555_s19 + $0x20] sm:$0xff]  }
 0x38c   : > { %v3453_v29 = vmax.f32 %v3452_v37, 0.0  ;;  %v16598_v37 = vld [vmem:[%s19555_s19 + $0x28] sm:$0xff]  }
 0x38e   : > { %v3454_v9 = vpack.c.bf16 %v3453_v29, %v3453_v29 }
 0x390   : > { %13079 = vmatmul.mubr.msk.bf16.vlgmr.msra.gmra.mrb[12].mxu1 %vm2250_vm5, %v3454_v9 }
 0x391   : > { %15326 = vmatpush3.bf16.msra.mxu1 %v17690_v30  ;;  %13268 = vmatprep.mubr.msk.f32.mxu1 %vm16911_vm0, %v16912_v1 }
 0x392   : > { %15327 = vmatprep.subr.bf16.mxu1 %v16910_v0 }
 0x395   : > { %15329 = vmatpush3.bf16.msra.mxu1 %v17708_v38 }
 0x396   : > { %15330 = vmatprep.subr.bf16.mxu1 %v16910_v0 }
 0x399   : > { %15332 = vmatpush3.bf16.msra.mxu1 %v17712_v39 }
 0x39a   : > { %15333 = vmatprep.subr.bf16.mxu1 %v16910_v0 }
 0x39d   : > { %15335 = vmatpush3.bf16.msra.mxu1 %v17726_v49 }
 0x39e   : > { %15336 = vmatprep.subr.bf16.mxu1 %v16910_v0 }
 0x3a1   : > { %15338 = vmatpush3.bf16.msra.mxu1 %v17738_v54 }
 0x3a2   : > { %15339 = vmatprep.subr.bf16.mxu1 %v16910_v0 }
 0x3a5   : > { %15341 = vmatpush3.bf16.msra.mxu1 %v17756_v18 }
 0x3a6   : > { %15342 = vmatprep.subr.bf16.mxu1 %v16910_v0 }
 0x463   : > { %v3544_v31 = vpop.f32.mrb[12].mxu1 }
 0x464   : > { %v18162_v22 = vadd.f32 %v3544_v31, %v3470_v14  ;;  %v13080_v25 = vpop.f32.mrb[13].mxu1 }
 0x465   : > { %v3547_v43 = vpop.f32.mrb[14].mxu1 }
 0x466   : > { %v3551_v50 = vsel %vm2250_vm5, %v18162_v22, 0  ;;  %v4142_v53 = vmul.f32 %v18162_v22, %v18162_v22  ;;  %v13081_v5 = vpop.f32.mrb[15].mxu1 }
 0x467   : > { %v18168_v47 = vand.u32 4294901760, %v3551_v50  ;;  %v4744_v5 = vsub.s32 4, %v17868_v59 }
 0x468   : > { %v4144_v19 = vsel %vm2250_vm5, %v4142_v53, 0 }
 0x469   : > { %v18172_v27 = vsub.f32 %v3551_v50, %v18168_v47  ;;  %v18174_v52 = vand.u32 4294901760, %v4144_v19 }
 0x46b   : > { %v18177_v55 = vsub.f32 %v4144_v19, %v18174_v52  ;;  %v3632_v6 = vand.u32 4294901760, %v18172_v27 }
 0x46d   : > { %v3633_v12 = vsub.f32 %v18172_v27, %v3632_v6  ;;  %v4225_v10 = vand.u32 4294901760, %v18177_v55 }
 0x46f   : > { %v3634_v28 = vand.u32 4294901760, %v3633_v12  ;;  %v4226_v15 = vsub.f32 %v18177_v55, %v4225_v10 }
 0x471   : > { %13107 = vmatmul.mubr.f32.vlgmr.msra.gmra.mrb[14].mxu0 %v3634_v28  ;;  %v4227_v41 = vand.u32 4294901760, %v4226_v15 }
 0x472   : > { %15236 = vmatpush3.bf16.msra.mxu0 %v17774_v56  ;;  %13133 = vmatprep.mubr.msk.f32.mxu0 %vm16911_vm0, %v16912_v1 }
 0x473   : > { %13269 = vmatmul.mubr.f32.vlgmr.msra.gmra.mrb[10].mxu1 %v4227_v41  ;;  %15237 = vmatprep.subr.bf16.mxu0 %v16910_v0 }
 0x474   : > { %15344 = vmatpush3.bf16.msra.mxu1 %v17774_v56  ;;  %13295 = vmatprep.mubr.msk.f32.mxu1 %vm16911_vm0, %v16912_v1 }
 0x475   : > { %15345 = vmatprep.subr.bf16.mxu1 %v16910_v0 }
 0x476   : > { %15239 = vmatpush3.bf16.msra.mxu0 %v17788_v51 }
 0x477   : > { %15240 = vmatprep.subr.bf16.mxu0 %v16910_v0 }
 0x478   : > { %15347 = vmatpush3.bf16.msra.mxu1 %v17788_v51 }
 0x479   : > { %15348 = vmatprep.subr.bf16.mxu1 %v16910_v0 }
 0x47a   : > { %15242 = vmatpush3.bf16.msra.mxu0 %v17802_v7 }
 0x47b   : > { %15243 = vmatprep.subr.bf16.mxu0 %v16910_v0 }
 0x47c   : > { %15350 = vmatpush3.bf16.msra.mxu1 %v17802_v7 }
 0x47d   : > { %15351 = vmatprep.subr.bf16.mxu1 %v16910_v0 }
 0x47e   : > { %15245 = vmatpush3.bf16.msra.mxu0 %v17826_v42 }
 0x47f   : > { %15246 = vmatprep.subr.bf16.mxu0 %v16910_v0 }
 0x480   : > { %15353 = vmatpush3.bf16.msra.mxu1 %v17826_v42 }
 0x481   : > { %15354 = vmatprep.subr.bf16.mxu1 %v16910_v0 }
 0x482   : > { %15248 = vmatpush3.bf16.msra.mxu0 %v17830_v24 }
 0x483   : > { %15249 = vmatprep.subr.bf16.mxu0 %v16910_v0 }
 0x484   : > { %15356 = vmatpush3.bf16.msra.mxu1 %v17830_v24 }
 0x485   : > { %15357 = vmatprep.subr.bf16.mxu1 %v16910_v0 }
 0x486   : > { %15251 = vmatpush3.bf16.msra.mxu0 %v17838_v13 }
 0x487   : > { %15252 = vmatprep.subr.bf16.mxu0 %v16910_v0 }
 0x488   : > { %15359 = vmatpush3.bf16.msra.mxu1 %v17838_v13 }
 0x489   : > { %13134 = vmatmul.mubr.f32.vlgmr.msra.gmra.mrb[14].mxu0 %v18168_v47  ;;  %15360 = vmatprep.subr.bf16.mxu1 %v16910_v0 }
 0x48a   : > { %15254 = vmatpush3.bf16.msra.mxu0 %v17842_v45  ;;  %13160 = vmatprep.mubr.msk.f32.mxu0 %vm16911_vm0, %v16912_v1 }
 0x48b   : > { %13296 = vmatmul.mubr.f32.vlgmr.msra.gmra.mrb[10].mxu1 %v18174_v52  ;;  %15255 = vmatprep.subr.bf16.mxu0 %v16910_v0 }
 0x48c   : > { %15362 = vmatpush3.bf16.msra.mxu1 %v17842_v45  ;;  %13322 = vmatprep.mubr.msk.f32.mxu1 %vm16911_vm0, %v16912_v1 }
 0x48d   : > { %15363 = vmatprep.subr.bf16.mxu1 %v16910_v0 }
 0x48e   : > { %15257 = vmatpush3.bf16.msra.mxu0 %v17846_v46 }
 0x48f   : > { %15258 = vmatprep.subr.bf16.mxu0 %v16910_v0 }
 0x490   : > { %15365 = vmatpush3.bf16.msra.mxu1 %v17846_v46 }
 0x491   : > { %15366 = vmatprep.subr.bf16.mxu1 %v16910_v0 }
 0x492   : > { %15260 = vmatpush3.bf16.msra.mxu0 %v17850_v11 }
 0x493   : > { %15261 = vmatprep.subr.bf16.mxu0 %v16910_v0 }
 0x494   : > { %15368 = vmatpush3.bf16.msra.mxu1 %v17850_v11 }
 0x495   : > { %15369 = vmatprep.subr.bf16.mxu1 %v16910_v0 }
 0x496   : > { %15263 = vmatpush3.bf16.msra.mxu0 %v17854_v2 }
 0x497   : > { %15264 = vmatprep.subr.bf16.mxu0 %v16910_v0 }
 0x498   : > { %15371 = vmatpush3.bf16.msra.mxu1 %v17854_v2 }
 0x499   : > { %15372 = vmatprep.subr.bf16.mxu1 %v16910_v0 }
 0x49a   : > { %15266 = vmatpush3.bf16.msra.mxu0 %v17858_v23 }
 0x49b   : > { %15267 = vmatprep.subr.bf16.mxu0 %v16910_v0 }
 0x49c   : > { %15374 = vmatpush3.bf16.msra.mxu1 %v17858_v23 }
 0x49d   : > { %15375 = vmatprep.subr.bf16.mxu1 %v16910_v0 }
 0x49e   : > { %15269 = vmatpush3.bf16.msra.mxu0 %v17862_v48 }
 0x49f   : > { %15270 = vmatprep.subr.bf16.mxu0 %v16910_v0 }
 0x4a0   : > { %15377 = vmatpush3.bf16.msra.mxu1 %v17862_v48 }
 0x4a1   : > { %13161 = vmatmul.mubr.f32.vlgmr.msra.gmra.mrb[14].mxu0 %v18172_v27  ;;  %15378 = vmatprep.subr.bf16.mxu1 %v16910_v0  ;;  %v4745_v27 = vrot.slane %v17874_v8, %v4744_v5 }
 0x4a2   : > { %15272 = vmatpush3.bf16.msra.mxu0 %v17690_v30  ;;  %13187 = vmatprep.mubr.msk.f32.mxu0 %vm16911_vm0, %v16912_v1 }
 0x4a3   : > { %13323 = vmatmul.mubr.f32.vlgmr.msra.gmra.mrb[10].mxu1 %v18177_v55  ;;  %15273 = vmatprep.subr.bf16.mxu0 %v16910_v0 }
 0x4a4   : > { %15380 = vmatpush3.bf16.msra.mxu1 %v17690_v30  ;;  %13349 = vmatprep.mubr.msk.f32.mxu1 %vm16911_vm0, %v16912_v1 }
 0x4a5   : > { %15381 = vmatprep.subr.bf16.mxu1 %v16910_v0 }
 0x4a6   : > { %15275 = vmatpush3.bf16.msra.mxu0 %v17708_v38 }
 0x4a7   : > { %15276 = vmatprep.subr.bf16.mxu0 %v16910_v0 }
 0x4a8   : > { %15383 = vmatpush3.bf16.msra.mxu1 %v17708_v38 }
 0x4a9   : > { %15384 = vmatprep.subr.bf16.mxu1 %v16910_v0 }
 0x4aa   : > { %15278 = vmatpush3.bf16.msra.mxu0 %v17712_v39 }
 0x4ab   : > { %15279 = vmatprep.subr.bf16.mxu0 %v16910_v0 }
 0x4ac   : > { %15386 = vmatpush3.bf16.msra.mxu1 %v17712_v39 }
 0x4ad   : > { %15387 = vmatprep.subr.bf16.mxu1 %v16910_v0 }
 0x4ae   : > { %15281 = vmatpush3.bf16.msra.mxu0 %v17726_v49 }
 0x4af   : > { %15282 = vmatprep.subr.bf16.mxu0 %v16910_v0 }
 0x4b0   : > { %15389 = vmatpush3.bf16.msra.mxu1 %v17726_v49 }
 0x4b1   : > { %15390 = vmatprep.subr.bf16.mxu1 %v16910_v0 }
 0x4b2   : > { %15284 = vmatpush3.bf16.msra.mxu0 %v17738_v54 }
 0x4b3   : > { %15285 = vmatprep.subr.bf16.mxu0 %v16910_v0 }
 0x4b4   : > { %15392 = vmatpush3.bf16.msra.mxu1 %v17738_v54 }
 0x4b5   : > { %15393 = vmatprep.subr.bf16.mxu1 %v16910_v0 }
 0x4b6   : > { %15287 = vmatpush3.bf16.msra.mxu0 %v17756_v18 }
 0x4b7   : > { %15288 = vmatprep.subr.bf16.mxu0 %v16910_v0 }
 0x4b8   : > { %15395 = vmatpush3.bf16.msra.mxu1 %v17756_v18 }
 0x4b9   : > { %13188 = vmatmul.mubr.f32.vlgmr.msra.gmra.mrb[14].mxu0 %v3632_v6  ;;  %15396 = vmatprep.subr.bf16.mxu1 %v16910_v0 }
 0x4ba   : > { %15290 = vmatpush3.bf16.msra.mxu0 %v17995_v36  ;;  %13214 = vmatprep.mubr.msk.f32.mxu0 %vm16911_vm0, %v16912_v1 }
 0x4bb   : > { %13350 = vmatmul.mubr.f32.vlgmr.msra.gmra.mrb[10].mxu1 %v4225_v10  ;;  %15291 = vmatprep.subr.bf16.mxu0 %v16910_v0 }
 0x4bc   : > { %15398 = vmatpush3.bf16.msra.mxu1 %v17995_v36  ;;  %13376 = vmatprep.mubr.msk.f32.mxu1 %vm16911_vm0, %v16912_v1 }
 0x4bd   : > { %15399 = vmatprep.subr.bf16.mxu1 %v16910_v0 }
 0x4be   : > { %15293 = vmatpush3.bf16.msra.mxu0 %v18007_v57 }
 0x4bf   : > { %15294 = vmatprep.subr.bf16.mxu0 %v16910_v0 }
 0x4c0   : > { %15401 = vmatpush3.bf16.msra.mxu1 %v18007_v57 }
 0x4c1   : > { %15402 = vmatprep.subr.bf16.mxu1 %v16910_v0 }
 0x4c2   : > { %15296 = vmatpush3.bf16.msra.mxu0 %v18023_v60 }
 0x4c3   : > { %15297 = vmatprep.subr.bf16.mxu0 %v16910_v0 }
 0x4c4   : > { %15404 = vmatpush3.bf16.msra.mxu1 %v18023_v60 }
 0x4c5   : > { %15405 = vmatprep.subr.bf16.mxu1 %v16910_v0 }
 0x4c6   : > { %15299 = vmatpush3.bf16.msra.mxu0 %v18033_v26 }
 0x4c7   : > { %15300 = vmatprep.subr.bf16.mxu0 %v16910_v0 }
 0x4c8   : > { %15407 = vmatpush3.bf16.msra.mxu1 %v18033_v26 }
 0x4c9   : > { %15408 = vmatprep.subr.bf16.mxu1 %v16910_v0 }
 0x4ca   : > { %15302 = vmatpush3.bf16.msra.mxu0 %v18043_v20 }
 0x4cb   : > { %15303 = vmatprep.subr.bf16.mxu0 %v16910_v0 }
 0x4cc   : > { %15410 = vmatpush3.bf16.msra.mxu1 %v18043_v20 }
 0x4cd   : > { %15411 = vmatprep.subr.bf16.mxu1 %v16910_v0 }
 0x4ce   : > { %15305 = vmatpush3.bf16.msra.mxu0 %v18053_v40 }
 0x4cf   : > { %15306 = vmatprep.subr.bf16.mxu0 %v16910_v0 }
 0x4d0   : > { %15413 = vmatpush3.bf16.msra.mxu1 %v18053_v40 }
 0x4d1   : > { %13215 = vmatmul.mubr.f32.vlgmr.msra.gmra.mrb[14].mxu0 %v18168_v47  ;;  %15414 = vmatprep.subr.bf16.mxu1 %v16910_v0 }
 0x4d2   : > { %15308 = vmatpush3.bf16.msra.mxu0 %v17690_v30  ;;  %13241 = vmatprep.mubr.msk.f32.mxu0 %vm16911_vm0, %v16912_v1 }
 0x4d3   : > { %13377 = vmatmul.mubr.f32.vlgmr.msra.gmra.mrb[10].mxu1 %v18174_v52  ;;  %15309 = vmatprep.subr.bf16.mxu0 %v16910_v0 }
 0x4d4   : > { %15416 = vmatpush3.bf16.msra.mxu1 %v17690_v30  ;;  %13403 = vmatprep.mubr.msk.f32.mxu1 %vm16911_vm0, %v16912_v1 }
 0x4d5   : > { %15417 = vmatprep.subr.bf16.mxu1 %v16910_v0 }
 0x4d6   : > { %15311 = vmatpush3.bf16.msra.mxu0 %v17708_v38 }
 0x4d7   : > { %15312 = vmatprep.subr.bf16.mxu0 %v16910_v0 }
 0x4d8   : > { %15419 = vmatpush3.bf16.msra.mxu1 %v17708_v38 }
 0x4d9   : > { %15420 = vmatprep.subr.bf16.mxu1 %v16910_v0 }
 0x4da   : > { %15314 = vmatpush3.bf16.msra.mxu0 %v17712_v39 }
 0x4db   : > { %15315 = vmatprep.subr.bf16.mxu0 %v16910_v0 }
 0x4dc   : > { %15422 = vmatpush3.bf16.msra.mxu1 %v17712_v39 }
 0x4dd   : > { %15423 = vmatprep.subr.bf16.mxu1 %v16910_v0 }
 0x4de   : > { %15317 = vmatpush3.bf16.msra.mxu0 %v17726_v49 }
 0x4df   : > { %15318 = vmatprep.subr.bf16.mxu0 %v16910_v0 }
 0x4e0   : > { %15425 = vmatpush3.bf16.msra.mxu1 %v17726_v49 }
 0x4e1   : > { %15426 = vmatprep.subr.bf16.mxu1 %v16910_v0 }
 0x4e2   : > { %15320 = vmatpush3.bf16.msra.mxu0 %v17738_v54 }
 0x4e3   : > { %15321 = vmatprep.subr.bf16.mxu0 %v16910_v0 }
 0x4e4   : > { %15428 = vmatpush3.bf16.msra.mxu1 %v17738_v54 }
 0x4e5   : > { %15429 = vmatprep.subr.bf16.mxu1 %v16910_v0 }
 0x4e6   : > { %15323 = vmatpush3.bf16.msra.mxu0 %v17756_v18 }
 0x4e7   : > { %13406 = vmatprep.subr.bf16.mxu0 %v16912_v1 }
 0x4e8   : > { %15431 = vmatpush3.bf16.msra.mxu1 %v17756_v18 }
 0x4e9   : > { %13242 = vmatmul.mubr.f32.vlgmr.msra.gmra.mrb[14].mxu0 %v18168_v47  ;;  %15435 = vmatprep.subr.bf16.mxu1 %v16910_v0  ;;  %v4749_v47 = vsub.s32 5, %v17868_v59 }
 0x4ea   : > { %13418 = vmatprep.mubr.msk.bf16.mxu0 %vm16911_vm0, %v16912_v1  ;;  %13407 = vmatpush3.bf16.msra.mxu0 %v16593_v16  ;;  %v4847_v16 = vld [vmem:[%s19556_s30 + $0x8] sm:$0xff] }
 0x4eb   : > { %13404 = vmatmul.mubr.f32.vlgmr.msra.gmra.mrb[10].mxu1 %v18174_v52  ;;  %13408 = vmatprep.subr.bf16.mxu0 %v16912_v1  ;;  %v4750_v6 = vrot.slane %v17874_v8, %v4749_v47 }
 0x4ec   : > { %13437 = vmatprep.mubr.msk.f32.mxu1 %vm16911_vm0, %v16912_v1 }
 0x4ee   : > { %13409 = vmatpush3.bf16.msra.mxu0 %v16594_v17  ;;  %v4857_v17 = vand.u32 4294901760, %v4847_v16 }
 0x4ef   : > { %13410 = vmatprep.subr.bf16.mxu0 %v16912_v1 }
 0x4f2   : > { %13411 = vmatpush3.bf16.msra.mxu0 %v16595_v44 }
 0x4f3   : > { %13412 = vmatprep.subr.bf16.mxu0 %v16912_v1 }
 0x4f6   : > { %13413 = vmatpush3.bf16.msra.mxu0 %v16596_v62  ;;  %v4940_v62 = vsub.f32 %v4847_v16, %v4857_v17 }
 0x4f7   : > { %13414 = vmatprep.subr.bf16.mxu0 %v16912_v1 }
 0x4fa   : > { %13415 = vmatpush3.bf16.msra.mxu0 %v16597_v32  ;;  %v4941_v32 = vand.u32 4294901760, %v4940_v62 }
 0x4fb   : > { %13416 = vmatprep.subr.bf16.mxu0 %v16912_v1 }
 0x4fe   : > { %13417 = vmatpush3.bf16.msra.mxu0 %v16598_v37  ;;  %v4848_v37 = vld [vmem:[%s19556_s30 + $0x10] sm:$0xff] }
 0x4ff   : > { %15432 = vmatprep.subr.bf16.mxu0 %v16910_v0 }
 0x5bc   : > { %v4138_v29 = vpop.f32.mrb[14].mxu0 }
 0x5bd   : > { %v4735_v9 = vmul.f32 %v4138_v29, %v4138_v29  ;;  %v13243_v14 = vpop.f32.mrb[15].mxu0  ;;  %v4738_v19 = vsub.f32 %v18162_v22, %v4138_v29  ;;  %v4846_v22 = vld [vmem:[%s19556_s30] sm:$0xff] }
 0x5be   : > { %v4731_v31 = vpop.f32.mrb[10].mxu1  ;;  %v4854_v8 = vand.u32 4294901760, %v4846_v22  ;;  %v4860_v14 = vand.u32 4294901760, %v4848_v37 }
 0x5bf   : > { %v4736_v25 = vsub.f32 %v4731_v31, %v4735_v9  ;;  %v13405_v43 = vpop.f32.mrb[11].mxu1  ;;  %v4942_v9 = vsub.f32 %v4940_v62, %v4941_v32 }
 0x5c0   : > { %v4933_v44 = vsub.f32 %v4846_v22, %v4854_v8  ;;  %v4947_v43 = vsub.f32 %v4848_v37, %v4860_v14  ;;  %v16599_v37 = vld [vmem:[%s19557_s2] sm:$0xff]  }
 0x5c1   : > { %v4737_v50 = vmax.f32 %v4736_v25, 0.0  ;;  %v4943_v25 = vand.u32 4294901760, %v4942_v9  ;;  %v16601_v9 = vld [vmem:[%s19557_s2 + $0x10] sm:$0xff]  }
 0x5c3   : > { %v4739_v53 = vadd.f32 1e-05, %v4737_v50 }
 0x5c5   : > { %16634 = vrsqrt.f32 %v4739_v53  ;;  %v4948_v53 = vand.u32 4294901760, %v4947_v43 }
 0x5cf   : > { %v16635_v52 = vpop.eup %16634 }
 0x5d0   : > { %v4741_v55 = vmul.f32 %v16635_v52, %v4738_v19  ;;  %v4949_v19 = vsub.f32 %v4947_v43, %v4948_v53  ;;  %v15439_v52 = vpack.c.bf16 %v4940_v62, %v4933_v44  ;;  %v5326_v62 = vld [vmem:[#allocation7] sm:$0x3f] }
 0x5d2   : > { %v4746_v12 = vmul.f32 %v4745_v27, %v4741_v55  ;;  %v4950_v27 = vand.u32 4294901760, %v4949_v19  ;;  %v15433_v55 = vpack.c.bf16 %v4857_v17, %v4854_v8 }
 0x5d4   : > { %v4751_v10 = vadd.f32 %v4750_v6, %v4746_v12 }
 0x5d6   : > { %v4752_v28 = vadd.f32 %v4751_v10, %v17864_v61  ;;  %v4934_v61 = vand.u32 4294901760, %v4933_v44 }
 0x5d8   : > { %v4753_v15 = vmax.f32 %v4752_v28, 0.0  ;;  %v4935_v29 = vsub.f32 %v4933_v44, %v4934_v61  ;;  %v15445_v6 = vpack.c.bf16 %v4941_v32, %v4934_v61  ;;  %v5337_v61 = vsel %vm5335_vm7, %v5326_v62, 0 }
 0x5d9   : > { %v5340_v32 = vand.u32 4294901760, %v5337_v61 }
 0x5da   : > { %v4754_v41 = vpack.c.bf16 %v4753_v15, %v4753_v15  ;;  %v4936_v31 = vand.u32 4294901760, %v4935_v29  ;;  %v16600_v29 = vld [vmem:[%s19557_s2 + $0x8] sm:$0xff]  }
 0x5db   : > { %v5417_v19 = vsub.f32 %v5337_v61, %v5340_v32 }
 0x5dc   : > { %13419 = vmatmul.mubr.msk.bf16.vlgmr.msra.gmra.mrb[16].mxu0 %vm2250_vm5, %v4754_v41  ;;  %v15436_v50 = vpack.c.bf16 %v4943_v25, %v4936_v31 }
 0x5dd   : > { %13428 = vmatprep.mubr.msk.f32.mxu0 %vm16911_vm0, %v16912_v1  ;;  %15434 = vmatpush3.bf16.msra.mxu0 %v15433_v55 }
 0x5de   : > { %15437 = vmatpush3.bf16.msra.mxu1 %v15436_v50  ;;  %13426 = vmatprep.subr.mxu0 %v16912_v1 }
 0x5df   : > { %13435 = vmatprep.subr.mxu1 %v16912_v1 }
 0x5e1   : > { %13427 = vmatpush3.msra.mxu0 %v4860_v14 }
 0x5e2   : > { %13436 = vmatpush3.msra.mxu1 %v4950_v27  ;;  %13476 = vmatprep.subr.mxu0 %v16912_v1 }
 0x5e3   : > { %15438 = vmatprep.subr.bf16.mxu1 %v16910_v0 }
 0x6af   : > { %v4840_v12 = vpop.f32.mrb[16].mxu0 }
 0x6b0   : > { %v18394_v10 = vadd.f32 %v4840_v12, %v17866_v33  ;;  %v13420_v28 = vpop.f32.mrb[17].mxu0 }
 0x6b1   : > { %v4843_v15 = vpop.f32.mrb[18].mxu0 }
 0x6b2   : > { %v4851_v41 = vsel %vm4849_vm6, %v18394_v10, 0  ;;  %v13421_v22 = vpop.f32.mrb[19].mxu0 }
 0x6b3   : > { %v4921_v16 = vand.u32 4294901760, %v4851_v41 }
 0x6b5   : > { %v4922_v8 = vsub.f32 %v4851_v41, %v4921_v16  ;;  %13438 = vmatmul.mubr.f32.vlgmr.msra.gmra.mrb[16].mxu1 %v4921_v16 }
 0x6b6   : > { %15440 = vmatpush3.bf16.msra.mxu1 %v15439_v52  ;;  %13446 = vmatprep.mubr.msk.f32.mxu1 %vm16911_vm0, %v16912_v1 }
 0x6b7   : > { %v4923_v17 = vand.u32 4294901760, %v4922_v8  ;;  %13444 = vmatprep.subr.mxu1 %v16912_v1 }
 0x6b9   : > { %v4924_v44 = vsub.f32 %v4922_v8, %v4923_v17 }
 0x6ba   : > { %13445 = vmatpush3.msra.mxu1 %v4947_v43 }
 0x6bb   : > { %15441 = vmatprep.subr.bf16.mxu1 %v16910_v0  ;;  %v4925_v33 = vand.u32 4294901760, %v4924_v44  ;;  %v18477_v44 = vld [vmem:[%s19500_s16] sm:$0xff] }
 0x6bd   : > { %13429 = vmatmul.mubr.f32.vlgmr.msra.gmra.mrb[20].mxu0 %v4925_v33  ;;  %13447 = vmatmul.mubr.f32.vlgmr.msra.gmra.mrb[16].mxu1 %v4922_v8  ;;  %v16604_v8 = vld [vmem:[%s19557_s2 + $0x28] sm:$0xff]  }
 0x6be   : > { %15443 = vmatpush3.bf16.msra.mxu1 %v15433_v55  ;;  %13455 = vmatprep.mubr.msk.f32.mxu1 %vm16911_vm0, %v16912_v1 }
 0x6bf   : > { %13453 = vmatprep.subr.mxu1 %v16912_v1  ;;  %13478 = vmatprep.mubr.msk.f32.mxu0 %vm16911_vm0, %v16912_v1 }
 0x6c0   : > { %13477 = vmatpush3.msra.mxu0 %v5340_v32 }
 0x6c1   : > { %13481 = vmatprep.subr.mxu0 %v16912_v1 }
 0x6c2   : > { %13454 = vmatpush3.msra.mxu1 %v4860_v14 }
 0x6c3   : > { %15444 = vmatprep.subr.bf16.mxu1 %v16910_v0 }
 0x6c5   : > { %13456 = vmatmul.mubr.f32.vlgmr.msra.gmra.mrb[16].mxu1 %v4923_v17  ;;  %v5329_v17 = vsub.s32 6, %v17868_v59 }
 0x6c6   : > { %15446 = vmatpush3.bf16.msra.mxu1 %v15445_v6  ;;  %13464 = vmatprep.mubr.msk.f32.mxu1 %vm16911_vm0, %v16912_v1 }
 0x6c7   : > { %13462 = vmatprep.subr.mxu1 %v16912_v1  ;;  %v5330_v33 = vrot.slane %v18477_v44, %v5329_v17 }
 0x6ca   : > { %13463 = vmatpush3.msra.mxu1 %v4948_v53 }
 0x6cb   : > { %15447 = vmatprep.subr.bf16.mxu1 %v16910_v0 }
 0x6cd   : > { %13465 = vmatmul.mubr.f32.vlgmr.msra.gmra.mrb[16].mxu1 %v4921_v16 }
 0x6ce   : > { %15449 = vmatpush3.bf16.msra.mxu1 %v15433_v55  ;;  %13473 = vmatprep.mubr.msk.f32.mxu1 %vm16911_vm0, %v16912_v1  ;;  %v5418_v55 = vand.u32 4294901760, %v5417_v19 }
 0x6cf   : > { %13471 = vmatprep.subr.mxu1 %v16912_v1 }
 0x6d0   : > { %v5419_v28 = vsub.f32 %v5417_v19, %v5418_v55 }
 0x6d2   : > { %13472 = vmatpush3.msra.mxu1 %v4860_v14  ;;  %v16602_v14 = vld [vmem:[%s19557_s2 + $0x18] sm:$0xff]   ;;  %v5420_v22 = vand.u32 4294901760, %v5419_v28 }
 0x6d3   : > { %13506 = vmatprep.subr.bf16.mxu1 %v16912_v1 }
 0x6d5   : > { %13474 = vmatmul.mubr.f32.vlgmr.msra.gmra.mrb[16].mxu1 %v4921_v16 }
 0x6d6   : > { %13518 = vmatprep.mubr.msk.bf16.mxu1 %vm16911_vm0, %v16912_v1  ;;  %13507 = vmatpush3.bf16.msra.mxu1 %v16599_v37 }
 0x6d7   : > { %13508 = vmatprep.subr.bf16.mxu1 %v16912_v1 }
 0x6da   : > { %13509 = vmatpush3.bf16.msra.mxu1 %v16600_v29 }
 0x6db   : > { %13510 = vmatprep.subr.bf16.mxu1 %v16912_v1 }
 0x6de   : > { %13511 = vmatpush3.bf16.msra.mxu1 %v16601_v9 }
 0x6df   : > { %13512 = vmatprep.subr.bf16.mxu1 %v16912_v1 }
 0x6e2   : > { %13513 = vmatpush3.bf16.msra.mxu1 %v16602_v14 }
 0x6e3   : > { %13514 = vmatprep.subr.bf16.mxu1 %v16912_v1 }
 0x790   : > { %v4927_v31 = vpop.f32.mrb[20].mxu0 }
 0x791   : > { %v13430_v25 = vpop.f32.mrb[21].mxu0 }
 0x7a8   : > { %v5321_v43 = vpop.f32.mrb[16].mxu1 }
 0x7a9   : > { %v16314_v50 = vadd.f32 %v5321_v43, %v4927_v31  ;;  %v13475_v53 = vpop.f32.mrb[17].mxu1 }
 0x7ab   : > { %v5325_v27 = vsub.f32 %v17916_v34, %v16314_v50  ;;  %v16603_v34 = vld [vmem:[%s19557_s2 + $0x20] sm:$0xff]   ;;  %s19560_s2 = sld [smem:[#allocation29_spill]] }
 0x7ac   : > { %13515 = vmatpush3.bf16.msra.mxu1 %v16603_v34  ;;  %v16606_v34 = vld [vmem:[#allocation8 + $0x8] sm:$0xff]  }
 0x7ad   : > { %v5333_v52 = vsel %vm5331_vm8, %v5325_v27, 0  ;;  %13516 = vmatprep.subr.bf16.mxu1 %v16912_v1 }
 0x7ae   : > { %v5405_v6 = vand.u32 4294901760, %v5333_v52 }
 0x7b0   : > { %v5406_v12 = vsub.f32 %v5333_v52, %v5405_v6  ;;  %13517 = vmatpush3.bf16.msra.mxu1 %v16604_v8  ;;  %v16607_v8 = vld [vmem:[#allocation8 + $0x10] ss:$0 sps:$4 sm:$0x77]  }
 0x7b1   : > { %15558 = vmatprep.subr.bf16.mxu1 %v16910_v0 }
 0x7b2   : > { %v5407_v15 = vand.u32 4294901760, %v5406_v12 }
 0x7b4   : > { %v5408_v41 = vsub.f32 %v5406_v12, %v5407_v15 }
 0x7b6   : > { %v5409_v16 = vand.u32 4294901760, %v5408_v41 }
 0x7b8   : > { %13479 = vmatmul.mubr.f32.vlgmr.msra.gmra.mrb[22].mxu0 %v5409_v16  ;;  %v16605_v16 = vld [vmem:[#allocation8] sm:$0xff]  }
 0x7b9   : > { %13482 = vmatpush3.msra.mxu0 %v5420_v22  ;;  %13483 = vmatprep.mubr.msk.f32.mxu0 %vm16911_vm0, %v16912_v1 }
 0x7ba   : > { %13486 = vmatprep.subr.mxu0 %v16912_v1 }
 0x7c0   : > { %13484 = vmatmul.mubr.f32.vlgmr.msra.gmra.mrb[22].mxu0 %v5405_v6 }
 0x7c1   : > { %13487 = vmatpush3.msra.mxu0 %v5417_v19  ;;  %13488 = vmatprep.mubr.msk.f32.mxu0 %vm16911_vm0, %v16912_v1 }
 0x7c2   : > { %13491 = vmatprep.subr.mxu0 %v16912_v1 }
 0x7c8   : > { %13489 = vmatmul.mubr.f32.vlgmr.msra.gmra.mrb[22].mxu0 %v5406_v12 }
 0x7c9   : > { %13492 = vmatpush3.msra.mxu0 %v5340_v32  ;;  %13493 = vmatprep.mubr.msk.f32.mxu0 %vm16911_vm0, %v16912_v1 }
 0x7ca   : > { %13496 = vmatprep.subr.mxu0 %v16912_v1 }
 0x7d0   : > { %13494 = vmatmul.mubr.f32.vlgmr.msra.gmra.mrb[22].mxu0 %v5407_v15 }
 0x7d1   : > { %13497 = vmatpush3.msra.mxu0 %v5418_v55  ;;  %13498 = vmatprep.mubr.msk.f32.mxu0 %vm16911_vm0, %v16912_v1 }
 0x7d2   : > { %13501 = vmatprep.subr.mxu0 %v16912_v1 }
 0x7d8   : > { %13499 = vmatmul.mubr.f32.vlgmr.msra.gmra.mrb[22].mxu0 %v5405_v6 }
 0x7d9   : > { %13502 = vmatpush3.msra.mxu0 %v5340_v32  ;;  %13503 = vmatprep.mubr.msk.f32.mxu0 %vm16911_vm0, %v16912_v1 }
 0x7da   : > { %15450 = vmatprep.subr.bf16.mxu0 %v16910_v0 }
 0x7e0   : > { %13504 = vmatmul.mubr.f32.vlgmr.msra.gmra.mrb[22].mxu0 %v5405_v6 }
 0x7e1   : > { %15452 = vmatpush3.bf16.msra.mxu0 %v17690_v30  ;;  %13546 = vmatprep.mubr.msk.f32.mxu0 %vm16911_vm0, %v16912_v1 }
 0x7e2   : > { %15453 = vmatprep.subr.bf16.mxu0 %v16910_v0 }
 0x7e5   : > { %15455 = vmatpush3.bf16.msra.mxu0 %v17708_v38 }
 0x7e6   : > { %15456 = vmatprep.subr.bf16.mxu0 %v16910_v0 }
 0x7e9   : > { %15458 = vmatpush3.bf16.msra.mxu0 %v17712_v39 }
 0x7ea   : > { %15459 = vmatprep.subr.bf16.mxu0 %v16910_v0 }
 0x7ed   : > { %15461 = vmatpush3.bf16.msra.mxu0 %v17726_v49 }
 0x7ee   : > { %15462 = vmatprep.subr.bf16.mxu0 %v16910_v0 }
 0x7f1   : > { %15464 = vmatpush3.bf16.msra.mxu0 %v17738_v54 }
 0x7f2   : > { %15465 = vmatprep.subr.bf16.mxu0 %v16910_v0 }
 0x7f5   : > { %15467 = vmatpush3.bf16.msra.mxu0 %v17756_v18 }
 0x7f6   : > { %15468 = vmatprep.subr.bf16.mxu0 %v16910_v0 }
 0x8b3   : > { %v5781_v62 = vpop.f32.mrb[22].mxu0 }
 0x8b4   : > { %v16315_v61 = vadd.f32 %v5781_v62, %v5330_v33  ;;  %v13505_v32 = vpop.f32.mrb[23].mxu0  ;;  %v7115_v33 = vand.u32 %v16607_v8, %v17646_v63  ;;  %v16608_v62 = vld [vmem:[%s19558_s21] sm:$0xff]   ;;  %v16609_v63 = vld [vmem:[%s19558_s21 + $0x8] sm:$0xff]  }
 0x8b5   : > { %v16612_v32 = vld [vmem:[%s19558_s21 + $0x20] sm:$0xff]  }
 0x8b6   : > { %v5785_v37 = vmax.f32 %v16315_v61, 0.0  ;;  %v16610_v61 = vld [vmem:[%s19558_s21 + $0x10] sm:$0xff]  }
 0x8b8   : > { %v5786_v29 = vpack.c.bf16 %v5785_v37, %v5785_v37  ;;  %v16613_v37 = vld [vmem:[%s19558_s21 + $0x28] sm:$0xff]  }
 0x8ba   : > { %13519 = vmatmul.mubr.msk.bf16.vlgmr.msra.gmra.mrb[20].mxu1 %vm2250_vm5, %v5786_v29 }
 0x8bb   : > { %15560 = vmatpush3.bf16.msra.mxu1 %v17690_v30  ;;  %13708 = vmatprep.mubr.msk.f32.mxu1 %vm16911_vm0, %v16912_v1 }
 0x8bc   : > { %15561 = vmatprep.subr.bf16.mxu1 %v16910_v0 }
 0x8bf   : > { %15563 = vmatpush3.bf16.msra.mxu1 %v17708_v38 }
 0x8c0   : > { %15564 = vmatprep.subr.bf16.mxu1 %v16910_v0 }
 0x8c3   : > { %15566 = vmatpush3.bf16.msra.mxu1 %v17712_v39 }
 0x8c4   : > { %15567 = vmatprep.subr.bf16.mxu1 %v16910_v0 }
 0x8c7   : > { %15569 = vmatpush3.bf16.msra.mxu1 %v17726_v49 }
 0x8c8   : > { %15570 = vmatprep.subr.bf16.mxu1 %v16910_v0 }
 0x8cb   : > { %15572 = vmatpush3.bf16.msra.mxu1 %v17738_v54 }
 0x8cc   : > { %15573 = vmatprep.subr.bf16.mxu1 %v16910_v0 }
 0x8cf   : > { %15575 = vmatpush3.bf16.msra.mxu1 %v17756_v18 }
 0x8d0   : > { %15576 = vmatprep.subr.bf16.mxu1 %v16910_v0 }
 0x98d   : > { %v18497_v9 = vpop.f32.mrb[20].mxu1 }
 0x98e   : > { %v5879_v14 = vsel %vm2250_vm5, %v18497_v9, 0  ;;  %v6470_v31 = vmul.f32 %v18497_v9, %v18497_v9  ;;  %v13520_v25 = vpop.f32.mrb[21].mxu1 }
 0x98f   : > { %v18503_v43 = vand.u32 4294901760, %v5879_v14  ;;  %v5875_v50 = vpop.f32.mrb[22].mxu1 }
 0x990   : > { %v6472_v53 = vsel %vm2250_vm5, %v6470_v31, 0  ;;  %v13521_v19 = vpop.f32.mrb[23].mxu1 }
 0x991   : > { %v18507_v27 = vsub.f32 %v5879_v14, %v18503_v43  ;;  %v18509_v52 = vand.u32 4294901760, %v6472_v53 }
 0x993   : > { %v5960_v55 = vand.u32 4294901760, %v18507_v27  ;;  %v18513_v6 = vsub.f32 %v6472_v53, %v18509_v52 }
 0x995   : > { %v5961_v12 = vsub.f32 %v18507_v27, %v5960_v55  ;;  %v6553_v28 = vand.u32 4294901760, %v18513_v6 }
 0x997   : > { %v5962_v15 = vand.u32 4294901760, %v5961_v12  ;;  %v6554_v41 = vsub.f32 %v18513_v6, %v6553_v28 }
 0x999   : > { %13547 = vmatmul.mubr.f32.vlgmr.msra.gmra.mrb[24].mxu0 %v5962_v15  ;;  %v6555_v22 = vand.u32 4294901760, %v6554_v41 }
 0x99a   : > { %15470 = vmatpush3.bf16.msra.mxu0 %v17774_v56  ;;  %13573 = vmatprep.mubr.msk.f32.mxu0 %vm16911_vm0, %v16912_v1 }
 0x99b   : > { %13709 = vmatmul.mubr.f32.vlgmr.msra.gmra.mrb[18].mxu1 %v6555_v22  ;;  %15471 = vmatprep.subr.bf16.mxu0 %v16910_v0 }
 0x99c   : > { %15578 = vmatpush3.bf16.msra.mxu1 %v17774_v56  ;;  %13735 = vmatprep.mubr.msk.f32.mxu1 %vm16911_vm0, %v16912_v1 }
 0x99d   : > { %15579 = vmatprep.subr.bf16.mxu1 %v16910_v0 }
 0x99e   : > { %15473 = vmatpush3.bf16.msra.mxu0 %v17788_v51 }
 0x99f   : > { %15474 = vmatprep.subr.bf16.mxu0 %v16910_v0 }
 0x9a0   : > { %15581 = vmatpush3.bf16.msra.mxu1 %v17788_v51 }
 0x9a1   : > { %15582 = vmatprep.subr.bf16.mxu1 %v16910_v0 }
 0x9a2   : > { %15476 = vmatpush3.bf16.msra.mxu0 %v17802_v7 }
 0x9a3   : > { %15477 = vmatprep.subr.bf16.mxu0 %v16910_v0 }
 0x9a4   : > { %15584 = vmatpush3.bf16.msra.mxu1 %v17802_v7 }
 0x9a5   : > { %15585 = vmatprep.subr.bf16.mxu1 %v16910_v0 }
 0x9a6   : > { %15479 = vmatpush3.bf16.msra.mxu0 %v17826_v42 }
 0x9a7   : > { %15480 = vmatprep.subr.bf16.mxu0 %v16910_v0 }
 0x9a8   : > { %15587 = vmatpush3.bf16.msra.mxu1 %v17826_v42 }
 0x9a9   : > { %15588 = vmatprep.subr.bf16.mxu1 %v16910_v0 }
 0x9aa   : > { %15482 = vmatpush3.bf16.msra.mxu0 %v17830_v24 }
 0x9ab   : > { %15483 = vmatprep.subr.bf16.mxu0 %v16910_v0 }
 0x9ac   : > { %15590 = vmatpush3.bf16.msra.mxu1 %v17830_v24 }
 0x9ad   : > { %15591 = vmatprep.subr.bf16.mxu1 %v16910_v0 }
 0x9ae   : > { %15485 = vmatpush3.bf16.msra.mxu0 %v17838_v13 }
 0x9af   : > { %15486 = vmatprep.subr.bf16.mxu0 %v16910_v0 }
 0x9b0   : > { %15593 = vmatpush3.bf16.msra.mxu1 %v17838_v13 }
 0x9b1   : > { %13574 = vmatmul.mubr.f32.vlgmr.msra.gmra.mrb[24].mxu0 %v18503_v43  ;;  %15594 = vmatprep.subr.bf16.mxu1 %v16910_v0 }
 0x9b2   : > { %15488 = vmatpush3.bf16.msra.mxu0 %v17842_v45  ;;  %13600 = vmatprep.mubr.msk.f32.mxu0 %vm16911_vm0, %v16912_v1 }
 0x9b3   : > { %13736 = vmatmul.mubr.f32.vlgmr.msra.gmra.mrb[18].mxu1 %v18509_v52  ;;  %15489 = vmatprep.subr.bf16.mxu0 %v16910_v0 }
 0x9b4   : > { %15596 = vmatpush3.bf16.msra.mxu1 %v17842_v45  ;;  %13762 = vmatprep.mubr.msk.f32.mxu1 %vm16911_vm0, %v16912_v1 }
 0x9b5   : > { %15597 = vmatprep.subr.bf16.mxu1 %v16910_v0 }
 0x9b6   : > { %15491 = vmatpush3.bf16.msra.mxu0 %v17846_v46 }
 0x9b7   : > { %15492 = vmatprep.subr.bf16.mxu0 %v16910_v0 }
 0x9b8   : > { %15599 = vmatpush3.bf16.msra.mxu1 %v17846_v46 }
 0x9b9   : > { %15600 = vmatprep.subr.bf16.mxu1 %v16910_v0 }
 0x9ba   : > { %15494 = vmatpush3.bf16.msra.mxu0 %v17850_v11 }
 0x9bb   : > { %15495 = vmatprep.subr.bf16.mxu0 %v16910_v0 }
 0x9bc   : > { %15602 = vmatpush3.bf16.msra.mxu1 %v17850_v11 }
 0x9bd   : > { %15603 = vmatprep.subr.bf16.mxu1 %v16910_v0 }
 0x9be   : > { %15497 = vmatpush3.bf16.msra.mxu0 %v17854_v2 }
 0x9bf   : > { %15498 = vmatprep.subr.bf16.mxu0 %v16910_v0 }
 0x9c0   : > { %15605 = vmatpush3.bf16.msra.mxu1 %v17854_v2 }
 0x9c1   : > { %15606 = vmatprep.subr.bf16.mxu1 %v16910_v0 }
 0x9c2   : > { %15500 = vmatpush3.bf16.msra.mxu0 %v17858_v23 }
 0x9c3   : > { %15501 = vmatprep.subr.bf16.mxu0 %v16910_v0 }
 0x9c4   : > { %15608 = vmatpush3.bf16.msra.mxu1 %v17858_v23 }
 0x9c5   : > { %15609 = vmatprep.subr.bf16.mxu1 %v16910_v0 }
 0x9c6   : > { %15503 = vmatpush3.bf16.msra.mxu0 %v17862_v48 }
 0x9c7   : > { %15504 = vmatprep.subr.bf16.mxu0 %v16910_v0 }
 0x9c8   : > { %15611 = vmatpush3.bf16.msra.mxu1 %v17862_v48 }
 0x9c9   : > { %13601 = vmatmul.mubr.f32.vlgmr.msra.gmra.mrb[24].mxu0 %v18507_v27  ;;  %15612 = vmatprep.subr.bf16.mxu1 %v16910_v0 }
 0x9ca   : > { %15506 = vmatpush3.bf16.msra.mxu0 %v17690_v30  ;;  %13627 = vmatprep.mubr.msk.f32.mxu0 %vm16911_vm0, %v16912_v1 }
 0x9cb   : > { %13763 = vmatmul.mubr.f32.vlgmr.msra.gmra.mrb[18].mxu1 %v18513_v6  ;;  %15507 = vmatprep.subr.bf16.mxu0 %v16910_v0 }
 0x9cc   : > { %15614 = vmatpush3.bf16.msra.mxu1 %v17690_v30  ;;  %13789 = vmatprep.mubr.msk.f32.mxu1 %vm16911_vm0, %v16912_v1 }
 0x9cd   : > { %15615 = vmatprep.subr.bf16.mxu1 %v16910_v0 }
 0x9ce   : > { %15509 = vmatpush3.bf16.msra.mxu0 %v17708_v38 }
 0x9cf   : > { %15510 = vmatprep.subr.bf16.mxu0 %v16910_v0 }
 0x9d0   : > { %15617 = vmatpush3.bf16.msra.mxu1 %v17708_v38 }
 0x9d1   : > { %15618 = vmatprep.subr.bf16.mxu1 %v16910_v0 }
 0x9d2   : > { %15512 = vmatpush3.bf16.msra.mxu0 %v17712_v39 }
 0x9d3   : > { %15513 = vmatprep.subr.bf16.mxu0 %v16910_v0 }
 0x9d4   : > { %15620 = vmatpush3.bf16.msra.mxu1 %v17712_v39 }
 0x9d5   : > { %15621 = vmatprep.subr.bf16.mxu1 %v16910_v0 }
 0x9d6   : > { %15515 = vmatpush3.bf16.msra.mxu0 %v17726_v49 }
 0x9d7   : > { %15516 = vmatprep.subr.bf16.mxu0 %v16910_v0 }
 0x9d8   : > { %15623 = vmatpush3.bf16.msra.mxu1 %v17726_v49 }
 0x9d9   : > { %15624 = vmatprep.subr.bf16.mxu1 %v16910_v0 }
 0x9da   : > { %15518 = vmatpush3.bf16.msra.mxu0 %v17738_v54 }
 0x9db   : > { %15519 = vmatprep.subr.bf16.mxu0 %v16910_v0 }
 0x9dc   : > { %15626 = vmatpush3.bf16.msra.mxu1 %v17738_v54 }
 0x9dd   : > { %15627 = vmatprep.subr.bf16.mxu1 %v16910_v0 }
 0x9de   : > { %15521 = vmatpush3.bf16.msra.mxu0 %v17756_v18 }
 0x9df   : > { %15522 = vmatprep.subr.bf16.mxu0 %v16910_v0 }
 0x9e0   : > { %15629 = vmatpush3.bf16.msra.mxu1 %v17756_v18 }
 0x9e1   : > { %13628 = vmatmul.mubr.f32.vlgmr.msra.gmra.mrb[24].mxu0 %v5960_v55  ;;  %15630 = vmatprep.subr.bf16.mxu1 %v16910_v0  ;;  %v18727_v55 = vld [vmem:[%s19500_s16 + $0x8] sm:$0xff] }
 0x9e2   : > { %15524 = vmatpush3.bf16.msra.mxu0 %v17995_v36  ;;  %13654 = vmatprep.mubr.msk.f32.mxu0 %vm16911_vm0, %v16912_v1 }
 0x9e3   : > { %13790 = vmatmul.mubr.f32.vlgmr.msra.gmra.mrb[18].mxu1 %v6553_v28  ;;  %15525 = vmatprep.subr.bf16.mxu0 %v16910_v0 }
 0x9e4   : > { %15632 = vmatpush3.bf16.msra.mxu1 %v17995_v36  ;;  %13816 = vmatprep.mubr.msk.f32.mxu1 %vm16911_vm0, %v16912_v1 }
 0x9e5   : > { %15633 = vmatprep.subr.bf16.mxu1 %v16910_v0 }
 0x9e6   : > { %15527 = vmatpush3.bf16.msra.mxu0 %v18007_v57 }
 0x9e7   : > { %15528 = vmatprep.subr.bf16.mxu0 %v16910_v0 }
 0x9e8   : > { %15635 = vmatpush3.bf16.msra.mxu1 %v18007_v57 }
 0x9e9   : > { %15636 = vmatprep.subr.bf16.mxu1 %v16910_v0 }
 0x9ea   : > { %15530 = vmatpush3.bf16.msra.mxu0 %v18023_v60 }
 0x9eb   : > { %15531 = vmatprep.subr.bf16.mxu0 %v16910_v0 }
 0x9ec   : > { %15638 = vmatpush3.bf16.msra.mxu1 %v18023_v60 }
 0x9ed   : > { %15639 = vmatprep.subr.bf16.mxu1 %v16910_v0 }
 0x9ee   : > { %15533 = vmatpush3.bf16.msra.mxu0 %v18033_v26 }
 0x9ef   : > { %15534 = vmatprep.subr.bf16.mxu0 %v16910_v0 }
 0x9f0   : > { %15641 = vmatpush3.bf16.msra.mxu1 %v18033_v26 }
 0x9f1   : > { %15642 = vmatprep.subr.bf16.mxu1 %v16910_v0 }
 0x9f2   : > { %15536 = vmatpush3.bf16.msra.mxu0 %v18043_v20 }
 0x9f3   : > { %15537 = vmatprep.subr.bf16.mxu0 %v16910_v0 }
 0x9f4   : > { %15644 = vmatpush3.bf16.msra.mxu1 %v18043_v20 }
 0x9f5   : > { %15645 = vmatprep.subr.bf16.mxu1 %v16910_v0 }
 0x9f6   : > { %15539 = vmatpush3.bf16.msra.mxu0 %v18053_v40 }
 0x9f7   : > { %15540 = vmatprep.subr.bf16.mxu0 %v16910_v0 }
 0x9f8   : > { %15647 = vmatpush3.bf16.msra.mxu1 %v18053_v40 }
 0x9f9   : > { %13655 = vmatmul.mubr.f32.vlgmr.msra.gmra.mrb[24].mxu0 %v18503_v43  ;;  %15648 = vmatprep.subr.bf16.mxu1 %v16910_v0 }
 0x9fa   : > { %15542 = vmatpush3.bf16.msra.mxu0 %v17690_v30  ;;  %13681 = vmatprep.mubr.msk.f32.mxu0 %vm16911_vm0, %v16912_v1 }
 0x9fb   : > { %13817 = vmatmul.mubr.f32.vlgmr.msra.gmra.mrb[18].mxu1 %v18509_v52  ;;  %15543 = vmatprep.subr.bf16.mxu0 %v16910_v0 }
 0x9fc   : > { %15650 = vmatpush3.bf16.msra.mxu1 %v17690_v30  ;;  %13843 = vmatprep.mubr.msk.f32.mxu1 %vm16911_vm0, %v16912_v1 }
 0x9fd   : > { %15651 = vmatprep.subr.bf16.mxu1 %v16910_v0 }
 0x9fe   : > { %15545 = vmatpush3.bf16.msra.mxu0 %v17708_v38 }
 0x9ff   : > { %15546 = vmatprep.subr.bf16.mxu0 %v16910_v0 }
 0xa00   : > { %15653 = vmatpush3.bf16.msra.mxu1 %v17708_v38 }
 0xa01   : > { %15654 = vmatprep.subr.bf16.mxu1 %v16910_v0 }
 0xa02   : > { %15548 = vmatpush3.bf16.msra.mxu0 %v17712_v39 }
 0xa03   : > { %15549 = vmatprep.subr.bf16.mxu0 %v16910_v0 }
 0xa04   : > { %15656 = vmatpush3.bf16.msra.mxu1 %v17712_v39 }
 0xa05   : > { %15657 = vmatprep.subr.bf16.mxu1 %v16910_v0 }
 0xa06   : > { %15551 = vmatpush3.bf16.msra.mxu0 %v17726_v49 }
 0xa07   : > { %15552 = vmatprep.subr.bf16.mxu0 %v16910_v0 }
 0xa08   : > { %15659 = vmatpush3.bf16.msra.mxu1 %v17726_v49 }
 0xa09   : > { %15660 = vmatprep.subr.bf16.mxu1 %v16910_v0 }
 0xa0a   : > { %15554 = vmatpush3.bf16.msra.mxu0 %v17738_v54 }
 0xa0b   : > { %15555 = vmatprep.subr.bf16.mxu0 %v16910_v0 }
 0xa0c   : > { %15662 = vmatpush3.bf16.msra.mxu1 %v17738_v54 }
 0xa0d   : > { %15663 = vmatprep.subr.bf16.mxu1 %v16910_v0 }
 0xa0e   : > { %15557 = vmatpush3.bf16.msra.mxu0 %v17756_v18 }
 0xa0f   : > { %13846 = vmatprep.subr.bf16.mxu0 %v16912_v1 }
 0xa10   : > { %15665 = vmatpush3.bf16.msra.mxu1 %v17756_v18 }
 0xa11   : > { %13682 = vmatmul.mubr.f32.vlgmr.msra.gmra.mrb[24].mxu0 %v18503_v43  ;;  %15666 = vmatprep.subr.bf16.mxu1 %v16910_v0 }
 0xa12   : > { %13847 = vmatpush3.bf16.msra.mxu0 %v16605_v16  ;;  %13852 = vmatprep.mubr.msk.bf16.mxu0 %vm16911_vm0, %v16912_v1 }
 0xa13   : > { %13844 = vmatmul.mubr.f32.vlgmr.msra.gmra.mrb[18].mxu1 %v18509_v52  ;;  %13848 = vmatprep.subr.bf16.mxu0 %v16912_v1  ;;  %v7072_v52 = vsub.s32 7, %v17868_v59 }
 0xa14   : > { %15668 = vmatpush3.bf16.msra.mxu1 %v17690_v30  ;;  %13896 = vmatprep.mubr.msk.f32.mxu1 %vm16911_vm0, %v16912_v1 }
 0xa15   : > { %15669 = vmatprep.subr.bf16.mxu1 %v16910_v0  ;;  %v7073_v6 = vrot.slane %v18477_v44, %v7072_v52 }
 0xa16   : > { %13849 = vmatpush3.bf16.msra.mxu0 %v16606_v34 }
 0xa17   : > { %13850 = vmatprep.subr.bf16.mxu0 %v16912_v1 }
 0xa18   : > { %15671 = vmatpush3.bf16.msra.mxu1 %v17708_v38 }
 0xa19   : > { %15672 = vmatprep.subr.bf16.mxu1 %v16910_v0 }
 0xa1a   : > { %13851 = vmatpush3.bf16.msra.mxu0 %v7115_v33 }
 0xa1b   : > { %13856 = vmatprep.subr.bf16.mxu0 %v16912_v1 }
 0xa1c   : > { %15674 = vmatpush3.bf16.msra.mxu1 %v17712_v39 }
 0xa1d   : > { %15675 = vmatprep.subr.bf16.mxu1 %v16910_v0  ;;  %13853 = vmatmul.mubr.msk.bf16.vlgmr.msra.gmra.mrb[28].mxu0 %vm658_vm2, %v17652_v4  ;;  %v16611_v4 = vld [vmem:[%s19558_s21 + $0x18] sm:$0xff]  }
 0xa1e   : > { %13857 = vmatpush3.bf16.msra.mxu0 %v16608_v62  ;;  %13868 = vmatprep.mubr.msk.bf16.mxu0 %vm16911_vm0, %v16912_v1 }
 0xa1f   : > { %13858 = vmatprep.subr.bf16.mxu0 %v16912_v1 }
 0xa20   : > { %15677 = vmatpush3.bf16.msra.mxu1 %v17726_v49 }
 0xa21   : > { %15678 = vmatprep.subr.bf16.mxu1 %v16910_v0 }
 0xa22   : > { %13859 = vmatpush3.bf16.msra.mxu0 %v16609_v63 }
 0xa23   : > { %13860 = vmatprep.subr.bf16.mxu0 %v16912_v1 }
 0xa24   : > { %15680 = vmatpush3.bf16.msra.mxu1 %v17738_v54 }
 0xa25   : > { %15681 = vmatprep.subr.bf16.mxu1 %v16910_v0 }
 0xa26   : > { %13861 = vmatpush3.bf16.msra.mxu0 %v16610_v61 }
 0xa27   : > { %13862 = vmatprep.subr.bf16.mxu0 %v16912_v1 }
 0xa28   : > { %15683 = vmatpush3.bf16.msra.mxu1 %v17756_v18 }
 0xa29   : > { %15684 = vmatprep.subr.bf16.mxu1 %v16910_v0 }
 0xa2a   : > { %13863 = vmatpush3.bf16.msra.mxu0 %v16611_v4 }
 0xa2b   : > { %13864 = vmatprep.subr.bf16.mxu0 %v16912_v1 }
 0xa2e   : > { %13865 = vmatpush3.bf16.msra.mxu0 %v16612_v32 }
 0xa2f   : > { %13866 = vmatprep.subr.bf16.mxu0 %v16912_v1 }
 0xa32   : > { %13867 = vmatpush3.bf16.msra.mxu0 %v16613_v37 }
 0xa33   : > { %15774 = vmatprep.subr.bf16.mxu0 %v16910_v0 }
 0xae4   : > { %v6466_v29 = vpop.f32.mrb[24].mxu0 }
 0xae5   : > { %v7063_v14 = vmul.f32 %v6466_v29, %v6466_v29  ;;  %v7066_v31 = vsub.f32 %v18497_v9, %v6466_v29  ;;  %v13683_v25 = vpop.f32.mrb[25].mxu0  ;;  %v7078_v9 = vrot.slane %v18727_v55, %v2183_v3 }
 0xae6   : > { %v7059_v43 = vpop.f32.mrb[18].mxu1 }
 0xae7   : > { %v7064_v50 = vsub.f32 %v7059_v43, %v7063_v14  ;;  %v13845_v53 = vpop.f32.mrb[19].mxu1 }
 0xae8   : > { %v16614_v53 = vld [vmem:[#allocation10] sm:$0xff]  }
 0xae9   : > { %v7065_v19 = vmax.f32 %v7064_v50, 0.0 }
 0xaeb   : > { %v7067_v27 = vadd.f32 1e-05, %v7065_v19  ;;  %v16615_v19 = vld [vmem:[#allocation10 + $0x8] sm:$0xff]  }
 0xaed   : > { %16636 = vrsqrt.f32 %v7067_v27  ;;  %v16616_v27 = vld [vmem:[#allocation10 + $0x10] sm:$0xff]  }
 0xaf7   : > { %v16637_v12 = vpop.eup %16636 }
 0xaf8   : > { %v7069_v28 = vmul.f32 %v16637_v12, %v7066_v31  ;;  %v16618_v12 = vld [vmem:[#allocation10 + $0x20] sm:$0xff]  }
 0xafa   : > { %v7074_v15 = vmul.f32 %v7073_v6, %v7069_v28  ;;  %v16617_v6 = vld [vmem:[#allocation10 + $0x18] sm:$0xff]  }
 0xafc   : > { %v7079_v41 = vadd.f32 %v7078_v9, %v7074_v15  ;;  %v16619_v9 = vld [vmem:[#allocation10 + $0x28] sm:$0xff]  }
 0xafe   : > { %v7080_v22 = vmax.f32 %v7079_v41, 0.0 }
 0xb00   : > { %v7081_v16 = vpack.c.bf16 %v7080_v22, %v7080_v22 }
 0xb02   : > { %13869 = vmatmul.mubr.msk.bf16.vlgmr.msra.gmra.mrb[28].mxu0 %vm2250_vm5, %v7081_v16 }
 0xb03   : > { %15776 = vmatpush3.bf16.msra.mxu0 %v17690_v30  ;;  %14058 = vmatprep.mubr.msk.f32.mxu0 %vm16911_vm0, %v16912_v1 }
 0xb04   : > { %15777 = vmatprep.subr.bf16.mxu0 %v16910_v0 }
 0xb07   : > { %15779 = vmatpush3.bf16.msra.mxu0 %v17708_v38 }
 0xb08   : > { %15780 = vmatprep.subr.bf16.mxu0 %v16910_v0 }
 0xb0b   : > { %15782 = vmatpush3.bf16.msra.mxu0 %v17712_v39 }
 0xb0c   : > { %15783 = vmatprep.subr.bf16.mxu0 %v16910_v0 }
 0xb0f   : > { %15785 = vmatpush3.bf16.msra.mxu0 %v17726_v49 }
 0xb10   : > { %15786 = vmatprep.subr.bf16.mxu0 %v16910_v0 }
 0xb13   : > { %15788 = vmatpush3.bf16.msra.mxu0 %v17738_v54 }
 0xb14   : > { %15789 = vmatprep.subr.bf16.mxu0 %v16910_v0 }
 0xb17   : > { %15791 = vmatpush3.bf16.msra.mxu0 %v17756_v18 }
 0xb18   : > { %15792 = vmatprep.subr.bf16.mxu0 %v16910_v0 }
 0xbd5   : > { %v18750_v3 = vpop.f32.mrb[28].mxu0 }
 0xbd6   : > { %v7237_v44 = vsel %vm2250_vm5, %v18750_v3, 0  ;;  %v7828_v34 = vmul.f32 %v18750_v3, %v18750_v3  ;;  %v13870_v8 = vpop.f32.mrb[29].mxu0 }
 0xbd7   : > { %v18756_v33 = vand.u32 4294901760, %v7237_v44  ;;  %v7233_v62 = vpop.f32.mrb[30].mxu0 }
 0xbd8   : > { %v7830_v63 = vsel %vm2250_vm5, %v7828_v34, 0  ;;  %v13871_v61 = vpop.f32.mrb[31].mxu0  ;;  %v8431_v62 = vrot.slane %v18727_v55, %v3445_v21  ;;  %v8455_v21 = vrot.slane %v18727_v55, %v3469_v58 }
 0xbd9   : > { %v18760_v4 = vsub.f32 %v7237_v44, %v18756_v33  ;;  %v18762_v32 = vand.u32 4294901760, %v7830_v63 }
 0xbdb   : > { %v7318_v37 = vand.u32 4294901760, %v18760_v4  ;;  %v18766_v29 = vsub.f32 %v7830_v63, %v18762_v32 }
 0xbdd   : > { %v7319_v14 = vsub.f32 %v18760_v4, %v7318_v37  ;;  %v7911_v31 = vand.u32 4294901760, %v18766_v29 }
 0xbdf   : > { %v7320_v25 = vand.u32 4294901760, %v7319_v14  ;;  %v7912_v43 = vsub.f32 %v18766_v29, %v7911_v31 }
 0xbe1   : > { %13897 = vmatmul.mubr.f32.vlgmr.msra.gmra.mrb[24].mxu1 %v7320_v25  ;;  %v7913_v50 = vand.u32 4294901760, %v7912_v43 }
 0xbe2   : > { %15686 = vmatpush3.bf16.msra.mxu1 %v17774_v56  ;;  %13923 = vmatprep.mubr.msk.f32.mxu1 %vm16911_vm0, %v16912_v1 }
 0xbe3   : > { %14059 = vmatmul.mubr.f32.vlgmr.msra.gmra.mrb[26].mxu0 %v7913_v50  ;;  %15687 = vmatprep.subr.bf16.mxu1 %v16910_v0 }
 0xbe4   : > { %15794 = vmatpush3.bf16.msra.mxu0 %v17774_v56  ;;  %14085 = vmatprep.mubr.msk.f32.mxu0 %vm16911_vm0, %v16912_v1 }
 0xbe5   : > { %15795 = vmatprep.subr.bf16.mxu0 %v16910_v0 }
 0xbe6   : > { %15689 = vmatpush3.bf16.msra.mxu1 %v17788_v51 }
 0xbe7   : > { %15690 = vmatprep.subr.bf16.mxu1 %v16910_v0 }
 0xbe8   : > { %15797 = vmatpush3.bf16.msra.mxu0 %v17788_v51 }
 0xbe9   : > { %15798 = vmatprep.subr.bf16.mxu0 %v16910_v0 }
 0xbea   : > { %15692 = vmatpush3.bf16.msra.mxu1 %v17802_v7 }
 0xbeb   : > { %15693 = vmatprep.subr.bf16.mxu1 %v16910_v0 }
 0xbec   : > { %15800 = vmatpush3.bf16.msra.mxu0 %v17802_v7 }
 0xbed   : > { %15801 = vmatprep.subr.bf16.mxu0 %v16910_v0 }
 0xbee   : > { %15695 = vmatpush3.bf16.msra.mxu1 %v17826_v42 }
 0xbef   : > { %15696 = vmatprep.subr.bf16.mxu1 %v16910_v0 }
 0xbf0   : > { %15803 = vmatpush3.bf16.msra.mxu0 %v17826_v42 }
 0xbf1   : > { %15804 = vmatprep.subr.bf16.mxu0 %v16910_v0 }
 0xbf2   : > { %15698 = vmatpush3.bf16.msra.mxu1 %v17830_v24 }
 0xbf3   : > { %15699 = vmatprep.subr.bf16.mxu1 %v16910_v0 }
 0xbf4   : > { %15806 = vmatpush3.bf16.msra.mxu0 %v17830_v24 }
 0xbf5   : > { %15807 = vmatprep.subr.bf16.mxu0 %v16910_v0 }
 0xbf6   : > { %15701 = vmatpush3.bf16.msra.mxu1 %v17838_v13 }
 0xbf7   : > { %15702 = vmatprep.subr.bf16.mxu1 %v16910_v0 }
 0xbf8   : > { %15809 = vmatpush3.bf16.msra.mxu0 %v17838_v13 }
 0xbf9   : > { %13924 = vmatmul.mubr.f32.vlgmr.msra.gmra.mrb[24].mxu1 %v18756_v33  ;;  %15810 = vmatprep.subr.bf16.mxu0 %v16910_v0 }
 0xbfa   : > { %15704 = vmatpush3.bf16.msra.mxu1 %v17842_v45  ;;  %13950 = vmatprep.mubr.msk.f32.mxu1 %vm16911_vm0, %v16912_v1 }
 0xbfb   : > { %14086 = vmatmul.mubr.f32.vlgmr.msra.gmra.mrb[26].mxu0 %v18762_v32  ;;  %15705 = vmatprep.subr.bf16.mxu1 %v16910_v0 }
 0xbfc   : > { %15812 = vmatpush3.bf16.msra.mxu0 %v17842_v45  ;;  %14112 = vmatprep.mubr.msk.f32.mxu0 %vm16911_vm0, %v16912_v1 }
 0xbfd   : > { %15813 = vmatprep.subr.bf16.mxu0 %v16910_v0 }
 0xbfe   : > { %15707 = vmatpush3.bf16.msra.mxu1 %v17846_v46 }
 0xbff   : > { %15708 = vmatprep.subr.bf16.mxu1 %v16910_v0 }
 0xc00   : > { %15815 = vmatpush3.bf16.msra.mxu0 %v17846_v46 }
 0xc01   : > { %15816 = vmatprep.subr.bf16.mxu0 %v16910_v0 }
 0xc02   : > { %15710 = vmatpush3.bf16.msra.mxu1 %v17850_v11 }
 0xc03   : > { %15711 = vmatprep.subr.bf16.mxu1 %v16910_v0 }
 0xc04   : > { %15818 = vmatpush3.bf16.msra.mxu0 %v17850_v11 }
 0xc05   : > { %15819 = vmatprep.subr.bf16.mxu0 %v16910_v0 }
 0xc06   : > { %15713 = vmatpush3.bf16.msra.mxu1 %v17854_v2 }
 0xc07   : > { %15714 = vmatprep.subr.bf16.mxu1 %v16910_v0 }
 0xc08   : > { %15821 = vmatpush3.bf16.msra.mxu0 %v17854_v2 }
 0xc09   : > { %15822 = vmatprep.subr.bf16.mxu0 %v16910_v0 }
 0xc0a   : > { %15716 = vmatpush3.bf16.msra.mxu1 %v17858_v23 }
 0xc0b   : > { %15717 = vmatprep.subr.bf16.mxu1 %v16910_v0 }
 0xc0c   : > { %15824 = vmatpush3.bf16.msra.mxu0 %v17858_v23 }
 0xc0d   : > { %15825 = vmatprep.subr.bf16.mxu0 %v16910_v0 }
 0xc0e   : > { %15719 = vmatpush3.bf16.msra.mxu1 %v17862_v48 }
 0xc0f   : > { %15720 = vmatprep.subr.bf16.mxu1 %v16910_v0 }
 0xc10   : > { %15827 = vmatpush3.bf16.msra.mxu0 %v17862_v48 }
 0xc11   : > { %13951 = vmatmul.mubr.f32.vlgmr.msra.gmra.mrb[24].mxu1 %v18760_v4  ;;  %15828 = vmatprep.subr.bf16.mxu0 %v16910_v0  ;;  %v8436_v4 = vrot.slane %v18727_v55, %v3450_v35 }
 0xc12   : > { %15722 = vmatpush3.bf16.msra.mxu1 %v17690_v30  ;;  %13977 = vmatprep.mubr.msk.f32.mxu1 %vm16911_vm0, %v16912_v1 }
 0xc13   : > { %14113 = vmatmul.mubr.f32.vlgmr.msra.gmra.mrb[26].mxu0 %v18766_v29  ;;  %15723 = vmatprep.subr.bf16.mxu1 %v16910_v0 }
 0xc14   : > { %15830 = vmatpush3.bf16.msra.mxu0 %v17690_v30  ;;  %14139 = vmatprep.mubr.msk.f32.mxu0 %vm16911_vm0, %v16912_v1 }
 0xc15   : > { %15831 = vmatprep.subr.bf16.mxu0 %v16910_v0 }
 0xc16   : > { %15725 = vmatpush3.bf16.msra.mxu1 %v17708_v38 }
 0xc17   : > { %15726 = vmatprep.subr.bf16.mxu1 %v16910_v0 }
 0xc18   : > { %15833 = vmatpush3.bf16.msra.mxu0 %v17708_v38 }
 0xc19   : > { %15834 = vmatprep.subr.bf16.mxu0 %v16910_v0 }
 0xc1a   : > { %15728 = vmatpush3.bf16.msra.mxu1 %v17712_v39 }
 0xc1b   : > { %15729 = vmatprep.subr.bf16.mxu1 %v16910_v0 }
 0xc1c   : > { %15836 = vmatpush3.bf16.msra.mxu0 %v17712_v39 }
 0xc1d   : > { %15837 = vmatprep.subr.bf16.mxu0 %v16910_v0 }
 0xc1e   : > { %15731 = vmatpush3.bf16.msra.mxu1 %v17726_v49 }
 0xc1f   : > { %15732 = vmatprep.subr.bf16.mxu1 %v16910_v0 }
 0xc20   : > { %15839 = vmatpush3.bf16.msra.mxu0 %v17726_v49 }
 0xc21   : > { %15840 = vmatprep.subr.bf16.mxu0 %v16910_v0 }
 0xc22   : > { %15734 = vmatpush3.bf16.msra.mxu1 %v17738_v54 }
 0xc23   : > { %15735 = vmatprep.subr.bf16.mxu1 %v16910_v0 }
 0xc24   : > { %15842 = vmatpush3.bf16.msra.mxu0 %v17738_v54 }
 0xc25   : > { %15843 = vmatprep.subr.bf16.mxu0 %v16910_v0 }
 0xc26   : > { %15737 = vmatpush3.bf16.msra.mxu1 %v17756_v18 }
 0xc27   : > { %15738 = vmatprep.subr.bf16.mxu1 %v16910_v0 }
 0xc28   : > { %15845 = vmatpush3.bf16.msra.mxu0 %v17756_v18 }
 0xc29   : > { %13978 = vmatmul.mubr.f32.vlgmr.msra.gmra.mrb[24].mxu1 %v7318_v37  ;;  %15846 = vmatprep.subr.bf16.mxu0 %v16910_v0 }
 0xc2a   : > { %15740 = vmatpush3.bf16.msra.mxu1 %v17995_v36  ;;  %14004 = vmatprep.mubr.msk.f32.mxu1 %vm16911_vm0, %v16912_v1 }
 0xc2b   : > { %14140 = vmatmul.mubr.f32.vlgmr.msra.gmra.mrb[26].mxu0 %v7911_v31  ;;  %15741 = vmatprep.subr.bf16.mxu1 %v16910_v0 }
 0xc2c   : > { %15848 = vmatpush3.bf16.msra.mxu0 %v17995_v36  ;;  %14166 = vmatprep.mubr.msk.f32.mxu0 %vm16911_vm0, %v16912_v1 }
 0xc2d   : > { %15849 = vmatprep.subr.bf16.mxu0 %v16910_v0 }
 0xc2e   : > { %15743 = vmatpush3.bf16.msra.mxu1 %v18007_v57 }
 0xc2f   : > { %15744 = vmatprep.subr.bf16.mxu1 %v16910_v0 }
 0xc30   : > { %15851 = vmatpush3.bf16.msra.mxu0 %v18007_v57 }
 0xc31   : > { %15852 = vmatprep.subr.bf16.mxu0 %v16910_v0 }
 0xc32   : > { %15746 = vmatpush3.bf16.msra.mxu1 %v18023_v60 }
 0xc33   : > { %15747 = vmatprep.subr.bf16.mxu1 %v16910_v0 }
 0xc34   : > { %15854 = vmatpush3.bf16.msra.mxu0 %v18023_v60 }
 0xc35   : > { %15855 = vmatprep.subr.bf16.mxu0 %v16910_v0 }
 0xc36   : > { %15749 = vmatpush3.bf16.msra.mxu1 %v18033_v26 }
 0xc37   : > { %15750 = vmatprep.subr.bf16.mxu1 %v16910_v0 }
 0xc38   : > { %15857 = vmatpush3.bf16.msra.mxu0 %v18033_v26 }
 0xc39   : > { %15858 = vmatprep.subr.bf16.mxu0 %v16910_v0 }
 0xc3a   : > { %15752 = vmatpush3.bf16.msra.mxu1 %v18043_v20 }
 0xc3b   : > { %15753 = vmatprep.subr.bf16.mxu1 %v16910_v0 }
 0xc3c   : > { %15860 = vmatpush3.bf16.msra.mxu0 %v18043_v20 }
 0xc3d   : > { %15861 = vmatprep.subr.bf16.mxu0 %v16910_v0 }
 0xc3e   : > { %15755 = vmatpush3.bf16.msra.mxu1 %v18053_v40 }
 0xc3f   : > { %15756 = vmatprep.subr.bf16.mxu1 %v16910_v0 }
 0xc40   : > { %15863 = vmatpush3.bf16.msra.mxu0 %v18053_v40 }
 0xc41   : > { %14005 = vmatmul.mubr.f32.vlgmr.msra.gmra.mrb[24].mxu1 %v18756_v33  ;;  %15864 = vmatprep.subr.bf16.mxu0 %v16910_v0 }
 0xc42   : > { %15758 = vmatpush3.bf16.msra.mxu1 %v17690_v30  ;;  %14031 = vmatprep.mubr.msk.f32.mxu1 %vm16911_vm0, %v16912_v1 }
 0xc43   : > { %14167 = vmatmul.mubr.f32.vlgmr.msra.gmra.mrb[26].mxu0 %v18762_v32  ;;  %15759 = vmatprep.subr.bf16.mxu1 %v16910_v0 }
 0xc44   : > { %15866 = vmatpush3.bf16.msra.mxu0 %v17690_v30  ;;  %14193 = vmatprep.mubr.msk.f32.mxu0 %vm16911_vm0, %v16912_v1 }
 0xc45   : > { %15867 = vmatprep.subr.bf16.mxu0 %v16910_v0 }
 0xc46   : > { %15761 = vmatpush3.bf16.msra.mxu1 %v17708_v38 }
 0xc47   : > { %15762 = vmatprep.subr.bf16.mxu1 %v16910_v0 }
 0xc48   : > { %15869 = vmatpush3.bf16.msra.mxu0 %v17708_v38 }
 0xc49   : > { %15870 = vmatprep.subr.bf16.mxu0 %v16910_v0 }
 0xc4a   : > { %15764 = vmatpush3.bf16.msra.mxu1 %v17712_v39 }
 0xc4b   : > { %15765 = vmatprep.subr.bf16.mxu1 %v16910_v0 }
 0xc4c   : > { %15872 = vmatpush3.bf16.msra.mxu0 %v17712_v39 }
 0xc4d   : > { %15873 = vmatprep.subr.bf16.mxu0 %v16910_v0 }
 0xc4e   : > { %15767 = vmatpush3.bf16.msra.mxu1 %v17726_v49 }
 0xc4f   : > { %15768 = vmatprep.subr.bf16.mxu1 %v16910_v0 }
 0xc50   : > { %15875 = vmatpush3.bf16.msra.mxu0 %v17726_v49 }
 0xc51   : > { %15876 = vmatprep.subr.bf16.mxu0 %v16910_v0 }
 0xc52   : > { %15770 = vmatpush3.bf16.msra.mxu1 %v17738_v54 }
 0xc53   : > { %15771 = vmatprep.subr.bf16.mxu1 %v16910_v0 }
 0xc54   : > { %15878 = vmatpush3.bf16.msra.mxu0 %v17738_v54 }
 0xc55   : > { %15879 = vmatprep.subr.bf16.mxu0 %v16910_v0 }
 0xc56   : > { %15773 = vmatpush3.bf16.msra.mxu1 %v17756_v18 }
 0xc57   : > { %14196 = vmatprep.subr.bf16.mxu1 %v16912_v1 }
 0xc58   : > { %15881 = vmatpush3.bf16.msra.mxu0 %v17756_v18 }
 0xc59   : > { %14032 = vmatmul.mubr.f32.vlgmr.msra.gmra.mrb[24].mxu1 %v18756_v33  ;;  %15882 = vmatprep.subr.bf16.mxu0 %v16910_v0 }
 0xc5a   : > { %14208 = vmatprep.mubr.msk.bf16.mxu1 %vm16911_vm0, %v16912_v1  ;;  %14197 = vmatpush3.bf16.msra.mxu1 %v16614_v53 }
 0xc5b   : > { %14194 = vmatmul.mubr.f32.vlgmr.msra.gmra.mrb[26].mxu0 %v18762_v32  ;;  %14198 = vmatprep.subr.bf16.mxu1 %v16912_v1 }
 0xc5c   : > { %15884 = vmatpush3.bf16.msra.mxu0 %v17690_v30  ;;  %14236 = vmatprep.mubr.msk.f32.mxu0 %vm16911_vm0, %v16912_v1 }
 0xc5d   : > { %15885 = vmatprep.subr.bf16.mxu0 %v16910_v0 }
 0xc5e   : > { %14199 = vmatpush3.bf16.msra.mxu1 %v16615_v19 }
 0xc5f   : > { %14200 = vmatprep.subr.bf16.mxu1 %v16912_v1 }
 0xc60   : > { %15887 = vmatpush3.bf16.msra.mxu0 %v17708_v38 }
 0xc61   : > { %15888 = vmatprep.subr.bf16.mxu0 %v16910_v0 }
 0xc62   : > { %14201 = vmatpush3.bf16.msra.mxu1 %v16616_v27 }
 0xc63   : > { %14202 = vmatprep.subr.bf16.mxu1 %v16912_v1 }
 0xc64   : > { %15890 = vmatpush3.bf16.msra.mxu0 %v17712_v39 }
 0xc65   : > { %15891 = vmatprep.subr.bf16.mxu0 %v16910_v0 }
 0xc66   : > { %14203 = vmatpush3.bf16.msra.mxu1 %v16617_v6 }
 0xc67   : > { %14204 = vmatprep.subr.bf16.mxu1 %v16912_v1 }
 0xc68   : > { %15893 = vmatpush3.bf16.msra.mxu0 %v17726_v49 }
 0xc69   : > { %15894 = vmatprep.subr.bf16.mxu0 %v16910_v0 }
 0xc6a   : > { %14205 = vmatpush3.bf16.msra.mxu1 %v16618_v12 }
 0xc6b   : > { %14206 = vmatprep.subr.bf16.mxu1 %v16912_v1 }
 0xc6c   : > { %15896 = vmatpush3.bf16.msra.mxu0 %v17738_v54 }
 0xc6d   : > { %15897 = vmatprep.subr.bf16.mxu0 %v16910_v0 }
 0xc6e   : > { %14207 = vmatpush3.bf16.msra.mxu1 %v16619_v9 }
 0xc6f   : > { %15990 = vmatprep.subr.bf16.mxu1 %v16910_v0 }
 0xc70   : > { %15899 = vmatpush3.bf16.msra.mxu0 %v17756_v18 }
 0xc71   : > { %15900 = vmatprep.subr.bf16.mxu0 %v16910_v0 }
 0xd2c   : > { %v7824_v28 = vpop.f32.mrb[24].mxu1 }
 0xd2d   : > { %v8421_v15 = vmul.f32 %v7824_v28, %v7824_v28  ;;  %v8424_v41 = vsub.f32 %v18750_v3, %v7824_v28  ;;  %v14033_v22 = vpop.f32.mrb[25].mxu1 }
 0xd2e   : > { %v8417_v16 = vpop.f32.mrb[26].mxu0 }
 0xd2f   : > { %v8422_v44 = vsub.f32 %v8417_v16, %v8421_v15  ;;  %v14195_v34 = vpop.f32.mrb[27].mxu0 }
 0xd30   : > { %v16621_v34 = vld [vmem:[%s19559_s15 + $0x8] sm:$0xff]  }
 0xd31   : > { %v8423_v8 = vmax.f32 %v8422_v44, 0.0  ;;  %v16620_v44 = vld [vmem:[%s19559_s15] sm:$0xff]  }
 0xd33   : > { %v8425_v33 = vadd.f32 1e-05, %v8423_v8  ;;  %v16622_v8 = vld [vmem:[%s19559_s15 + $0x10] sm:$0xff]  }
 0xd35   : > { %16638 = vrsqrt.f32 %v8425_v33  ;;  %v16623_v33 = vld [vmem:[%s19559_s15 + $0x18] sm:$0xff]  }
 0xd3f   : > { %v16639_v63 = vpop.eup %16638 }
 0xd40   : > { %v8427_v61 = vmul.f32 %v16639_v63, %v8424_v41  ;;  %v16625_v63 = vld [vmem:[%s19559_s15 + $0x28] sm:$0xff]  }
 0xd42   : > { %v8432_v32 = vmul.f32 %v8431_v62, %v8427_v61  ;;  %v16624_v62 = vld [vmem:[%s19559_s15 + $0x20] sm:$0xff]  }
 0xd44   : > { %v8437_v37 = vadd.f32 %v8436_v4, %v8432_v32 }
 0xd46   : > { %v18956_v3 = vmax.f32 %v8437_v37, 0.0 }
 0xd48   : > { %v8439_v29 = vpack.c.bf16 %v18956_v3, %v18956_v3 }
 0xd4a   : > { %14209 = vmatmul.mubr.msk.bf16.vlgmr.msra.gmra.mrb[28].mxu1 %vm2250_vm5, %v8439_v29 }
 0xd4b   : > { %15992 = vmatpush3.bf16.msra.mxu1 %v17690_v30  ;;  %14398 = vmatprep.mubr.msk.f32.mxu1 %vm16911_vm0, %v16912_v1 }
 0xd4c   : > { %15993 = vmatprep.subr.bf16.mxu1 %v16910_v0 }
 0xd4f   : > { %15995 = vmatpush3.bf16.msra.mxu1 %v17708_v38 }
 0xd50   : > { %15996 = vmatprep.subr.bf16.mxu1 %v16910_v0 }
 0xd53   : > { %15998 = vmatpush3.bf16.msra.mxu1 %v17712_v39 }
 0xd54   : > { %15999 = vmatprep.subr.bf16.mxu1 %v16910_v0 }
 0xd57   : > { %16001 = vmatpush3.bf16.msra.mxu1 %v17726_v49 }
 0xd58   : > { %16002 = vmatprep.subr.bf16.mxu1 %v16910_v0 }
 0xd5b   : > { %16004 = vmatpush3.bf16.msra.mxu1 %v17738_v54 }
 0xd5c   : > { %16005 = vmatprep.subr.bf16.mxu1 %v16910_v0 }
 0xd5f   : > { %16007 = vmatpush3.bf16.msra.mxu1 %v17756_v18 }
 0xd60   : > { %16008 = vmatprep.subr.bf16.mxu1 %v16910_v0 }
 0xe1d   : > { %v8529_v35 = vpop.f32.mrb[28].mxu1 }
 0xe1e   : > { %v18978_v14 = vadd.f32 %v8529_v35, %v8455_v21  ;;  %v14210_v31 = vpop.f32.mrb[29].mxu1 }
 0xe1f   : > { %v8532_v25 = vpop.f32.mrb[30].mxu1 }
 0xe20   : > { %v8536_v43 = vsel %vm2250_vm5, %v18978_v14, 0  ;;  %v9127_v50 = vmul.f32 %v18978_v14, %v18978_v14  ;;  %v14211_v53 = vpop.f32.mrb[31].mxu1 }
 0xe21   : > { %v18984_v19 = vand.u32 4294901760, %v8536_v43 }
 0xe22   : > { %v9129_v27 = vsel %vm2250_vm5, %v9127_v50, 0 }
 0xe23   : > { %v18988_v6 = vsub.f32 %v8536_v43, %v18984_v19  ;;  %v18990_v58 = vand.u32 4294901760, %v9129_v27  ;;  %v9730_v43 = vrot.slane %v18727_v55, %v4744_v5  ;;  %v9754_v5 = vrot.slane %v18727_v55, %v5329_v17 }
 0xe25   : > { %v18993_v12 = vsub.f32 %v9129_v27, %v18990_v58  ;;  %v8617_v9 = vand.u32 4294901760, %v18988_v6 }
 0xe27   : > { %v8618_v28 = vsub.f32 %v18988_v6, %v8617_v9  ;;  %v9210_v15 = vand.u32 4294901760, %v18993_v12 }
 0xe29   : > { %v8619_v41 = vand.u32 4294901760, %v8618_v28  ;;  %v9211_v22 = vsub.f32 %v18993_v12, %v9210_v15 }
 0xe2b   : > { %14237 = vmatmul.mubr.f32.vlgmr.msra.gmra.mrb[32].mxu0 %v8619_v41  ;;  %v9212_v16 = vand.u32 4294901760, %v9211_v22 }
 0xe2c   : > { %15902 = vmatpush3.bf16.msra.mxu0 %v17774_v56  ;;  %14263 = vmatprep.mubr.msk.f32.mxu0 %vm16911_vm0, %v16912_v1 }
 0xe2d   : > { %14399 = vmatmul.mubr.f32.vlgmr.msra.gmra.mrb[26].mxu1 %v9212_v16  ;;  %15903 = vmatprep.subr.bf16.mxu0 %v16910_v0 }
 0xe2e   : > { %16010 = vmatpush3.bf16.msra.mxu1 %v17774_v56  ;;  %14425 = vmatprep.mubr.msk.f32.mxu1 %vm16911_vm0, %v16912_v1 }
 0xe2f   : > { %16011 = vmatprep.subr.bf16.mxu1 %v16910_v0 }
 0xe30   : > { %15905 = vmatpush3.bf16.msra.mxu0 %v17788_v51 }
 0xe31   : > { %15906 = vmatprep.subr.bf16.mxu0 %v16910_v0 }
 0xe32   : > { %16013 = vmatpush3.bf16.msra.mxu1 %v17788_v51 }
 0xe33   : > { %16014 = vmatprep.subr.bf16.mxu1 %v16910_v0 }
 0xe34   : > { %15908 = vmatpush3.bf16.msra.mxu0 %v17802_v7 }
 0xe35   : > { %15909 = vmatprep.subr.bf16.mxu0 %v16910_v0 }
 0xe36   : > { %16016 = vmatpush3.bf16.msra.mxu1 %v17802_v7 }
 0xe37   : > { %16017 = vmatprep.subr.bf16.mxu1 %v16910_v0 }
 0xe38   : > { %15911 = vmatpush3.bf16.msra.mxu0 %v17826_v42 }
 0xe39   : > { %15912 = vmatprep.subr.bf16.mxu0 %v16910_v0 }
 0xe3a   : > { %16019 = vmatpush3.bf16.msra.mxu1 %v17826_v42 }
 0xe3b   : > { %16020 = vmatprep.subr.bf16.mxu1 %v16910_v0 }
 0xe3c   : > { %15914 = vmatpush3.bf16.msra.mxu0 %v17830_v24 }
 0xe3d   : > { %15915 = vmatprep.subr.bf16.mxu0 %v16910_v0 }
 0xe3e   : > { %16022 = vmatpush3.bf16.msra.mxu1 %v17830_v24 }
 0xe3f   : > { %16023 = vmatprep.subr.bf16.mxu1 %v16910_v0 }
 0xe40   : > { %15917 = vmatpush3.bf16.msra.mxu0 %v17838_v13 }
 0xe41   : > { %15918 = vmatprep.subr.bf16.mxu0 %v16910_v0 }
 0xe42   : > { %16025 = vmatpush3.bf16.msra.mxu1 %v17838_v13 }
 0xe43   : > { %14264 = vmatmul.mubr.f32.vlgmr.msra.gmra.mrb[32].mxu0 %v18984_v19  ;;  %16026 = vmatprep.subr.bf16.mxu1 %v16910_v0 }
 0xe44   : > { %15920 = vmatpush3.bf16.msra.mxu0 %v17842_v45  ;;  %14290 = vmatprep.mubr.msk.f32.mxu0 %vm16911_vm0, %v16912_v1 }
 0xe45   : > { %14426 = vmatmul.mubr.f32.vlgmr.msra.gmra.mrb[26].mxu1 %v18990_v58  ;;  %15921 = vmatprep.subr.bf16.mxu0 %v16910_v0 }
 0xe46   : > { %16028 = vmatpush3.bf16.msra.mxu1 %v17842_v45  ;;  %14452 = vmatprep.mubr.msk.f32.mxu1 %vm16911_vm0, %v16912_v1 }
 0xe47   : > { %16029 = vmatprep.subr.bf16.mxu1 %v16910_v0 }
 0xe48   : > { %15923 = vmatpush3.bf16.msra.mxu0 %v17846_v46 }
 0xe49   : > { %15924 = vmatprep.subr.bf16.mxu0 %v16910_v0 }
 0xe4a   : > { %16031 = vmatpush3.bf16.msra.mxu1 %v17846_v46 }
 0xe4b   : > { %16032 = vmatprep.subr.bf16.mxu1 %v16910_v0 }
 0xe4c   : > { %15926 = vmatpush3.bf16.msra.mxu0 %v17850_v11 }
 0xe4d   : > { %15927 = vmatprep.subr.bf16.mxu0 %v16910_v0 }
 0xe4e   : > { %16034 = vmatpush3.bf16.msra.mxu1 %v17850_v11 }
 0xe4f   : > { %16035 = vmatprep.subr.bf16.mxu1 %v16910_v0 }
 0xe50   : > { %15929 = vmatpush3.bf16.msra.mxu0 %v17854_v2 }
 0xe51   : > { %15930 = vmatprep.subr.bf16.mxu0 %v16910_v0 }
 0xe52   : > { %16037 = vmatpush3.bf16.msra.mxu1 %v17854_v2 }
 0xe53   : > { %16038 = vmatprep.subr.bf16.mxu1 %v16910_v0 }
 0xe54   : > { %15932 = vmatpush3.bf16.msra.mxu0 %v17858_v23 }
 0xe55   : > { %15933 = vmatprep.subr.bf16.mxu0 %v16910_v0 }
 0xe56   : > { %16040 = vmatpush3.bf16.msra.mxu1 %v17858_v23 }
 0xe57   : > { %16041 = vmatprep.subr.bf16.mxu1 %v16910_v0 }
 0xe58   : > { %15935 = vmatpush3.bf16.msra.mxu0 %v17862_v48 }
 0xe59   : > { %15936 = vmatprep.subr.bf16.mxu0 %v16910_v0 }
 0xe5a   : > { %16043 = vmatpush3.bf16.msra.mxu1 %v17862_v48 }
 0xe5b   : > { %14291 = vmatmul.mubr.f32.vlgmr.msra.gmra.mrb[32].mxu0 %v18988_v6  ;;  %16044 = vmatprep.subr.bf16.mxu1 %v16910_v0 }
 0xe5c   : > { %15938 = vmatpush3.bf16.msra.mxu0 %v17690_v30  ;;  %14317 = vmatprep.mubr.msk.f32.mxu0 %vm16911_vm0, %v16912_v1 }
 0xe5d   : > { %14453 = vmatmul.mubr.f32.vlgmr.msra.gmra.mrb[26].mxu1 %v18993_v12  ;;  %15939 = vmatprep.subr.bf16.mxu0 %v16910_v0 }
 0xe5e   : > { %16046 = vmatpush3.bf16.msra.mxu1 %v17690_v30  ;;  %14479 = vmatprep.mubr.msk.f32.mxu1 %vm16911_vm0, %v16912_v1 }
 0xe5f   : > { %16047 = vmatprep.subr.bf16.mxu1 %v16910_v0 }
 0xe60   : > { %15941 = vmatpush3.bf16.msra.mxu0 %v17708_v38 }
 0xe61   : > { %15942 = vmatprep.subr.bf16.mxu0 %v16910_v0 }
 0xe62   : > { %16049 = vmatpush3.bf16.msra.mxu1 %v17708_v38 }
 0xe63   : > { %16050 = vmatprep.subr.bf16.mxu1 %v16910_v0 }
 0xe64   : > { %15944 = vmatpush3.bf16.msra.mxu0 %v17712_v39 }
 0xe65   : > { %15945 = vmatprep.subr.bf16.mxu0 %v16910_v0 }
 0xe66   : > { %16052 = vmatpush3.bf16.msra.mxu1 %v17712_v39 }
 0xe67   : > { %16053 = vmatprep.subr.bf16.mxu1 %v16910_v0 }
 0xe68   : > { %15947 = vmatpush3.bf16.msra.mxu0 %v17726_v49 }
 0xe69   : > { %15948 = vmatprep.subr.bf16.mxu0 %v16910_v0 }
 0xe6a   : > { %16055 = vmatpush3.bf16.msra.mxu1 %v17726_v49 }
 0xe6b   : > { %16056 = vmatprep.subr.bf16.mxu1 %v16910_v0 }
 0xe6c   : > { %15950 = vmatpush3.bf16.msra.mxu0 %v17738_v54 }
 0xe6d   : > { %15951 = vmatprep.subr.bf16.mxu0 %v16910_v0 }
 0xe6e   : > { %16058 = vmatpush3.bf16.msra.mxu1 %v17738_v54 }
 0xe6f   : > { %16059 = vmatprep.subr.bf16.mxu1 %v16910_v0 }
 0xe70   : > { %15953 = vmatpush3.bf16.msra.mxu0 %v17756_v18 }
 0xe71   : > { %15954 = vmatprep.subr.bf16.mxu0 %v16910_v0 }
 0xe72   : > { %16061 = vmatpush3.bf16.msra.mxu1 %v17756_v18 }
 0xe73   : > { %14318 = vmatmul.mubr.f32.vlgmr.msra.gmra.mrb[32].mxu0 %v8617_v9  ;;  %16062 = vmatprep.subr.bf16.mxu1 %v16910_v0 }
 0xe74   : > { %15956 = vmatpush3.bf16.msra.mxu0 %v17995_v36  ;;  %14344 = vmatprep.mubr.msk.f32.mxu0 %vm16911_vm0, %v16912_v1 }
 0xe75   : > { %14480 = vmatmul.mubr.f32.vlgmr.msra.gmra.mrb[26].mxu1 %v9210_v15  ;;  %15957 = vmatprep.subr.bf16.mxu0 %v16910_v0 }
 0xe76   : > { %16064 = vmatpush3.bf16.msra.mxu1 %v17995_v36  ;;  %14506 = vmatprep.mubr.msk.f32.mxu1 %vm16911_vm0, %v16912_v1 }
 0xe77   : > { %16065 = vmatprep.subr.bf16.mxu1 %v16910_v0 }
 0xe78   : > { %15959 = vmatpush3.bf16.msra.mxu0 %v18007_v57 }
 0xe79   : > { %15960 = vmatprep.subr.bf16.mxu0 %v16910_v0 }
 0xe7a   : > { %16067 = vmatpush3.bf16.msra.mxu1 %v18007_v57 }
 0xe7b   : > { %16068 = vmatprep.subr.bf16.mxu1 %v16910_v0 }
 0xe7c   : > { %15962 = vmatpush3.bf16.msra.mxu0 %v18023_v60 }
 0xe7d   : > { %15963 = vmatprep.subr.bf16.mxu0 %v16910_v0 }
 0xe7e   : > { %16070 = vmatpush3.bf16.msra.mxu1 %v18023_v60 }
 0xe7f   : > { %16071 = vmatprep.subr.bf16.mxu1 %v16910_v0 }
 0xe80   : > { %15965 = vmatpush3.bf16.msra.mxu0 %v18033_v26 }
 0xe81   : > { %15966 = vmatprep.subr.bf16.mxu0 %v16910_v0 }
 0xe82   : > { %16073 = vmatpush3.bf16.msra.mxu1 %v18033_v26 }
 0xe83   : > { %16074 = vmatprep.subr.bf16.mxu1 %v16910_v0 }
 0xe84   : > { %15968 = vmatpush3.bf16.msra.mxu0 %v18043_v20 }
 0xe85   : > { %15969 = vmatprep.subr.bf16.mxu0 %v16910_v0 }
 0xe86   : > { %16076 = vmatpush3.bf16.msra.mxu1 %v18043_v20 }
 0xe87   : > { %16077 = vmatprep.subr.bf16.mxu1 %v16910_v0 }
 0xe88   : > { %15971 = vmatpush3.bf16.msra.mxu0 %v18053_v40 }
 0xe89   : > { %15972 = vmatprep.subr.bf16.mxu0 %v16910_v0 }
 0xe8a   : > { %16079 = vmatpush3.bf16.msra.mxu1 %v18053_v40 }
 0xe8b   : > { %14345 = vmatmul.mubr.f32.vlgmr.msra.gmra.mrb[32].mxu0 %v18984_v19  ;;  %16080 = vmatprep.subr.bf16.mxu1 %v16910_v0 }
 0xe8c   : > { %15974 = vmatpush3.bf16.msra.mxu0 %v17690_v30  ;;  %14371 = vmatprep.mubr.msk.f32.mxu0 %vm16911_vm0, %v16912_v1 }
 0xe8d   : > { %14507 = vmatmul.mubr.f32.vlgmr.msra.gmra.mrb[26].mxu1 %v18990_v58  ;;  %15975 = vmatprep.subr.bf16.mxu0 %v16910_v0 }
 0xe8e   : > { %16082 = vmatpush3.bf16.msra.mxu1 %v17690_v30  ;;  %14533 = vmatprep.mubr.msk.f32.mxu1 %vm16911_vm0, %v16912_v1 }
 0xe8f   : > { %16083 = vmatprep.subr.bf16.mxu1 %v16910_v0 }
 0xe90   : > { %15977 = vmatpush3.bf16.msra.mxu0 %v17708_v38 }
 0xe91   : > { %15978 = vmatprep.subr.bf16.mxu0 %v16910_v0 }
 0xe92   : > { %16085 = vmatpush3.bf16.msra.mxu1 %v17708_v38 }
 0xe93   : > { %16086 = vmatprep.subr.bf16.mxu1 %v16910_v0 }
 0xe94   : > { %15980 = vmatpush3.bf16.msra.mxu0 %v17712_v39 }
 0xe95   : > { %15981 = vmatprep.subr.bf16.mxu0 %v16910_v0 }
 0xe96   : > { %16088 = vmatpush3.bf16.msra.mxu1 %v17712_v39 }
 0xe97   : > { %16089 = vmatprep.subr.bf16.mxu1 %v16910_v0 }
 0xe98   : > { %15983 = vmatpush3.bf16.msra.mxu0 %v17726_v49 }
 0xe99   : > { %15984 = vmatprep.subr.bf16.mxu0 %v16910_v0 }
 0xe9a   : > { %16091 = vmatpush3.bf16.msra.mxu1 %v17726_v49 }
 0xe9b   : > { %16092 = vmatprep.subr.bf16.mxu1 %v16910_v0 }
 0xe9c   : > { %15986 = vmatpush3.bf16.msra.mxu0 %v17738_v54 }
 0xe9d   : > { %15987 = vmatprep.subr.bf16.mxu0 %v16910_v0 }
 0xe9e   : > { %16094 = vmatpush3.bf16.msra.mxu1 %v17738_v54 }
 0xe9f   : > { %16095 = vmatprep.subr.bf16.mxu1 %v16910_v0 }
 0xea0   : > { %15989 = vmatpush3.bf16.msra.mxu0 %v17756_v18 }
 0xea1   : > { %14536 = vmatprep.subr.bf16.mxu0 %v16912_v1 }
 0xea2   : > { %16097 = vmatpush3.bf16.msra.mxu1 %v17756_v18 }
 0xea3   : > { %14372 = vmatmul.mubr.f32.vlgmr.msra.gmra.mrb[32].mxu0 %v18984_v19  ;;  %16098 = vmatprep.subr.bf16.mxu1 %v16910_v0  ;;  %v9735_v19 = vrot.slane %v18727_v55, %v4749_v47 }
 0xea4   : > { %14548 = vmatprep.mubr.msk.bf16.mxu0 %vm16911_vm0, %v16912_v1  ;;  %14537 = vmatpush3.bf16.msra.mxu0 %v16620_v44 }
 0xea5   : > { %14534 = vmatmul.mubr.f32.vlgmr.msra.gmra.mrb[26].mxu1 %v18990_v58  ;;  %14538 = vmatprep.subr.bf16.mxu0 %v16912_v1 }
 0xea6   : > { %16100 = vmatpush3.bf16.msra.mxu1 %v17690_v30  ;;  %14576 = vmatprep.mubr.msk.f32.mxu1 %vm16911_vm0, %v16912_v1 }
 0xea7   : > { %16101 = vmatprep.subr.bf16.mxu1 %v16910_v0 }
 0xea8   : > { %14539 = vmatpush3.bf16.msra.mxu0 %v16621_v34 }
 0xea9   : > { %14540 = vmatprep.subr.bf16.mxu0 %v16912_v1 }
 0xeaa   : > { %16103 = vmatpush3.bf16.msra.mxu1 %v17708_v38 }
 0xeab   : > { %16104 = vmatprep.subr.bf16.mxu1 %v16910_v0 }
 0xeac   : > { %14541 = vmatpush3.bf16.msra.mxu0 %v16622_v8 }
 0xead   : > { %14542 = vmatprep.subr.bf16.mxu0 %v16912_v1 }
 0xeae   : > { %16106 = vmatpush3.bf16.msra.mxu1 %v17712_v39 }
 0xeaf   : > { %16107 = vmatprep.subr.bf16.mxu1 %v16910_v0 }
 0xeb0   : > { %14543 = vmatpush3.bf16.msra.mxu0 %v16623_v33 }
 0xeb1   : > { %14544 = vmatprep.subr.bf16.mxu0 %v16912_v1 }
 0xeb2   : > { %16109 = vmatpush3.bf16.msra.mxu1 %v17726_v49 }
 0xeb3   : > { %16110 = vmatprep.subr.bf16.mxu1 %v16910_v0 }
 0xeb4   : > { %14545 = vmatpush3.bf16.msra.mxu0 %v16624_v62 }
 0xeb5   : > { %14546 = vmatprep.subr.bf16.mxu0 %v16912_v1 }
 0xeb6   : > { %16112 = vmatpush3.bf16.msra.mxu1 %v17738_v54 }
 0xeb7   : > { %16113 = vmatprep.subr.bf16.mxu1 %v16910_v0 }
 0xeb8   : > { %14547 = vmatpush3.bf16.msra.mxu0 %v16625_v63 }
 0xeb9   : > { %16206 = vmatprep.subr.bf16.mxu0 %v16910_v0 }
 0xeba   : > { %16115 = vmatpush3.bf16.msra.mxu1 %v17756_v18 }
 0xebb   : > { %16116 = vmatprep.subr.bf16.mxu1 %v16910_v0 }
 0xf76   : > { %v9123_v61 = vpop.f32.mrb[32].mxu0 }
 0xf77   : > { %v9720_v4 = vmul.f32 %v9123_v61, %v9123_v61  ;;  %v14373_v32 = vpop.f32.mrb[33].mxu0  ;;  %v9723_v25 = vsub.f32 %v18978_v14, %v9123_v61 }
 0xf78   : > { %v9716_v37 = vpop.f32.mrb[26].mxu1 }
 0xf79   : > { %v9721_v29 = vsub.f32 %v9716_v37, %v9720_v4  ;;  %v14535_v21 = vpop.f32.mrb[27].mxu1 }
 0xf7b   : > { %v9722_v35 = vmax.f32 %v9721_v29, 0.0 }
 0xf7d   : > { %v9724_v31 = vadd.f32 1e-05, %v9722_v35 }
 0xf7f   : > { %16640 = vrsqrt.f32 %v9724_v31 }
 0xf89   : > { %v16641_v50 = vpop.eup %16640 }
 0xf8a   : > { %v9726_v53 = vmul.f32 %v16641_v50, %v9723_v25 }
 0xf8c   : > { %v9731_v27 = vmul.f32 %v9730_v43, %v9726_v53 }
 0xf8e   : > { %v9736_v6 = vadd.f32 %v9735_v19, %v9731_v27 }
 0xf90   : > { %v9737_v58 = vmax.f32 %v9736_v6, 0.0 }
 0xf92   : > { %v9738_v12 = vpack.c.bf16 %v9737_v58, %v9737_v58 }
 0xf94   : > { %14549 = vmatmul.mubr.msk.bf16.vlgmr.msra.gmra.mrb[36].mxu0 %vm2250_vm5, %v9738_v12 }
 0xf95   : > { %16208 = vmatpush3.bf16.msra.mxu0 %v17690_v30  ;;  %14738 = vmatprep.mubr.msk.f32.mxu0 %vm16911_vm0, %v16912_v1 }
 0xf96   : > { %16209 = vmatprep.subr.bf16.mxu0 %v16910_v0 }
 0xf99   : > { %16211 = vmatpush3.bf16.msra.mxu0 %v17708_v38 }
 0xf9a   : > { %16212 = vmatprep.subr.bf16.mxu0 %v16910_v0 }
 0xf9d   : > { %16214 = vmatpush3.bf16.msra.mxu0 %v17712_v39 }
 0xf9e   : > { %16215 = vmatprep.subr.bf16.mxu0 %v16910_v0 }
 0xfa1   : > { %16217 = vmatpush3.bf16.msra.mxu0 %v17726_v49 }
 0xfa2   : > { %16218 = vmatprep.subr.bf16.mxu0 %v16910_v0 }
 0xfa5   : > { %16220 = vmatpush3.bf16.msra.mxu0 %v17738_v54 }
 0xfa6   : > { %16221 = vmatprep.subr.bf16.mxu0 %v16910_v0 }
 0xfa9   : > { %16223 = vmatpush3.bf16.msra.mxu0 %v17756_v18 }
 0xfaa   : > { %16224 = vmatprep.subr.bf16.mxu0 %v16910_v0 }
0x1067   : > { %v9828_v47 = vpop.f32.mrb[36].mxu0 }
0x1068   : > { %v19220_v14 = vadd.f32 %v9828_v47, %v9754_v5  ;;  %v14550_v9 = vpop.f32.mrb[37].mxu0 }
0x1069   : > { %v9831_v28 = vpop.f32.mrb[38].mxu0 }
0x106a   : > { %v9835_v15 = vsel %vm2250_vm5, %v19220_v14, 0  ;;  %v10426_v41 = vmul.f32 %v19220_v14, %v19220_v14  ;;  %v14551_v22 = vpop.f32.mrb[39].mxu0 }
0x106b   : > { %v19226_v16 = vand.u32 4294901760, %v9835_v15 }
0x106c   : > { %v10428_v44 = vsel %vm2250_vm5, %v10426_v41, 0 }
0x106d   : > { %v19230_v34 = vsub.f32 %v9835_v15, %v19226_v16  ;;  %v19232_v17 = vand.u32 4294901760, %v10428_v44 }
0x106f   : > { %v19235_v55 = vsub.f32 %v10428_v44, %v19232_v17  ;;  %v9916_v8 = vand.u32 4294901760, %v19230_v34 }
0x1071   : > { %v9917_v33 = vsub.f32 %v19230_v34, %v9916_v8  ;;  %v10509_v62 = vand.u32 4294901760, %v19235_v55 }
0x1073   : > { %v9918_v63 = vand.u32 4294901760, %v9917_v33  ;;  %v10510_v61 = vsub.f32 %v19235_v55, %v10509_v62 }
0x1075   : > { %14577 = vmatmul.mubr.f32.vlgmr.msra.gmra.mrb[32].mxu1 %v9918_v63  ;;  %v10511_v4 = vand.u32 4294901760, %v10510_v61 }
0x1076   : > { %16118 = vmatpush3.bf16.msra.mxu1 %v17774_v56  ;;  %14603 = vmatprep.mubr.msk.f32.mxu1 %vm16911_vm0, %v16912_v1 }
0x1077   : > { %14739 = vmatmul.mubr.f32.vlgmr.msra.gmra.mrb[34].mxu0 %v10511_v4  ;;  %16119 = vmatprep.subr.bf16.mxu1 %v16910_v0 }
0x1078   : > { %16226 = vmatpush3.bf16.msra.mxu0 %v17774_v56  ;;  %14765 = vmatprep.mubr.msk.f32.mxu0 %vm16911_vm0, %v16912_v1 }
0x1079   : > { %16227 = vmatprep.subr.bf16.mxu0 %v16910_v0 }
0x107a   : > { %16121 = vmatpush3.bf16.msra.mxu1 %v17788_v51 }
0x107b   : > { %16122 = vmatprep.subr.bf16.mxu1 %v16910_v0 }
0x107c   : > { %16229 = vmatpush3.bf16.msra.mxu0 %v17788_v51 }
0x107d   : > { %16230 = vmatprep.subr.bf16.mxu0 %v16910_v0 }
0x107e   : > { %16124 = vmatpush3.bf16.msra.mxu1 %v17802_v7 }
0x107f   : > { %16125 = vmatprep.subr.bf16.mxu1 %v16910_v0 }
0x1080   : > { %16232 = vmatpush3.bf16.msra.mxu0 %v17802_v7 }
0x1081   : > { %16233 = vmatprep.subr.bf16.mxu0 %v16910_v0 }
0x1082   : > { %16127 = vmatpush3.bf16.msra.mxu1 %v17826_v42 }
0x1083   : > { %16128 = vmatprep.subr.bf16.mxu1 %v16910_v0 }
0x1084   : > { %16235 = vmatpush3.bf16.msra.mxu0 %v17826_v42 }
0x1085   : > { %16236 = vmatprep.subr.bf16.mxu0 %v16910_v0 }
0x1086   : > { %16130 = vmatpush3.bf16.msra.mxu1 %v17830_v24 }
0x1087   : > { %16131 = vmatprep.subr.bf16.mxu1 %v16910_v0 }
0x1088   : > { %16238 = vmatpush3.bf16.msra.mxu0 %v17830_v24 }
0x1089   : > { %16239 = vmatprep.subr.bf16.mxu0 %v16910_v0 }
0x108a   : > { %16133 = vmatpush3.bf16.msra.mxu1 %v17838_v13 }
0x108b   : > { %16134 = vmatprep.subr.bf16.mxu1 %v16910_v0 }
0x108c   : > { %16241 = vmatpush3.bf16.msra.mxu0 %v17838_v13 }
0x108d   : > { %14604 = vmatmul.mubr.f32.vlgmr.msra.gmra.mrb[32].mxu1 %v19226_v16  ;;  %16242 = vmatprep.subr.bf16.mxu0 %v16910_v0 }
0x108e   : > { %16136 = vmatpush3.bf16.msra.mxu1 %v17842_v45  ;;  %14630 = vmatprep.mubr.msk.f32.mxu1 %vm16911_vm0, %v16912_v1 }
0x108f   : > { %14766 = vmatmul.mubr.f32.vlgmr.msra.gmra.mrb[34].mxu0 %v19232_v17  ;;  %16137 = vmatprep.subr.bf16.mxu1 %v16910_v0 }
0x1090   : > { %16244 = vmatpush3.bf16.msra.mxu0 %v17842_v45  ;;  %14792 = vmatprep.mubr.msk.f32.mxu0 %vm16911_vm0, %v16912_v1 }
0x1091   : > { %16245 = vmatprep.subr.bf16.mxu0 %v16910_v0 }
0x1092   : > { %16139 = vmatpush3.bf16.msra.mxu1 %v17846_v46 }
0x1093   : > { %16140 = vmatprep.subr.bf16.mxu1 %v16910_v0 }
0x1094   : > { %16247 = vmatpush3.bf16.msra.mxu0 %v17846_v46 }
0x1095   : > { %16248 = vmatprep.subr.bf16.mxu0 %v16910_v0 }
0x1096   : > { %16142 = vmatpush3.bf16.msra.mxu1 %v17850_v11 }
0x1097   : > { %16143 = vmatprep.subr.bf16.mxu1 %v16910_v0 }
0x1098   : > { %16250 = vmatpush3.bf16.msra.mxu0 %v17850_v11  ;;  %v16649_v11 = vld [vmem:[%s19500_s16 + $0x8] sm:$0xff] }
0x1099   : > { %16251 = vmatprep.subr.bf16.mxu0 %v16910_v0 }
0x109a   : > { %16145 = vmatpush3.bf16.msra.mxu1 %v17854_v2 }
0x109b   : > { %16146 = vmatprep.subr.bf16.mxu1 %v16910_v0 }
0x109c   : > { %16253 = vmatpush3.bf16.msra.mxu0 %v17854_v2  ;;  %v11029_v2 = vrot.slane %v16649_v11, %v7072_v52 }
0x109d   : > { %16254 = vmatprep.subr.bf16.mxu0 %v16910_v0 }
0x109e   : > { %16148 = vmatpush3.bf16.msra.mxu1 %v17858_v23 }
0x109f   : > { %16149 = vmatprep.subr.bf16.mxu1 %v16910_v0 }
0x10a0   : > { %16256 = vmatpush3.bf16.msra.mxu0 %v17858_v23 }
0x10a1   : > { %16257 = vmatprep.subr.bf16.mxu0 %v16910_v0 }
0x10a2   : > { %16151 = vmatpush3.bf16.msra.mxu1 %v17862_v48 }
0x10a3   : > { %16152 = vmatprep.subr.bf16.mxu1 %v16910_v0 }
0x10a4   : > { %16259 = vmatpush3.bf16.msra.mxu0 %v17862_v48  ;;  %v11349_v48 = vld [vmem:[%s19500_s16 + $0x10] ss:$0 sm:$0xff] }
0x10a5   : > { %14631 = vmatmul.mubr.f32.vlgmr.msra.gmra.mrb[32].mxu1 %v19230_v34  ;;  %16260 = vmatprep.subr.bf16.mxu0 %v16910_v0 }
0x10a6   : > { %16154 = vmatpush3.bf16.msra.mxu1 %v17690_v30  ;;  %14657 = vmatprep.mubr.msk.f32.mxu1 %vm16911_vm0, %v16912_v1 }
0x10a7   : > { %14793 = vmatmul.mubr.f32.vlgmr.msra.gmra.mrb[34].mxu0 %v19235_v55  ;;  %16155 = vmatprep.subr.bf16.mxu1 %v16910_v0 }
0x10a8   : > { %16262 = vmatpush3.bf16.msra.mxu0 %v17690_v30  ;;  %14819 = vmatprep.mubr.msk.f32.mxu0 %vm16911_vm0, %v16912_v1 }
0x10a9   : > { %16263 = vmatprep.subr.bf16.mxu0 %v16910_v0 }
0x10aa   : > { %16157 = vmatpush3.bf16.msra.mxu1 %v17708_v38 }
0x10ab   : > { %16158 = vmatprep.subr.bf16.mxu1 %v16910_v0 }
0x10ac   : > { %16265 = vmatpush3.bf16.msra.mxu0 %v17708_v38 }
0x10ad   : > { %16266 = vmatprep.subr.bf16.mxu0 %v16910_v0 }
0x10ae   : > { %16160 = vmatpush3.bf16.msra.mxu1 %v17712_v39 }
0x10af   : > { %16161 = vmatprep.subr.bf16.mxu1 %v16910_v0 }
0x10b0   : > { %16268 = vmatpush3.bf16.msra.mxu0 %v17712_v39 }
0x10b1   : > { %16269 = vmatprep.subr.bf16.mxu0 %v16910_v0 }
0x10b2   : > { %16163 = vmatpush3.bf16.msra.mxu1 %v17726_v49 }
0x10b3   : > { %16164 = vmatprep.subr.bf16.mxu1 %v16910_v0 }
0x10b4   : > { %16271 = vmatpush3.bf16.msra.mxu0 %v17726_v49 }
0x10b5   : > { %16272 = vmatprep.subr.bf16.mxu0 %v16910_v0 }
0x10b6   : > { %16166 = vmatpush3.bf16.msra.mxu1 %v17738_v54 }
0x10b7   : > { %16167 = vmatprep.subr.bf16.mxu1 %v16910_v0 }
0x10b8   : > { %16274 = vmatpush3.bf16.msra.mxu0 %v17738_v54 }
0x10b9   : > { %16275 = vmatprep.subr.bf16.mxu0 %v16910_v0 }
0x10ba   : > { %16169 = vmatpush3.bf16.msra.mxu1 %v17756_v18 }
0x10bb   : > { %16170 = vmatprep.subr.bf16.mxu1 %v16910_v0 }
0x10bc   : > { %16277 = vmatpush3.bf16.msra.mxu0 %v17756_v18 }
0x10bd   : > { %14658 = vmatmul.mubr.f32.vlgmr.msra.gmra.mrb[32].mxu1 %v9916_v8  ;;  %16278 = vmatprep.subr.bf16.mxu0 %v16910_v0 }
0x10be   : > { %16172 = vmatpush3.bf16.msra.mxu1 %v17995_v36  ;;  %14684 = vmatprep.mubr.msk.f32.mxu1 %vm16911_vm0, %v16912_v1 }
0x10bf   : > { %14820 = vmatmul.mubr.f32.vlgmr.msra.gmra.mrb[34].mxu0 %v10509_v62  ;;  %16173 = vmatprep.subr.bf16.mxu1 %v16910_v0 }
0x10c0   : > { %16280 = vmatpush3.bf16.msra.mxu0 %v17995_v36  ;;  %14846 = vmatprep.mubr.msk.f32.mxu0 %vm16911_vm0, %v16912_v1 }
0x10c1   : > { %16281 = vmatprep.subr.bf16.mxu0 %v16910_v0 }
0x10c2   : > { %16175 = vmatpush3.bf16.msra.mxu1 %v18007_v57 }
0x10c3   : > { %16176 = vmatprep.subr.bf16.mxu1 %v16910_v0 }
0x10c4   : > { %16283 = vmatpush3.bf16.msra.mxu0 %v18007_v57 }
0x10c5   : > { %16284 = vmatprep.subr.bf16.mxu0 %v16910_v0 }
0x10c6   : > { %16178 = vmatpush3.bf16.msra.mxu1 %v18023_v60 }
0x10c7   : > { %16179 = vmatprep.subr.bf16.mxu1 %v16910_v0 }
0x10c8   : > { %16286 = vmatpush3.bf16.msra.mxu0 %v18023_v60 }
0x10c9   : > { %16287 = vmatprep.subr.bf16.mxu0 %v16910_v0 }
0x10ca   : > { %16181 = vmatpush3.bf16.msra.mxu1 %v18033_v26 }
0x10cb   : > { %16182 = vmatprep.subr.bf16.mxu1 %v16910_v0 }
0x10cc   : > { %16289 = vmatpush3.bf16.msra.mxu0 %v18033_v26 }
0x10cd   : > { %16290 = vmatprep.subr.bf16.mxu0 %v16910_v0 }
0x10ce   : > { %16184 = vmatpush3.bf16.msra.mxu1 %v18043_v20 }
0x10cf   : > { %16185 = vmatprep.subr.bf16.mxu1 %v16910_v0 }
0x10d0   : > { %16292 = vmatpush3.bf16.msra.mxu0 %v18043_v20 }
0x10d1   : > { %16293 = vmatprep.subr.bf16.mxu0 %v16910_v0 }
0x10d2   : > { %16187 = vmatpush3.bf16.msra.mxu1 %v18053_v40 }
0x10d3   : > { %16188 = vmatprep.subr.bf16.mxu1 %v16910_v0 }
0x10d4   : > { %16295 = vmatpush3.bf16.msra.mxu0 %v18053_v40 }
0x10d5   : > { %14685 = vmatmul.mubr.f32.vlgmr.msra.gmra.mrb[32].mxu1 %v19226_v16  ;;  %16296 = vmatprep.subr.bf16.mxu0 %v16910_v0 }
0x10d6   : > { %16190 = vmatpush3.bf16.msra.mxu1 %v17690_v30  ;;  %14711 = vmatprep.mubr.msk.f32.mxu1 %vm16911_vm0, %v16912_v1 }
0x10d7   : > { %14847 = vmatmul.mubr.f32.vlgmr.msra.gmra.mrb[34].mxu0 %v19232_v17  ;;  %16191 = vmatprep.subr.bf16.mxu1 %v16910_v0 }
0x10d8   : > { %16298 = vmatpush3.bf16.msra.mxu0 %v17690_v30  ;;  %14873 = vmatprep.mubr.msk.f32.mxu0 %vm16911_vm0, %v16912_v1  ;;  %v16626_v30 = vld [vmem:[%s19560_s2] sm:$0xff]  }
0x10d9   : > { %16299 = vmatprep.subr.bf16.mxu0 %v16910_v0 }
0x10da   : > { %16193 = vmatpush3.bf16.msra.mxu1 %v17708_v38 }
0x10db   : > { %16194 = vmatprep.subr.bf16.mxu1 %v16910_v0 }
0x10dc   : > { %16301 = vmatpush3.bf16.msra.mxu0 %v17708_v38  ;;  %v16628_v38 = vld [vmem:[%s19560_s2 + $0x10] sm:$0xff]  }
0x10dd   : > { %16302 = vmatprep.subr.bf16.mxu0 %v16910_v0 }
0x10de   : > { %16196 = vmatpush3.bf16.msra.mxu1 %v17712_v39 }
0x10df   : > { %16197 = vmatprep.subr.bf16.mxu1 %v16910_v0 }
0x10e0   : > { %16304 = vmatpush3.bf16.msra.mxu0 %v17712_v39  ;;  %v16629_v39 = vld [vmem:[%s19560_s2 + $0x18] sm:$0xff]  }
0x10e1   : > { %16305 = vmatprep.subr.bf16.mxu0 %v16910_v0 }
0x10e2   : > { %16199 = vmatpush3.bf16.msra.mxu1 %v17726_v49 }
0x10e3   : > { %16200 = vmatprep.subr.bf16.mxu1 %v16910_v0 }
0x10e4   : > { %16307 = vmatpush3.bf16.msra.mxu0 %v17726_v49  ;;  %v16630_v49 = vld [vmem:[%s19560_s2 + $0x20] sm:$0xff]  }
0x10e5   : > { %16308 = vmatprep.subr.bf16.mxu0 %v16910_v0 }
0x10e6   : > { %16202 = vmatpush3.bf16.msra.mxu1 %v17738_v54 }
0x10e7   : > { %16203 = vmatprep.subr.bf16.mxu1 %v16910_v0 }
0x10e8   : > { %16310 = vmatpush3.bf16.msra.mxu0 %v17738_v54  ;;  %v16631_v54 = vld [vmem:[%s19560_s2 + $0x28] sm:$0xff]  }
0x10e9   : > { %16311 = vmatprep.subr.bf16.mxu0 %v16910_v0  ;;  %v16627_v0 = vld [vmem:[%s19560_s2 + $0x8] sm:$0xff]   ;;  %s19438_s2 = scalar_lea.hbm %s19562_s29, %s11358_s6  ;;  %s16826_s6 = scalar_lea.vmem %s16825_s10, 256 }
0x10ea   : > { %16205 = vmatpush3.bf16.msra.mxu1 %v17756_v18 }
0x10eb   : > { %14876 = vmatprep.subr.bf16.mxu1 %v16912_v1 }
0x10ec   : > { %16313 = vmatpush3.bf16.msra.mxu0 %v17756_v18 }
0x10ed   : > { %14712 = vmatmul.mubr.f32.vlgmr.msra.gmra.mrb[32].mxu1 %v19226_v16 }
0x10ee   : > { %14888 = vmatprep.mubr.msk.bf16.mxu1 %vm16911_vm0, %v16912_v1  ;;  %14877 = vmatpush3.bf16.msra.mxu1 %v16626_v30 }
0x10ef   : > { %14874 = vmatmul.mubr.f32.vlgmr.msra.gmra.mrb[34].mxu0 %v19232_v17  ;;  %14878 = vmatprep.subr.bf16.mxu1 %v16912_v1 }
0x10f2   : > { %14879 = vmatpush3.bf16.msra.mxu1 %v16627_v0 }
0x10f3   : > { %14880 = vmatprep.subr.bf16.mxu1 %v16912_v1 }
0x10f6   : > { %14881 = vmatpush3.bf16.msra.mxu1 %v16628_v38 }
0x10f7   : > { %14882 = vmatprep.subr.bf16.mxu1 %v16912_v1 }
0x10fa   : > { %14883 = vmatpush3.bf16.msra.mxu1 %v16629_v39 }
0x10fb   : > { %14884 = vmatprep.subr.bf16.mxu1 %v16912_v1 }
0x10fe   : > { %14885 = vmatpush3.bf16.msra.mxu1 %v16630_v49 }
0x10ff   : > { %14886 = vmatprep.subr.bf16.mxu1 %v16912_v1 }
0x1102   : > { %14887 = vmatpush3.bf16.msra.mxu1 %v16631_v54 }
0x11c0   : > { %v10422_v18 = vpop.f32.mrb[32].mxu1 }
0x11c1   : > { %v11019_v56 = vmul.f32 %v10422_v18, %v10422_v18  ;;  %v14713_v51 = vpop.f32.mrb[33].mxu1  ;;  %v11022_v46 = vsub.f32 %v19220_v14, %v10422_v18 }
0x11c2   : > { %v11015_v7 = vpop.f32.mrb[34].mxu0 }
0x11c3   : > { %v11020_v42 = vsub.f32 %v11015_v7, %v11019_v56  ;;  %v14875_v24 = vpop.f32.mrb[35].mxu0 }
0x11c5   : > { %v11021_v13 = vmax.f32 %v11020_v42, 0.0 }
0x11c7   : > { %v11023_v45 = vadd.f32 1e-05, %v11021_v13 }
0x11c9   : > { %16642 = vrsqrt.f32 %v11023_v45 }
0x11d3   : > { %v16643_v1 = vpop.eup %16642 }
0x11d4   : > { %v11025_v23 = vmul.f32 %v16643_v1, %v11022_v46 }
0x11d6   : > { %v11030_v36 = vmul.f32 %v11029_v2, %v11025_v23 }
0x11d8   : > { %v11035_v57 = vadd.f32 %v11349_v48, %v11030_v36 }
0x11da   : > { %v11036_v60 = vadd.f32 %v11035_v57, %v18956_v3 }
0x11dc   : > { %v11037_v26 = vmax.f32 %v11036_v60, 0.0 }
0x11de   : > { %v11038_v20 = vpack.c.bf16 %v11037_v26, %v11037_v26 }
0x11e0   : > { %14889 = vmatmul.mubr.msk.bf16.vlgmr.msra.gmra.mrb[36].mxu1 %vm2250_vm5, %v11038_v20 }
0x12b3   : > { %v11124_v40 = vpop.f32.mrb[36].mxu1 }
0x12b4   : > { %v14890_v32 = vpop.f32.mrb[37].mxu1  ;;  %v11131_v37 = vsel %vm11130_vm9, %v11124_v40, -inf }
0x12b5   : > { %11132 = vmax.xlane.f32.xlu0 %v11131_v37  ;;  %v11127_v59 = vpop.f32.mrb[38].mxu1 }
0x12b6   : > { %v14891_v52 = vpop.f32.mrb[39].mxu1 }
0x1342   : > { %v11133_v29 = vpop.xlane.xlu0 %11132 }
0x1343   : > { %v11134_v21 = vsub.f32 %v11124_v40, %v11133_v29 }
0x1345   : > { %v11135_v35 = vmul.f32 1.442695, %v11134_v21 }
0x1347   : > { %16644 = vpow2.f32 %v11135_v35 }
0x1351   : > { %v16645_v31 = vpop.eup %16644 }
0x1352   : > { %v11137_v25 = vsel %vm11130_vm9, %v16645_v31, 0.0 }
0x1353   : > { %11138 = vadd.xlane.f32.xlu0 %v11137_v25 }
0x13e0   : > { %v11139_v3 = vpop.xlane.xlu0 %11138 }
0x13e1   : > { %16646 = vrcp.f32 %v11139_v3 }
0x13eb   : > { %v16647_v43 = vpop.eup %16646 }
0x13ec   : > { %v11141_v50 = vmul.f32 %v16647_v43, %v16645_v31 }
0x13ee   : > { %11143 = vrot.lane.b32.xlu1 %v11141_v50, %s16914_s7  ;;  %s16820_s7 = scalar_lea.vmem %s19440_s5, 128 }
0x13ef   : > { %p16821_p7 = scmp.ne.s32.totalorder %s19440_s5, %s16820_s7  ;;  %p16828_p0 = scmp.lt.s32.totalorder %s16826_s6, %s16820_s7 }
0x13f1   : > { %p16822_p12 = pnand %p16821_p7, %p19563_p4  ;;  %p16829_p2 = por %p16828_p0, %p16827_p13 }
0x13f3   : > { %p16823_p1 = pneg %p16822_p12 }
0x13f5   : > { %p16830_p3 = pnand %p16829_p2, %p16823_p1 }
0x1460   : > { %v11144_v53 = vpop.permute.xlu1 %11143 }
0x1461   : > { %v11146_v19 = vsel %vm4849_vm6, %v18394_v10, %v11144_v53 }
0x1462   : > { %11148 = vst.msk [vmem:[%s634_s1] sm:$0xff] %vm11147_vm10, %v11146_v19 }
0x1463   : > { %16833 = shalt.err (!%p16830_p3)
}
0x1464   : > { %s16834_s4 = scalar_lea.hbm %s19438_s2, 128  ;;  %s16838_s8 = scalar_lea.hbm %s19562_s29, 256 }
0x1465   : > { %p16835_p6 = scmp.ne.s32.totalorder %s19438_s2, %s16834_s4  ;;  %p16839_p8 = scmp.lt.u32.totalorder %s19438_s2, %s19562_s29 }
0x1466   : > { %p16840_p5 = scmp.lt.u32.totalorder %s16838_s8, %s16834_s4  ;;  %p16842_p7 = scmp.lt.u32.totalorder %s16834_s4, %s19438_s2 }
0x1467   : > { %p16836_p10 = pnand %p16835_p6, %p19563_p4 }
0x1468   : > { %p16841_p9 = por %p16840_p5, %p16839_p8 }
0x1469   : > { %p16837_p11 = pneg %p16836_p10 }
0x146a   : > { %p16843_p12 = por %p16842_p7, %p16841_p9 }
0x146c   : > { %p16844_p1 = pnand %p16843_p12, %p16837_p11 }
0x146e   : > { %16847 = shalt.err (!%p16844_p1)
}
0x146f   : > { %16500 = dma.vmem_to_hbm [thread:$0]  (%p19563_p4), %s19440_s5, 128, %s19438_s2, %s11150_s0  }
0x1470 PF: > { %s11175_s7 = sand.u32 1, %s16886_s24   ;;  %p19564_p13 = scmp.ne.s32.totalorder %s19544_s9, 0 }
0x1471   : > { %p19565_p0 = scmp.ge.s32.totalorder %s16898_s27, 2  ;;  %s11176_s6 = scalar_lea.sflag [#allocation4], %s11175_s7 }
0x1473   : > { %p16523_p2 = pnand %p19565_p0, %p19564_p13 }
0x1475   : > { %16881 = dma.done.wait (!%p16523_p2), %s11176_s6, 128  }
0x1476   : > { %16883 = vsyncadd (!%p16523_p2), %s11176_s6, 4294967168  ;;  %p33_p3 = scmp.ge.s32.totalorder %s17173_s3, 4   ;;  %s19566_s24 = smov %s16890_s25 }
0x1477   : > { %s19567_s25 = smov %s16894_s26  ;;  %s19568_s26 = smov %s17185_s23 }
0x1478   : > { %s19569_s27 = smov %s17173_s3  ;;  %35 = sbr.rel (!%p33_p3) target bundleno = 22 (0x16), region = 153 }
0x147f   :  { %11181 = vsyncpa [#allocation3], 1 }
0x1480   :  { %11183 = vsyncpa [#allocation3 + $0x1], 1 }
0x1481   :  { %11184 = vsyncpa [#allocation6], 1 }
0x1482   :  { %11185 = vsyncpa [#allocation9], 1 }
0x1483   :  { %11186 = vsyncpa [#allocation12], 1 }
0x1484   :  { %11187 = vsyncpa [#allocation4], 1 }
0x1485   :  { %11189 = vsyncpa [#allocation4 + $0x1], 1 }

</bundles_post_ra>
